<compile_context>
chip_gen: v5e
topology: v5e:2x2
jax: 0.10.0
libtpu: 0.0.40
codegen_flags: <defaults>
</compile_context>

<pallas_src>
import functools
import math

import jax
import jax.numpy as jnp
from jax.experimental import pallas as pl
from jax.experimental.pallas import tpu as pltpu


def _layernorm(x, g, b, eps=1e-6):
    # Matches torch.nn.LayerNorm(embedding_dim, eps=1e-06): biased variance + affine.
    mu = jnp.mean(x, axis=-1, keepdims=True)
    var = jnp.mean(jnp.square(x - mu), axis=-1, keepdims=True)
    return (x - mu) * jax.lax.rsqrt(var + eps) * g + b


def _encoder_kernel(
    # inputs (refs)
    x_ref,
    ln1_g_ref, ln1_b_ref,
    wqkv_ref, bqkv_ref,
    wmsa_ref,
    wa1_ref, ba1_ref, wa2_ref, ba2_ref,
    ln2_g_ref, ln2_b_ref,
    wfc1_ref, bfc1_ref, wfc2_ref, bfc2_ref,
    wm1_ref, bm1_ref, wm2_ref, bm2_ref,
    # output (ref)
    out_ref,
    *,
    num_heads, head_dim_p, emb, seq, batch_tile, inv_scale, approx_gelu,
):
    H, Dhp, E, S, TB = num_heads, head_dim_p, emb, seq, batch_tile
    f32 = jnp.float32
    mxu_dtype = wqkv_ref.dtype          # bf16 in the default configuration

    def mm(x, w_ref, b_ref=None):
        # bf16 x bf16 MXU matmul with f32 accumulation; bias added in f32.
        y = jnp.dot(x.astype(mxu_dtype), w_ref[...], preferred_element_type=f32)
        if b_ref is not None:
            y = y + b_ref[...].astype(f32)
        return y

    # (TB, S, E) -> (TB*S, E): one big row-slab for every dense layer.
    x_in = x_ref[...].reshape(TB * S, E).astype(f32)

    # ---------------- Attention block ----------------
    xn = _layernorm(x_in, ln1_g_ref[...].astype(f32), ln1_b_ref[...].astype(f32))

    # Fused QKV projection.  Columns are laid out [Q heads | K heads | V heads],
    # each head padded to Dhp (multiple of 128) lanes -> all head slices are aligned.
    qkv = mm(xn, wqkv_ref, bqkv_ref).reshape(TB, S, 3 * H * Dhp)

    def split_heads(part):
        base = part * H * Dhp
        return jnp.concatenate(
            [qkv[:, :, base + h * Dhp: base + (h + 1) * Dhp] for h in range(H)],
            axis=0)                                            # (H*TB, S, Dhp)

    q = (split_heads(0) * inv_scale).astype(mxu_dtype)         # fold 1/sqrt(Dh) once
    k = split_heads(1).astype(mxu_dtype)
    v = split_heads(2).astype(mxu_dtype)

    s = jnp.einsum("bqd,bkd->bqk", q, k, preferred_element_type=f32)   # (H*TB, S, S)
    s = s - jnp.max(s, axis=-1, keepdims=True)
    p = jnp.exp(s)
    # Exact reciprocal of the small (H*TB, S, 1) denominator, broadcast multiply.
    p = p * (1.0 / jnp.sum(p, axis=-1, keepdims=True))
    o = jnp.einsum("bqk,bkd->bqd", p.astype(mxu_dtype), v,
                   preferred_element_type=f32)                 # (H*TB, S, Dhp)

    # Merge heads back along the (aligned) lane dim; padded columns are zero and are
    # absorbed by the zero rows of the padded MSA weight.
    concat = jnp.concatenate([o[h * TB:(h + 1) * TB] for h in range(H)], axis=-1)
    concat = concat.reshape(TB * S, H * Dhp)

    msa = mm(concat, wmsa_ref)                                  # no bias

    # adapter (attention)
    a = jnp.maximum(mm(msa, wa1_ref, ba1_ref), 0.0)
    a = mm(a, wa2_ref, ba2_ref)
    x1 = (a + msa) + x_in            # adapter residual + encoder residual #1

    # ---------------- MLP block ----------------
    xn2 = _layernorm(x1, ln2_g_ref[...].astype(f32), ln2_b_ref[...].astype(f32))

    h1 = mm(xn2, wfc1_ref, bfc1_ref)
    # approximate=True (tanh) runs on the EUP slot and is ~free under the MXU stream;
    # deviation from torch's exact-erf GELU is ~1e-3 worst case (far smaller here).
    h1 = jax.nn.gelu(h1, approximate=approx_gelu)
    y = mm(h1, wfc2_ref, bfc2_ref)

    # adapter (mlp)
    m = jnp.maximum(mm(y, wm1_ref, bm1_ref), 0.0)
    m = mm(m, wm2_ref, bm2_ref)

    out = (m + y) + x1               # adapter residual + encoder residual #2
    out_ref[...] = out.reshape(TB, S, E).astype(out_ref.dtype)


def encoder_forward(x, params, *, num_heads, head_dim, batch_tile=None,
                    weight_dtype=jnp.bfloat16, approx_gelu=True):
    B, S, E = x.shape
    H, Dh = num_heads, head_dim
    assert H * Dh == E, "embedding_dim must equal num_heads * dim_head"
    f32 = jnp.float32

    # Pad each head's lane block up to a 128-lane boundary so head split/merge in the
    # kernel is alignment-free (zero pad columns/rows keep the math exact).
    Dhp = -(-Dh // 128) * 128

    # ---- weight prep: bf16 MXU operands, head-aligned fused QKV / MSA layout ----
    wqkv_p = jnp.pad(params["wqkv"].reshape(E, 3, H, Dh),
                     ((0, 0), (0, 0), (0, 0), (0, Dhp - Dh)))
    wqkv_p = wqkv_p.reshape(E, 3 * H * Dhp).astype(weight_dtype)
    bqkv_p = jnp.pad(params["bqkv"].reshape(3, H, Dh),
                     ((0, 0), (0, 0), (0, Dhp - Dh)))
    bqkv_p = bqkv_p.reshape(1, 3 * H * Dhp).astype(f32)
    wmsa_p = jnp.pad(params["wmsa"].reshape(H, Dh, E),
                     ((0, 0), (0, Dhp - Dh), (0, 0)))
    wmsa_p = wmsa_p.reshape(H * Dhp, E).astype(weight_dtype)

    param_list = [
        params["ln1_g"].astype(f32), params["ln1_b"].astype(f32),
        wqkv_p, bqkv_p,
        wmsa_p,
        params["wa1"].astype(weight_dtype), params["ba1"].astype(f32),
        params["wa2"].astype(weight_dtype), params["ba2"].astype(f32),
        params["ln2_g"].astype(f32), params["ln2_b"].astype(f32),
        params["wfc1"].astype(weight_dtype), params["bfc1"].astype(f32),
        params["wfc2"].astype(weight_dtype), params["bfc2"].astype(f32),
        params["wm1"].astype(weight_dtype), params["bm1"].astype(f32),
        params["wm2"].astype(weight_dtype), params["bm2"].astype(f32),
    ]
    weight_bytes = sum(int(p.size) * p.dtype.itemsize for p in param_list)

    # ---- per-generation VMEM budget / tile derivation (all trace-time Python) ----
    try:
        kind = jax.devices()[0].device_kind.lower()
    except Exception:
        kind = ""
    two_tc = ("v7" in kind) or ("7x" in kind)          # v7x: 2 TensorCores per chip
    try:
        vmem_cap = int(pltpu.get_tpu_info().vmem_capacity_bytes)
    except Exception:
        vmem_cap = (64 << 20) if two_tc else (128 << 20)
    two_tc = two_tc or vmem_cap <= (64 << 20)
    # ~7/8 of physical VMEM: ~112 MiB on v5e/v6e (128 MiB), ~56 MiB on v7x (64 MiB).
    vmem_limit = int(vmem_cap * 7 // 8)

    if batch_tile is None:
        # Rough upper bound on live f32 elements per row of the fused body
        # (activation in/out blocks, QKV slab + head copies, scores, fc1 slab, ...).
        per_row_f32 = (12 * E + 6 * H * Dhp + 2 * H * S + 2 * H * Dhp + 4 * E)
        bytes_per_row = 6 * per_row_f32            # 4 B/elem * 1.5x slack for casts
        avail = max(vmem_limit - weight_bytes - (4 << 20), bytes_per_row * S)
        max_tb = max(1, avail // (bytes_per_row * S))
        target_rows = 512                          # fill the MXU M dimension
        tb = max(1, min(B, max(1, target_rows // S), max_tb))
        if two_tc:                                 # give both v7x TensorCores a tile
            tb = min(tb, max(1, B // 2))
        while B % tb:                              # exact tiling: no garbage rows
            tb -= 1
        batch_tile = tb
    TB = int(batch_tile)
    num_tiles = pl.cdiv(B, TB)

    kernel = functools.partial(
        _encoder_kernel,
        num_heads=H, head_dim_p=Dhp, emb=E, seq=S, batch_tile=TB,
        inv_scale=1.0 / math.sqrt(Dh), approx_gelu=approx_gelu)

    # Advisory cost estimate so XLA schedules around the fused call sensibly.
    M = B * S
    r = params["wa1"].shape[1]
    flops = 2 * M * E * (3 * H * Dhp)              # fused QKV projection
    flops += 4 * B * H * S * S * Dhp               # scores + attn @ V
    flops += 2 * M * (H * Dhp) * E                 # MSA projection
    flops += 8 * M * E * r                         # two adapter bottlenecks
    flops += 16 * M * E * E                        # fc1 (E->4E) + fc2 (4E->E)
    transcendentals = B * H * S * S + M * 4 * E + 4 * M
    bytes_accessed = 2 * x.size * x.dtype.itemsize + weight_bytes
    cost = pl.CostEstimate(flops=int(flops), transcendentals=int(transcendentals),
                           bytes_accessed=int(bytes_accessed))

    act_spec = pl.BlockSpec((TB, S, E), lambda b: (b, 0, 0))
    out_spec = pl.BlockSpec((TB, S, E), lambda b: (b, 0, 0))
    # Whole-array, single-buffered, VMEM-resident weights: loaded once, no per-step
    # re-DMA, no 2x double-buffer cost.
    w_specs = [pl.BlockSpec(memory_space=pltpu.MemorySpace.VMEM) for _ in param_list]

    return pl.pallas_call(
        kernel,
        out_shape=jax.ShapeDtypeStruct((B, S, E), x.dtype),
        grid=(num_tiles,),
        in_specs=[act_spec] + w_specs,
        out_specs=out_spec,
        compiler_params=pltpu.CompilerParams(
            dimension_semantics=("parallel",),
            vmem_limit_bytes=vmem_limit),
        cost_estimate=cost,
    )(x, *param_list)


def encoder_reference(x, params, *, num_heads, head_dim):
    """Pure-JAX f32 reference mirroring the PyTorch Encoder forward (exact-erf GELU)."""
    B, S, E = x.shape
    sc = math.sqrt(head_dim)

    xn = _layernorm(x, params["ln1_g"], params["ln1_b"])
    qkv = xn @ params["wqkv"] + params["bqkv"]                      # (B, S, 3E)
    qkv = qkv.reshape(B, S, 3, num_heads, head_dim)
    qkv = jnp.transpose(qkv, (2, 0, 3, 1, 4))                       # (3, B, H, S, Dh)
    q, k, v = qkv[0], qkv[1], qkv[2]
    scores = jnp.einsum("bhsd,bhtd->bhst", q, k) / sc
    p = jax.nn.softmax(scores, axis=-1)
    o = jnp.einsum("bhst,bhtd->bhsd", p, v)                         # (B, H, S, Dh)
    concat = jnp.transpose(o, (0, 2, 1, 3)).reshape(B, S, E)
    msa = concat @ params["wmsa"]
    a = jnp.maximum(msa @ params["wa1"] + params["ba1"], 0.0)
    a = a @ params["wa2"] + params["ba2"]
    x1 = (a + msa) + x

    xn2 = _layernorm(x1, params["ln2_g"], params["ln2_b"])
    h1 = jax.nn.gelu(xn2 @ params["wfc1"] + params["bfc1"], approximate=False)
    y = h1 @ params["wfc2"] + params["bfc2"]
    m = jnp.maximum(y @ params["wm1"] + params["bm1"], 0.0)
    m = m @ params["wm2"] + params["bm2"]
    return (m + y) + x1


def make_params(key, *, emb, r):
    # All linear weights stored pre-transposed as (in, out) so y = x @ W + b
    # (equivalent to nn.Linear).  Kept f32 here; the wrapper casts MXU operands to bf16.
    ks = jax.random.split(key, 16)
    scale = 0.02
    f32 = jnp.float32
    return {
        "ln1_g": jnp.ones((1, emb), f32),
        "ln1_b": jnp.zeros((1, emb), f32),
        "wqkv": scale * jax.random.normal(ks[0], (emb, 3 * emb), f32),
        "bqkv": scale * jax.random.normal(ks[1], (1, 3 * emb), f32),
        "wmsa": scale * jax.random.normal(ks[2], (emb, emb), f32),
        "wa1": scale * jax.random.normal(ks[3], (emb, r), f32),
        "ba1": scale * jax.random.normal(ks[4], (1, r), f32),
        "wa2": scale * jax.random.normal(ks[5], (r, emb), f32),
        "ba2": scale * jax.random.normal(ks[6], (1, emb), f32),
        "ln2_g": jnp.ones((1, emb), f32),
        "ln2_b": jnp.zeros((1, emb), f32),
        "wfc1": scale * jax.random.normal(ks[7], (emb, 4 * emb), f32),
        "bfc1": scale * jax.random.normal(ks[8], (1, 4 * emb), f32),
        "wfc2": scale * jax.random.normal(ks[9], (4 * emb, emb), f32),
        "bfc2": scale * jax.random.normal(ks[10], (1, emb), f32),
        "wm1": scale * jax.random.normal(ks[11], (emb, r), f32),
        "bm1": scale * jax.random.normal(ks[12], (1, r), f32),
        "wm2": scale * jax.random.normal(ks[13], (r, emb), f32),
        "bm2": scale * jax.random.normal(ks[14], (1, emb), f32),
    }


if __name__ == "__main__":
    # num_patch=8 -> seq=9, heads=4, dim_head=8 -> emb=32, r=4, batch=2
    NUM_PATCH = 8
    NUM_HEADS = 4
    HEAD_DIM = 8
    EMB = NUM_HEADS * HEAD_DIM    # 32
    R = 4
    B = 2
    S = NUM_PATCH + 1             # 9

    key = jax.random.PRNGKey(0)
    kx, kp = jax.random.split(key)
    x = jax.random.normal(kx, (B, S, EMB), jnp.float32)
    params = make_params(kp, emb=EMB, r=R)

    fwd = jax.jit(functools.partial(encoder_forward,
                                    num_heads=NUM_HEADS, head_dim=HEAD_DIM))
    out = jax.block_until_ready(fwd(x, params))

    ref = encoder_reference(x, params, num_heads=NUM_HEADS, head_dim=HEAD_DIM)
    assert out.shape == (B, S, EMB)
    # Tolerance covers bf16 weight/activation rounding and the tanh-GELU approximation
    # (measured deviation is ~1e-3 at these scales; residual path stays exact f32).
    assert jnp.allclose(out, ref, rtol=2e-2, atol=2e-2), \
        "Pallas output mismatch vs JAX reference"

    print("KERNEL_OK")
</pallas_src>

<mosaic_0001>
module attributes {stable_mosaic.version = 11 : i64} {
  func.func @_encoder_kernel(%arg0: i32, %arg1: memref<2x9x32xf32, #tpu.memory_space<vmem>>, %arg2: memref<1x32xf32, #tpu.memory_space<vmem>>, %arg3: memref<1x32xf32, #tpu.memory_space<vmem>>, %arg4: memref<32x1536xbf16, #tpu.memory_space<vmem>>, %arg5: memref<1x1536xf32, #tpu.memory_space<vmem>>, %arg6: memref<512x32xbf16, #tpu.memory_space<vmem>>, %arg7: memref<32x4xbf16, #tpu.memory_space<vmem>>, %arg8: memref<1x4xf32, #tpu.memory_space<vmem>>, %arg9: memref<4x32xbf16, #tpu.memory_space<vmem>>, %arg10: memref<1x32xf32, #tpu.memory_space<vmem>>, %arg11: memref<1x32xf32, #tpu.memory_space<vmem>>, %arg12: memref<1x32xf32, #tpu.memory_space<vmem>>, %arg13: memref<32x128xbf16, #tpu.memory_space<vmem>>, %arg14: memref<1x128xf32, #tpu.memory_space<vmem>>, %arg15: memref<128x32xbf16, #tpu.memory_space<vmem>>, %arg16: memref<1x32xf32, #tpu.memory_space<vmem>>, %arg17: memref<32x4xbf16, #tpu.memory_space<vmem>>, %arg18: memref<1x4xf32, #tpu.memory_space<vmem>>, %arg19: memref<4x32xbf16, #tpu.memory_space<vmem>>, %arg20: memref<1x32xf32, #tpu.memory_space<vmem>>, %arg21: memref<2x9x32xf32, #tpu.memory_space<vmem>>) attributes {dimension_semantics = [#tpu.dimension_semantics<parallel>], iteration_bounds = array<i64: 1>, scalar_prefetch = 0 : i64, scratch_operands = 0 : i64, tpu.core_type = #tpu.core_type<tc>, window_params = [{transform_indices = @transform_0, window_bounds = array<i64: 2, 9, 32>}, {pipeline_mode = #tpu.pipeline_mode<synchronous>, transform_indices = @transform_1, window_bounds = array<i64: 1, 32>}, {pipeline_mode = #tpu.pipeline_mode<synchronous>, transform_indices = @transform_2, window_bounds = array<i64: 1, 32>}, {pipeline_mode = #tpu.pipeline_mode<synchronous>, transform_indices = @transform_3, window_bounds = array<i64: 32, 1536>}, {pipeline_mode = #tpu.pipeline_mode<synchronous>, transform_indices = @transform_4, window_bounds = array<i64: 1, 1536>}, {pipeline_mode = #tpu.pipeline_mode<synchronous>, transform_indices = @transform_5, window_bounds = array<i64: 512, 32>}, {pipeline_mode = #tpu.pipeline_mode<synchronous>, transform_indices = @transform_6, window_bounds = array<i64: 32, 4>}, {pipeline_mode = #tpu.pipeline_mode<synchronous>, transform_indices = @transform_7, window_bounds = array<i64: 1, 4>}, {pipeline_mode = #tpu.pipeline_mode<synchronous>, transform_indices = @transform_8, window_bounds = array<i64: 4, 32>}, {pipeline_mode = #tpu.pipeline_mode<synchronous>, transform_indices = @transform_9, window_bounds = array<i64: 1, 32>}, {pipeline_mode = #tpu.pipeline_mode<synchronous>, transform_indices = @transform_10, window_bounds = array<i64: 1, 32>}, {pipeline_mode = #tpu.pipeline_mode<synchronous>, transform_indices = @transform_11, window_bounds = array<i64: 1, 32>}, {pipeline_mode = #tpu.pipeline_mode<synchronous>, transform_indices = @transform_12, window_bounds = array<i64: 32, 128>}, {pipeline_mode = #tpu.pipeline_mode<synchronous>, transform_indices = @transform_13, window_bounds = array<i64: 1, 128>}, {pipeline_mode = #tpu.pipeline_mode<synchronous>, transform_indices = @transform_14, window_bounds = array<i64: 128, 32>}, {pipeline_mode = #tpu.pipeline_mode<synchronous>, transform_indices = @transform_15, window_bounds = array<i64: 1, 32>}, {pipeline_mode = #tpu.pipeline_mode<synchronous>, transform_indices = @transform_16, window_bounds = array<i64: 32, 4>}, {pipeline_mode = #tpu.pipeline_mode<synchronous>, transform_indices = @transform_17, window_bounds = array<i64: 1, 4>}, {pipeline_mode = #tpu.pipeline_mode<synchronous>, transform_indices = @transform_18, window_bounds = array<i64: 4, 32>}, {pipeline_mode = #tpu.pipeline_mode<synchronous>, transform_indices = @transform_19, window_bounds = array<i64: 1, 32>}, {transform_indices = @transform_20, window_bounds = array<i64: 2, 9, 32>}]} {
    %c0 = arith.constant 0 : index
    %c0_0 = arith.constant 0 : index
    %c0_1 = arith.constant 0 : index
    %0 = vector.load %arg1[%c0, %c0_0, %c0_1] : memref<2x9x32xf32, #tpu.memory_space<vmem>>, vector<2x9x32xf32>
    %1 = vector.shape_cast %0 : vector<2x9x32xf32> to vector<18x32xf32>
    %c0_2 = arith.constant 0 : index
    %c0_3 = arith.constant 0 : index
    %2 = vector.load %arg2[%c0_2, %c0_3] : memref<1x32xf32, #tpu.memory_space<vmem>>, vector<1x32xf32>
    %c0_4 = arith.constant 0 : index
    %c0_5 = arith.constant 0 : index
    %3 = vector.load %arg3[%c0_4, %c0_5] : memref<1x32xf32, #tpu.memory_space<vmem>>, vector<1x32xf32>
    %cst = arith.constant dense<0.000000e+00> : vector<18xf32>
    %4 = vector.multi_reduction <add>, %1, %cst [1] : vector<18x32xf32> to vector<18xf32>
    %5 = vector.shape_cast %4 : vector<18xf32> to vector<18x1xf32>
    %cst_6 = arith.constant 3.200000e+01 : f32
    %6 = vector.broadcast %cst_6 : f32 to vector<18x1xf32>
    %7 = arith.divf %5, %6 : vector<18x1xf32>
    %8 = vector.broadcast %7 : vector<18x1xf32> to vector<18x32xf32>
    %9 = arith.subf %1, %8 : vector<18x32xf32>
    %10 = arith.mulf %9, %9 : vector<18x32xf32>
    %cst_7 = arith.constant dense<0.000000e+00> : vector<18xf32>
    %11 = vector.multi_reduction <add>, %10, %cst_7 [1] : vector<18x32xf32> to vector<18xf32>
    %12 = vector.shape_cast %11 : vector<18xf32> to vector<18x1xf32>
    %cst_8 = arith.constant 3.200000e+01 : f32
    %13 = vector.broadcast %cst_8 : f32 to vector<18x1xf32>
    %14 = arith.divf %12, %13 : vector<18x1xf32>
    %15 = vector.broadcast %7 : vector<18x1xf32> to vector<18x32xf32>
    %16 = arith.subf %1, %15 : vector<18x32xf32>
    %cst_9 = arith.constant 9.99999997E-7 : f32
    %17 = vector.broadcast %cst_9 : f32 to vector<18x1xf32>
    %18 = arith.addf %14, %17 : vector<18x1xf32>
    %19 = math.rsqrt %18 : vector<18x1xf32>
    %20 = vector.broadcast %19 : vector<18x1xf32> to vector<18x32xf32>
    %21 = arith.mulf %16, %20 : vector<18x32xf32>
    %22 = vector.broadcast %2 : vector<1x32xf32> to vector<18x32xf32>
    %23 = arith.mulf %21, %22 : vector<18x32xf32>
    %24 = vector.broadcast %3 : vector<1x32xf32> to vector<18x32xf32>
    %25 = arith.addf %23, %24 : vector<18x32xf32>
    %26 = arith.truncf %25 : vector<18x32xf32> to vector<18x32xbf16>
    %c0_10 = arith.constant 0 : index
    %c0_11 = arith.constant 0 : index
    %27 = vector.load %arg4[%c0_10, %c0_11] : memref<32x1536xbf16, #tpu.memory_space<vmem>>, vector<32x1536xbf16>
    %cst_12 = arith.constant dense<0.000000e+00> : vector<18x1536xf32>
    %28 = tpu.matmul %26, %27, %cst_12 {dimension_numbers = #tpu.dot_dimension_numbers<[1], [0], [0], [1], [0, 0, 1, 1], [], []>} : vector<18x32xbf16>, vector<32x1536xbf16>, vector<18x1536xf32> -> vector<18x1536xf32>
    %c0_13 = arith.constant 0 : index
    %c0_14 = arith.constant 0 : index
    %29 = vector.load %arg5[%c0_13, %c0_14] : memref<1x1536xf32, #tpu.memory_space<vmem>>, vector<1x1536xf32>
    %30 = vector.broadcast %29 : vector<1x1536xf32> to vector<18x1536xf32>
    %31 = arith.addf %28, %30 : vector<18x1536xf32>
    %32 = vector.shape_cast %31 : vector<18x1536xf32> to vector<2x9x1536xf32>
    %33 = vector.extract_strided_slice %32 {offsets = [0, 0, 0], sizes = [2, 9, 128], strides = [1, 1, 1]} : vector<2x9x1536xf32> to vector<2x9x128xf32>
    %34 = vector.extract_strided_slice %32 {offsets = [0, 0, 128], sizes = [2, 9, 128], strides = [1, 1, 1]} : vector<2x9x1536xf32> to vector<2x9x128xf32>
    %35 = vector.extract_strided_slice %32 {offsets = [0, 0, 256], sizes = [2, 9, 128], strides = [1, 1, 1]} : vector<2x9x1536xf32> to vector<2x9x128xf32>
    %36 = vector.extract_strided_slice %32 {offsets = [0, 0, 384], sizes = [2, 9, 128], strides = [1, 1, 1]} : vector<2x9x1536xf32> to vector<2x9x128xf32>
    %37 = tpu.concatenate %33, %34, %35, %36 in 0 : vector<2x9x128xf32>, vector<2x9x128xf32>, vector<2x9x128xf32>, vector<2x9x128xf32> -> vector<8x9x128xf32>
    %cst_15 = arith.constant 0.353553385 : f32
    %38 = vector.broadcast %cst_15 : f32 to vector<8x9x128xf32>
    %39 = arith.mulf %37, %38 : vector<8x9x128xf32>
    %40 = arith.truncf %39 : vector<8x9x128xf32> to vector<8x9x128xbf16>
    %41 = vector.extract_strided_slice %32 {offsets = [0, 0, 512], sizes = [2, 9, 128], strides = [1, 1, 1]} : vector<2x9x1536xf32> to vector<2x9x128xf32>
    %42 = vector.extract_strided_slice %32 {offsets = [0, 0, 640], sizes = [2, 9, 128], strides = [1, 1, 1]} : vector<2x9x1536xf32> to vector<2x9x128xf32>
    %43 = vector.extract_strided_slice %32 {offsets = [0, 0, 768], sizes = [2, 9, 128], strides = [1, 1, 1]} : vector<2x9x1536xf32> to vector<2x9x128xf32>
    %44 = vector.extract_strided_slice %32 {offsets = [0, 0, 896], sizes = [2, 9, 128], strides = [1, 1, 1]} : vector<2x9x1536xf32> to vector<2x9x128xf32>
    %45 = tpu.concatenate %41, %42, %43, %44 in 0 : vector<2x9x128xf32>, vector<2x9x128xf32>, vector<2x9x128xf32>, vector<2x9x128xf32> -> vector<8x9x128xf32>
    %46 = arith.truncf %45 : vector<8x9x128xf32> to vector<8x9x128xbf16>
    %47 = vector.extract_strided_slice %32 {offsets = [0, 0, 1024], sizes = [2, 9, 128], strides = [1, 1, 1]} : vector<2x9x1536xf32> to vector<2x9x128xf32>
    %48 = vector.extract_strided_slice %32 {offsets = [0, 0, 1152], sizes = [2, 9, 128], strides = [1, 1, 1]} : vector<2x9x1536xf32> to vector<2x9x128xf32>
    %49 = vector.extract_strided_slice %32 {offsets = [0, 0, 1280], sizes = [2, 9, 128], strides = [1, 1, 1]} : vector<2x9x1536xf32> to vector<2x9x128xf32>
    %50 = vector.extract_strided_slice %32 {offsets = [0, 0, 1408], sizes = [2, 9, 128], strides = [1, 1, 1]} : vector<2x9x1536xf32> to vector<2x9x128xf32>
    %51 = tpu.concatenate %47, %48, %49, %50 in 0 : vector<2x9x128xf32>, vector<2x9x128xf32>, vector<2x9x128xf32>, vector<2x9x128xf32> -> vector<8x9x128xf32>
    %52 = arith.truncf %51 : vector<8x9x128xf32> to vector<8x9x128xbf16>
    "tpu.trace_start"() <{level = 10 : i32, message = "bqd,bkd->bqk"}> : () -> ()
    %cst_16 = arith.constant dense<0.000000e+00> : vector<8x9x9xf32>
    %53 = tpu.matmul %40, %46, %cst_16 {dimension_numbers = #tpu.dot_dimension_numbers<[2], [2], [1], [1], [0, 0, 0, 1, 1, 1], [0], [0]>} : vector<8x9x128xbf16>, vector<8x9x128xbf16>, vector<8x9x9xf32> -> vector<8x9x9xf32>
    "tpu.trace_stop"() : () -> ()
    %cst_17 = arith.constant dense<0xFF800000> : vector<8x9xf32>
    %54 = vector.multi_reduction <maximumf>, %53, %cst_17 [2] : vector<8x9x9xf32> to vector<8x9xf32>
    %55 = vector.shape_cast %54 : vector<8x9xf32> to vector<8x9x1xf32>
    %56 = vector.broadcast %55 : vector<8x9x1xf32> to vector<8x9x9xf32>
    %57 = arith.subf %53, %56 : vector<8x9x9xf32>
    %58 = math.exp %57 : vector<8x9x9xf32>
    %cst_18 = arith.constant dense<0.000000e+00> : vector<8x9xf32>
    %59 = vector.multi_reduction <add>, %58, %cst_18 [2] : vector<8x9x9xf32> to vector<8x9xf32>
    %60 = vector.shape_cast %59 : vector<8x9xf32> to vector<8x9x1xf32>
    %cst_19 = arith.constant 1.000000e+00 : f32
    %61 = vector.broadcast %cst_19 : f32 to vector<8x9x1xf32>
    %62 = arith.divf %61, %60 : vector<8x9x1xf32>
    %63 = vector.broadcast %62 : vector<8x9x1xf32> to vector<8x9x9xf32>
    %64 = arith.mulf %58, %63 : vector<8x9x9xf32>
    %65 = arith.truncf %64 : vector<8x9x9xf32> to vector<8x9x9xbf16>
    "tpu.trace_start"() <{level = 10 : i32, message = "bqk,bkd->bqd"}> : () -> ()
    %cst_20 = arith.constant dense<0.000000e+00> : vector<8x9x128xf32>
    %66 = tpu.matmul %65, %52, %cst_20 {dimension_numbers = #tpu.dot_dimension_numbers<[2], [1], [1], [2], [0, 0, 0, 1, 1, 2], [0], [0]>} : vector<8x9x9xbf16>, vector<8x9x128xbf16>, vector<8x9x128xf32> -> vector<8x9x128xf32>
    "tpu.trace_stop"() : () -> ()
    %67 = vector.extract_strided_slice %66 {offsets = [0, 0, 0], sizes = [2, 9, 128], strides = [1, 1, 1]} : vector<8x9x128xf32> to vector<2x9x128xf32>
    %68 = vector.extract_strided_slice %66 {offsets = [2, 0, 0], sizes = [2, 9, 128], strides = [1, 1, 1]} : vector<8x9x128xf32> to vector<2x9x128xf32>
    %69 = vector.extract_strided_slice %66 {offsets = [4, 0, 0], sizes = [2, 9, 128], strides = [1, 1, 1]} : vector<8x9x128xf32> to vector<2x9x128xf32>
    %70 = vector.extract_strided_slice %66 {offsets = [6, 0, 0], sizes = [2, 9, 128], strides = [1, 1, 1]} : vector<8x9x128xf32> to vector<2x9x128xf32>
    %71 = tpu.concatenate %67, %68, %69, %70 in 2 : vector<2x9x128xf32>, vector<2x9x128xf32>, vector<2x9x128xf32>, vector<2x9x128xf32> -> vector<2x9x512xf32>
    %72 = vector.shape_cast %71 : vector<2x9x512xf32> to vector<18x512xf32>
    %73 = arith.truncf %72 : vector<18x512xf32> to vector<18x512xbf16>
    %c0_21 = arith.constant 0 : index
    %c0_22 = arith.constant 0 : index
    %74 = vector.load %arg6[%c0_21, %c0_22] : memref<512x32xbf16, #tpu.memory_space<vmem>>, vector<512x32xbf16>
    %cst_23 = arith.constant dense<0.000000e+00> : vector<18x32xf32>
    %75 = tpu.matmul %73, %74, %cst_23 {dimension_numbers = #tpu.dot_dimension_numbers<[1], [0], [0], [1], [0, 0, 1, 1], [], []>} : vector<18x512xbf16>, vector<512x32xbf16>, vector<18x32xf32> -> vector<18x32xf32>
    %76 = arith.truncf %75 : vector<18x32xf32> to vector<18x32xbf16>
    %c0_24 = arith.constant 0 : index
    %c0_25 = arith.constant 0 : index
    %77 = vector.load %arg7[%c0_24, %c0_25] : memref<32x4xbf16, #tpu.memory_space<vmem>>, vector<32x4xbf16>
    %cst_26 = arith.constant dense<0.000000e+00> : vector<18x4xf32>
    %78 = tpu.matmul %76, %77, %cst_26 {dimension_numbers = #tpu.dot_dimension_numbers<[1], [0], [0], [1], [0, 0, 1, 1], [], []>} : vector<18x32xbf16>, vector<32x4xbf16>, vector<18x4xf32> -> vector<18x4xf32>
    %c0_27 = arith.constant 0 : index
    %c0_28 = arith.constant 0 : index
    %79 = vector.load %arg8[%c0_27, %c0_28] : memref<1x4xf32, #tpu.memory_space<vmem>>, vector<1x4xf32>
    %80 = vector.broadcast %79 : vector<1x4xf32> to vector<18x4xf32>
    %81 = arith.addf %78, %80 : vector<18x4xf32>
    %cst_29 = arith.constant 0.000000e+00 : f32
    %82 = vector.broadcast %cst_29 : f32 to vector<18x4xf32>
    %83 = arith.maximumf %81, %82 : vector<18x4xf32>
    %84 = arith.truncf %83 : vector<18x4xf32> to vector<18x4xbf16>
    %c0_30 = arith.constant 0 : index
    %c0_31 = arith.constant 0 : index
    %85 = vector.load %arg9[%c0_30, %c0_31] : memref<4x32xbf16, #tpu.memory_space<vmem>>, vector<4x32xbf16>
    %cst_32 = arith.constant dense<0.000000e+00> : vector<18x32xf32>
    %86 = tpu.matmul %84, %85, %cst_32 {dimension_numbers = #tpu.dot_dimension_numbers<[1], [0], [0], [1], [0, 0, 1, 1], [], []>} : vector<18x4xbf16>, vector<4x32xbf16>, vector<18x32xf32> -> vector<18x32xf32>
    %c0_33 = arith.constant 0 : index
    %c0_34 = arith.constant 0 : index
    %87 = vector.load %arg10[%c0_33, %c0_34] : memref<1x32xf32, #tpu.memory_space<vmem>>, vector<1x32xf32>
    %88 = vector.broadcast %87 : vector<1x32xf32> to vector<18x32xf32>
    %89 = arith.addf %86, %88 : vector<18x32xf32>
    %90 = arith.addf %89, %75 : vector<18x32xf32>
    %91 = arith.addf %90, %1 : vector<18x32xf32>
    %c0_35 = arith.constant 0 : index
    %c0_36 = arith.constant 0 : index
    %92 = vector.load %arg11[%c0_35, %c0_36] : memref<1x32xf32, #tpu.memory_space<vmem>>, vector<1x32xf32>
    %c0_37 = arith.constant 0 : index
    %c0_38 = arith.constant 0 : index
    %93 = vector.load %arg12[%c0_37, %c0_38] : memref<1x32xf32, #tpu.memory_space<vmem>>, vector<1x32xf32>
    %cst_39 = arith.constant dense<0.000000e+00> : vector<18xf32>
    %94 = vector.multi_reduction <add>, %91, %cst_39 [1] : vector<18x32xf32> to vector<18xf32>
    %95 = vector.shape_cast %94 : vector<18xf32> to vector<18x1xf32>
    %cst_40 = arith.constant 3.200000e+01 : f32
    %96 = vector.broadcast %cst_40 : f32 to vector<18x1xf32>
    %97 = arith.divf %95, %96 : vector<18x1xf32>
    %98 = vector.broadcast %97 : vector<18x1xf32> to vector<18x32xf32>
    %99 = arith.subf %91, %98 : vector<18x32xf32>
    %100 = arith.mulf %99, %99 : vector<18x32xf32>
    %cst_41 = arith.constant dense<0.000000e+00> : vector<18xf32>
    %101 = vector.multi_reduction <add>, %100, %cst_41 [1] : vector<18x32xf32> to vector<18xf32>
    %102 = vector.shape_cast %101 : vector<18xf32> to vector<18x1xf32>
    %cst_42 = arith.constant 3.200000e+01 : f32
    %103 = vector.broadcast %cst_42 : f32 to vector<18x1xf32>
    %104 = arith.divf %102, %103 : vector<18x1xf32>
    %105 = vector.broadcast %97 : vector<18x1xf32> to vector<18x32xf32>
    %106 = arith.subf %91, %105 : vector<18x32xf32>
    %cst_43 = arith.constant 9.99999997E-7 : f32
    %107 = vector.broadcast %cst_43 : f32 to vector<18x1xf32>
    %108 = arith.addf %104, %107 : vector<18x1xf32>
    %109 = math.rsqrt %108 : vector<18x1xf32>
    %110 = vector.broadcast %109 : vector<18x1xf32> to vector<18x32xf32>
    %111 = arith.mulf %106, %110 : vector<18x32xf32>
    %112 = vector.broadcast %92 : vector<1x32xf32> to vector<18x32xf32>
    %113 = arith.mulf %111, %112 : vector<18x32xf32>
    %114 = vector.broadcast %93 : vector<1x32xf32> to vector<18x32xf32>
    %115 = arith.addf %113, %114 : vector<18x32xf32>
    %116 = arith.truncf %115 : vector<18x32xf32> to vector<18x32xbf16>
    %c0_44 = arith.constant 0 : index
    %c0_45 = arith.constant 0 : index
    %117 = vector.load %arg13[%c0_44, %c0_45] : memref<32x128xbf16, #tpu.memory_space<vmem>>, vector<32x128xbf16>
    %cst_46 = arith.constant dense<0.000000e+00> : vector<18x128xf32>
    %118 = tpu.matmul %116, %117, %cst_46 {dimension_numbers = #tpu.dot_dimension_numbers<[1], [0], [0], [1], [0, 0, 1, 1], [], []>} : vector<18x32xbf16>, vector<32x128xbf16>, vector<18x128xf32> -> vector<18x128xf32>
    %c0_47 = arith.constant 0 : index
    %c0_48 = arith.constant 0 : index
    %119 = vector.load %arg14[%c0_47, %c0_48] : memref<1x128xf32, #tpu.memory_space<vmem>>, vector<1x128xf32>
    %120 = vector.broadcast %119 : vector<1x128xf32> to vector<18x128xf32>
    %121 = arith.addf %118, %120 : vector<18x128xf32>
    %122 = arith.mulf %121, %121 : vector<18x128xf32>
    %123 = arith.mulf %121, %122 : vector<18x128xf32>
    %cst_49 = arith.constant 4.471500e-02 : f32
    %124 = vector.broadcast %cst_49 : f32 to vector<18x128xf32>
    %125 = arith.mulf %124, %123 : vector<18x128xf32>
    %126 = arith.addf %121, %125 : vector<18x128xf32>
    %cst_50 = arith.constant 0.797884583 : f32
    %127 = vector.broadcast %cst_50 : f32 to vector<18x128xf32>
    %128 = arith.mulf %127, %126 : vector<18x128xf32>
    %129 = math.tanh %128 : vector<18x128xf32>
    %cst_51 = arith.constant 1.000000e+00 : f32
    %130 = vector.broadcast %cst_51 : f32 to vector<18x128xf32>
    %131 = arith.addf %130, %129 : vector<18x128xf32>
    %cst_52 = arith.constant 5.000000e-01 : f32
    %132 = vector.broadcast %cst_52 : f32 to vector<18x128xf32>
    %133 = arith.mulf %132, %131 : vector<18x128xf32>
    %134 = arith.mulf %121, %133 : vector<18x128xf32>
    %135 = arith.truncf %134 : vector<18x128xf32> to vector<18x128xbf16>
    %c0_53 = arith.constant 0 : index
    %c0_54 = arith.constant 0 : index
    %136 = vector.load %arg15[%c0_53, %c0_54] : memref<128x32xbf16, #tpu.memory_space<vmem>>, vector<128x32xbf16>
    %cst_55 = arith.constant dense<0.000000e+00> : vector<18x32xf32>
    %137 = tpu.matmul %135, %136, %cst_55 {dimension_numbers = #tpu.dot_dimension_numbers<[1], [0], [0], [1], [0, 0, 1, 1], [], []>} : vector<18x128xbf16>, vector<128x32xbf16>, vector<18x32xf32> -> vector<18x32xf32>
    %c0_56 = arith.constant 0 : index
    %c0_57 = arith.constant 0 : index
    %138 = vector.load %arg16[%c0_56, %c0_57] : memref<1x32xf32, #tpu.memory_space<vmem>>, vector<1x32xf32>
    %139 = vector.broadcast %138 : vector<1x32xf32> to vector<18x32xf32>
    %140 = arith.addf %137, %139 : vector<18x32xf32>
    %141 = arith.truncf %140 : vector<18x32xf32> to vector<18x32xbf16>
    %c0_58 = arith.constant 0 : index
    %c0_59 = arith.constant 0 : index
    %142 = vector.load %arg17[%c0_58, %c0_59] : memref<32x4xbf16, #tpu.memory_space<vmem>>, vector<32x4xbf16>
    %cst_60 = arith.constant dense<0.000000e+00> : vector<18x4xf32>
    %143 = tpu.matmul %141, %142, %cst_60 {dimension_numbers = #tpu.dot_dimension_numbers<[1], [0], [0], [1], [0, 0, 1, 1], [], []>} : vector<18x32xbf16>, vector<32x4xbf16>, vector<18x4xf32> -> vector<18x4xf32>
    %c0_61 = arith.constant 0 : index
    %c0_62 = arith.constant 0 : index
    %144 = vector.load %arg18[%c0_61, %c0_62] : memref<1x4xf32, #tpu.memory_space<vmem>>, vector<1x4xf32>
    %145 = vector.broadcast %144 : vector<1x4xf32> to vector<18x4xf32>
    %146 = arith.addf %143, %145 : vector<18x4xf32>
    %cst_63 = arith.constant 0.000000e+00 : f32
    %147 = vector.broadcast %cst_63 : f32 to vector<18x4xf32>
    %148 = arith.maximumf %146, %147 : vector<18x4xf32>
    %149 = arith.truncf %148 : vector<18x4xf32> to vector<18x4xbf16>
    %c0_64 = arith.constant 0 : index
    %c0_65 = arith.constant 0 : index
    %150 = vector.load %arg19[%c0_64, %c0_65] : memref<4x32xbf16, #tpu.memory_space<vmem>>, vector<4x32xbf16>
    %cst_66 = arith.constant dense<0.000000e+00> : vector<18x32xf32>
    %151 = tpu.matmul %149, %150, %cst_66 {dimension_numbers = #tpu.dot_dimension_numbers<[1], [0], [0], [1], [0, 0, 1, 1], [], []>} : vector<18x4xbf16>, vector<4x32xbf16>, vector<18x32xf32> -> vector<18x32xf32>
    %c0_67 = arith.constant 0 : index
    %c0_68 = arith.constant 0 : index
    %152 = vector.load %arg20[%c0_67, %c0_68] : memref<1x32xf32, #tpu.memory_space<vmem>>, vector<1x32xf32>
    %153 = vector.broadcast %152 : vector<1x32xf32> to vector<18x32xf32>
    %154 = arith.addf %151, %153 : vector<18x32xf32>
    %155 = arith.addf %154, %140 : vector<18x32xf32>
    %156 = arith.addf %155, %91 : vector<18x32xf32>
    %157 = vector.shape_cast %156 : vector<18x32xf32> to vector<2x9x32xf32>
    %c0_69 = arith.constant 0 : index
    %c0_70 = arith.constant 0 : index
    %c0_71 = arith.constant 0 : index
    %158 = vector.load %arg21[%c0_69, %c0_70, %c0_71] : memref<2x9x32xf32, #tpu.memory_space<vmem>>, vector<2x9x32xf32>
    tpu.vector_store %arg21[%c0_69, %c0_70, %c0_71], %157 {strides = array<i32>} : memref<2x9x32xf32, #tpu.memory_space<vmem>>, vector<2x9x32xf32>,
    return
  }
  func.func @transform_0(%arg0: i32) -> (i32, i32, i32) {
    %c0_i32 = arith.constant 0 : i32
    %c0_i32_0 = arith.constant 0 : i32
    %c0_i32_1 = arith.constant 0 : i32
    return %arg0, %c0_i32, %c0_i32_0 : i32, i32, i32
  }
  func.func @transform_1(%arg0: i32) -> (i32, i32) {
    %c0_i32 = arith.constant 0 : i32
    %c0_i32_0 = arith.constant 0 : i32
    %c0_i32_1 = arith.constant 0 : i32
    return %c0_i32, %c0_i32_0 : i32, i32
  }
  func.func @transform_2(%arg0: i32) -> (i32, i32) {
    %c0_i32 = arith.constant 0 : i32
    %c0_i32_0 = arith.constant 0 : i32
    %c0_i32_1 = arith.constant 0 : i32
    return %c0_i32, %c0_i32_0 : i32, i32
  }
  func.func @transform_3(%arg0: i32) -> (i32, i32) {
    %c0_i32 = arith.constant 0 : i32
    %c0_i32_0 = arith.constant 0 : i32
    %c0_i32_1 = arith.constant 0 : i32
    return %c0_i32, %c0_i32_0 : i32, i32
  }
  func.func @transform_4(%arg0: i32) -> (i32, i32) {
    %c0_i32 = arith.constant 0 : i32
    %c0_i32_0 = arith.constant 0 : i32
    %c0_i32_1 = arith.constant 0 : i32
    return %c0_i32, %c0_i32_0 : i32, i32
  }
  func.func @transform_5(%arg0: i32) -> (i32, i32) {
    %c0_i32 = arith.constant 0 : i32
    %c0_i32_0 = arith.constant 0 : i32
    %c0_i32_1 = arith.constant 0 : i32
    return %c0_i32, %c0_i32_0 : i32, i32
  }
  func.func @transform_6(%arg0: i32) -> (i32, i32) {
    %c0_i32 = arith.constant 0 : i32
    %c0_i32_0 = arith.constant 0 : i32
    %c0_i32_1 = arith.constant 0 : i32
    return %c0_i32, %c0_i32_0 : i32, i32
  }
  func.func @transform_7(%arg0: i32) -> (i32, i32) {
    %c0_i32 = arith.constant 0 : i32
    %c0_i32_0 = arith.constant 0 : i32
    %c0_i32_1 = arith.constant 0 : i32
    return %c0_i32, %c0_i32_0 : i32, i32
  }
  func.func @transform_8(%arg0: i32) -> (i32, i32) {
    %c0_i32 = arith.constant 0 : i32
    %c0_i32_0 = arith.constant 0 : i32
    %c0_i32_1 = arith.constant 0 : i32
    return %c0_i32, %c0_i32_0 : i32, i32
  }
  func.func @transform_9(%arg0: i32) -> (i32, i32) {
    %c0_i32 = arith.constant 0 : i32
    %c0_i32_0 = arith.constant 0 : i32
    %c0_i32_1 = arith.constant 0 : i32
    return %c0_i32, %c0_i32_0 : i32, i32
  }
  func.func @transform_10(%arg0: i32) -> (i32, i32) {
    %c0_i32 = arith.constant 0 : i32
    %c0_i32_0 = arith.constant 0 : i32
    %c0_i32_1 = arith.constant 0 : i32
    return %c0_i32, %c0_i32_0 : i32, i32
  }
  func.func @transform_11(%arg0: i32) -> (i32, i32) {
    %c0_i32 = arith.constant 0 : i32
    %c0_i32_0 = arith.constant 0 : i32
    %c0_i32_1 = arith.constant 0 : i32
    return %c0_i32, %c0_i32_0 : i32, i32
  }
  func.func @transform_12(%arg0: i32) -> (i32, i32) {
    %c0_i32 = arith.constant 0 : i32
    %c0_i32_0 = arith.constant 0 : i32
    %c0_i32_1 = arith.constant 0 : i32
    return %c0_i32, %c0_i32_0 : i32, i32
  }
  func.func @transform_13(%arg0: i32) -> (i32, i32) {
    %c0_i32 = arith.constant 0 : i32
    %c0_i32_0 = arith.constant 0 : i32
    %c0_i32_1 = arith.constant 0 : i32
    return %c0_i32, %c0_i32_0 : i32, i32
  }
  func.func @transform_14(%arg0: i32) -> (i32, i32) {
    %c0_i32 = arith.constant 0 : i32
    %c0_i32_0 = arith.constant 0 : i32
    %c0_i32_1 = arith.constant 0 : i32
    return %c0_i32, %c0_i32_0 : i32, i32
  }
  func.func @transform_15(%arg0: i32) -> (i32, i32) {
    %c0_i32 = arith.constant 0 : i32
    %c0_i32_0 = arith.constant 0 : i32
    %c0_i32_1 = arith.constant 0 : i32
    return %c0_i32, %c0_i32_0 : i32, i32
  }
  func.func @transform_16(%arg0: i32) -> (i32, i32) {
    %c0_i32 = arith.constant 0 : i32
    %c0_i32_0 = arith.constant 0 : i32
    %c0_i32_1 = arith.constant 0 : i32
    return %c0_i32, %c0_i32_0 : i32, i32
  }
  func.func @transform_17(%arg0: i32) -> (i32, i32) {
    %c0_i32 = arith.constant 0 : i32
    %c0_i32_0 = arith.constant 0 : i32
    %c0_i32_1 = arith.constant 0 : i32
    return %c0_i32, %c0_i32_0 : i32, i32
  }
  func.func @transform_18(%arg0: i32) -> (i32, i32) {
    %c0_i32 = arith.constant 0 : i32
    %c0_i32_0 = arith.constant 0 : i32
    %c0_i32_1 = arith.constant 0 : i32
    return %c0_i32, %c0_i32_0 : i32, i32
  }
  func.func @transform_19(%arg0: i32) -> (i32, i32) {
    %c0_i32 = arith.constant 0 : i32
    %c0_i32_0 = arith.constant 0 : i32
    %c0_i32_1 = arith.constant 0 : i32
    return %c0_i32, %c0_i32_0 : i32, i32
  }
  func.func @transform_20(%arg0: i32) -> (i32, i32, i32) {
    %c0_i32 = arith.constant 0 : i32
    %c0_i32_0 = arith.constant 0 : i32
    %c0_i32_1 = arith.constant 0 : i32
    return %arg0, %c0_i32, %c0_i32_0 : i32, i32, i32
  }
}

</mosaic_0001>

<bundles_post_ra>
// kernel: encoder_forward.1
= control target key start
LH: loop header
LB: loop body
LE: loop exit
PB: predicated region body
PF: predicated region fallthrough
CT: control target
= control target key end

     0   :  { %vm6452_vm0 = vcmask 261120   ;;  %vm6451_vm1 = vcmask 254976   ;;  %v4323_v24 = vmov 32.0   ;;  %vm965_vm12 = vcmask 1042434   ;;  %s6405_s0 = inlined_call_operand.vmem [shape: f32[2,9,32], index: 0, kind: input, shape index: {}]   ;;  %s6406_s1 = inlined_call_operand.vmem [shape: f32[1,32], index: 1, kind: input, shape index: {}]   ;;  %s6407_s2 = inlined_call_operand.vmem [shape: f32[1,32], index: 2, kind: input, shape index: {}]   ;;  %s6408_s3 = inlined_call_operand.vmem [shape: bf16[32,1536], index: 3, kind: input, shape index: {}]   ;;  %s6409_s4 = inlined_call_operand.vmem [shape: f32[1,1536], index: 4, kind: input, shape index: {}]   ;;  %s6410_s5 = inlined_call_operand.vmem [shape: bf16[512,32], index: 5, kind: input, shape index: {}]   ;;  %s6411_s6 = inlined_call_operand.vmem [shape: bf16[32,4], index: 6, kind: input, shape index: {}]   ;;  %s6412_s7 = inlined_call_operand.vmem [shape: f32[1,4], index: 7, kind: input, shape index: {}]   ;;  %s6413_s8 = inlined_call_operand.vmem [shape: bf16[4,32], index: 8, kind: input, shape index: {}]   ;;  %s6414_s9 = inlined_call_operand.vmem [shape: f32[1,32], index: 9, kind: input, shape index: {}]   ;;  %s6415_s10 = inlined_call_operand.vmem [shape: f32[1,32], index: 10, kind: input, shape index: {}]   ;;  %s6416_s11 = inlined_call_operand.vmem [shape: f32[1,32], index: 11, kind: input, shape index: {}]   ;;  %s6417_s13 = inlined_call_operand.vmem [shape: f32[1,128], index: 13, kind: input, shape index: {}]   ;;  %s6418_s12 = inlined_call_operand.vmem [shape: bf16[32,128], index: 12, kind: input, shape index: {}]   ;;  %s6419_s15 = inlined_call_operand.vmem [shape: f32[1,32], index: 15, kind: input, shape index: {}]   ;;  %s6420_s14 = inlined_call_operand.vmem [shape: bf16[128,32], index: 14, kind: input, shape index: {}]   ;;  %s6421_s16 = inlined_call_operand.vmem [shape: bf16[32,4], index: 16, kind: input, shape index: {}]   ;;  %s6422_s17 = inlined_call_operand.vmem [shape: f32[1,4], index: 17, kind: input, shape index: {}]   ;;  %s6423_s18 = inlined_call_operand.vmem [shape: bf16[4,32], index: 18, kind: input, shape index: {}]   ;;  %s6424_s19 = inlined_call_operand.vmem [shape: f32[1,32], index: 19, kind: input, shape index: {}]   ;;  %s6425_s20 = inlined_call_operand.vmem [shape: f32[2,9,32], index: 20, kind: output, shape index: {}]  }
   0x1   :  { %6467 = sst [smem:[#allocation30_spill]] %s6405_s0  ;;  %4239 = vrcp.f32 %v4323_v24  ;;  %vm971_vm13 = vcmask 1046534   ;;  %vm982_vm14 = vcmask 1043459   ;;  %vm6466_vm15 = vcmask 1046528  }
   0x2   :  { %6468 = sst [smem:[#allocation31_spill]] %s6406_s1 }
   0x3   :  { %6469 = sst [smem:[#allocation32_spill]] %s6407_s2 }
   0x4   :  { %6470 = sst [smem:[#allocation33_spill]] %s6408_s3 }
   0x5   :  { %6471 = sst [smem:[#allocation34_spill]] %s6409_s4 }
   0x6   :  { %s6472_s23 = sld [smem:[#allocation30_spill]] }
   0x7   :  { %v4240_v25 = vpop.eup %4239  ;;  %s6492_s29 = sld [smem:[#allocation31_spill]] }
   0x8   :  { %v147_v26 = vmul.f32 32.0, %v4240_v25  ;;  %vm151_vm2 = vweird.f32 %v4240_v25  ;;  %s6493_s21 = sld [smem:[#allocation32_spill]] }
   0xa   :  { %v148_v27 = vsub.f32 1.0, %v147_v26 }
   0xc   :  { %v4433_v0 = vld [vmem:[%s6472_s23] sm:$0xff]  ;;  %v4467_v8 = vld [vmem:[%s6472_s23 + $0x10] sm:$0xff]  ;;  %v4472_v9 = vld [vmem:[%s6472_s23 + $0x8] sm:$0x1]  ;;  %v149_v28 = vmul.f32 %v4240_v25, %v148_v27 }
   0xd   :  { %6473 = vst [vmem:[#allocation2_spill] sm:$0xff] %v4433_v0  ;;  %v4436_v1 = vrot.slane %v4433_v0, 1  ;;  %v4439_v2 = vrot.slane %v4433_v0, 2  ;;  %v4442_v3 = vrot.slane %v4433_v0, 3  ;;  %v4446_v4 = vrot.slane %v4433_v0, 4 }
   0xe   :  { %104 = vst [vmem:[#allocation1] ss:$9 sm:$0xff] %v4433_v0  ;;  %v4449_v5 = vrot.slane %v4433_v0, 5  ;;  %v4453_v6 = vrot.slane %v4433_v0, 6  ;;  %v4457_v7 = vrot.slane %v4433_v0, 7  ;;  %v4475_v10 = vrot.slane %v4467_v8, 1 }
   0xf   :  { %6474 = vst [vmem:[#allocation3_spill] sm:$0xff] %v4436_v1  ;;  %v4478_v12 = vrot.slane %v4467_v8, 2  ;;  %v4482_v14 = vrot.slane %v4467_v8, 3  ;;  %v4486_v15 = vrot.slane %v4467_v8, 4  ;;  %v4490_v16 = vrot.slane %v4467_v8, 5 }
  0x10   :  { %6475 = vst [vmem:[#allocation4_spill] sm:$0xff] %v4439_v2  ;;  %v4494_v17 = vrot.slane %v4467_v8, 6  ;;  %v4502_v18 = vrot.slane %v4467_v8, 7  ;;  %v4507_v19 = vld [vmem:[%s6472_s23 + $0x18] sm:$0x1]  ;;  %v150_v29 = vadd.f32 %v4240_v25, %v149_v28  ;;  %s6497_s23 = sld [smem:[#allocation33_spill]] }
  0x11   :  { %6476 = vst [vmem:[#allocation5_spill] sm:$0xff] %v4442_v3 }
  0x12   :  { %6477 = vst [vmem:[#allocation6_spill] sm:$0xff] %v4446_v4  ;;  %v4513_v30 = vsel %vm151_vm2, %v4240_v25, %v150_v29  ;;  %vm963_vm2 = vcmask 1040384  }
  0x13   :  { %6478 = vst [vmem:[#allocation7_spill] sm:$0xff] %v4449_v5 }
  0x14   :  { %106 = vst [vmem:[#allocation1 + $0x1] ss:$9 sm:$0xff] %v4436_v1 }
  0x15   :  { %6479 = vst [vmem:[#allocation8_spill] sm:$0xff] %v4453_v6 }
  0x16   :  { %108 = vst [vmem:[#allocation1 + $0x2] ss:$9 sm:$0xff] %v4439_v2 }
  0x17   :  { %6480 = vst [vmem:[#allocation9_spill] sm:$0xff] %v4457_v7 }
  0x18   :  { %110 = vst [vmem:[#allocation1 + $0x3] ss:$9 sm:$0xff] %v4442_v3 }
  0x19   :  { %112 = vst [vmem:[#allocation1 + $0x4] ss:$9 sm:$0xff] %v4446_v4 }
  0x1a   :  { %114 = vst [vmem:[#allocation1 + $0x5] ss:$9 sm:$0xff] %v4449_v5 }
  0x1b   :  { %116 = vst [vmem:[#allocation1 + $0x6] ss:$9 sm:$0xff] %v4453_v6 }
  0x1c   :  { %118 = vst [vmem:[#allocation1 + $0x7] ss:$9 sm:$0xff] %v4457_v7 }
  0x1d   :  { %6481 = vst [vmem:[#allocation10_spill] sm:$0xff] %v4467_v8 }
  0x1e   :  { %6482 = vst [vmem:[#allocation11_spill] sm:$0xff] %v4472_v9 }
  0x1f   :  { %6483 = vst [vmem:[#allocation12_spill] sm:$0xff] %v4475_v10 }
  0x20   :  { %6484 = vst [vmem:[#allocation13_spill] sm:$0xff] %v4478_v12 }
  0x21   :  { %6485 = vst [vmem:[#allocation14_spill] sm:$0xff] %v4482_v14 }
  0x22   :  { %6486 = vst [vmem:[#allocation15_spill] sm:$0xff] %v4486_v15 }
  0x23   :  { %v119_v11 = vld [vmem:[#allocation1] sm:$0xff]  ;;  %6487 = vst [vmem:[#allocation16_spill] sm:$0xff] %v4490_v16 }
  0x24   :  { %v136_v13 = vsel %vm6452_vm0, %v119_v11, 0.0  ;;  %120 = vst [vmem:[#allocation1] ss:$9 sm:$0xff] %v4472_v9 }
  0x25   :  { %137 = vadd.xlane.f32.xlu0 %v136_v13  ;;  %121 = vst [vmem:[#allocation1 + $0x1] ss:$9 sm:$0xff] %v4467_v8 }
  0x26   :  { %122 = vst [vmem:[#allocation1 + $0x2] ss:$9 sm:$0xff] %v4475_v10 }
  0x27   :  { %6488 = vst [vmem:[#allocation17_spill] sm:$0xff] %v4494_v17 }
  0x28   :  { %123 = vst [vmem:[#allocation1 + $0x3] ss:$9 sm:$0xff] %v4478_v12 }
  0x29   :  { %124 = vst [vmem:[#allocation1 + $0x4] ss:$9 sm:$0xff] %v4482_v14 }
  0x2a   :  { %125 = vst [vmem:[#allocation1 + $0x5] ss:$9 sm:$0xff] %v4486_v15 }
  0x2b   :  { %126 = vst [vmem:[#allocation1 + $0x6] ss:$9 sm:$0xff] %v4490_v16 }
  0x2c   :  { %127 = vst [vmem:[#allocation1 + $0x7] ss:$9 sm:$0xff] %v4494_v17 }
  0x2d   :  { %6489 = vst [vmem:[#allocation18_spill] sm:$0xff] %v4502_v18 }
  0x2e   :  { %6490 = vst [vmem:[#allocation19_spill] sm:$0xff] %v4507_v19 }
  0x2f   :  { %6491 = vst [vmem:[#allocation20_spill] sm:$0xff] %v4513_v30 }
  0x33   :  { %v128_v20 = vld [vmem:[#allocation1] sm:$0xff] }
  0x34   :  { %v139_v21 = vsel %vm6452_vm0, %v128_v20, 0.0  ;;  %129 = vst [vmem:[#allocation1] ss:$9 sm:$0xff] %v4502_v18 }
  0x35   :  { %140 = vadd.xlane.f32.xlu0 %v139_v21  ;;  %130 = vst [vmem:[#allocation1 + $0x1] ss:$9 sm:$0xff] %v4507_v19 }
  0x3c   :  { %v131_v22 = vld [vmem:[#allocation1] sm:$0xff] }
  0x3d   :  { %v143_v23 = vsel %vm6451_vm1, %v131_v22, 0.0 }
  0x3e   :  { %144 = vadd.xlane.f32.xlu1 %v143_v23 }
  0x98   :  { %v138_v31 = vpop.xlane.xlu0 %137 }
  0x99   :  { %v153_v32 = vmul.f32 %v4513_v30, %v138_v31 }
  0x9b   :  { %v159_v33 = vperm.slane %v153_v32, 0  ;;  %v160_v34 = vperm.slane %v153_v32, 1  ;;  %v161_v35 = vperm.slane %v153_v32, 2  ;;  %v162_v36 = vperm.slane %v153_v32, 3 }
  0x9c   :  { %v163_v37 = vperm.slane %v153_v32, 4  ;;  %v164_v38 = vperm.slane %v153_v32, 5  ;;  %v165_v39 = vperm.slane %v153_v32, 6  ;;  %v166_v40 = vperm.slane %v153_v32, 7 }
  0x9d   :  { %v4517_v41 = vsub.f32 %v4433_v0, %v159_v33  ;;  %v4520_v42 = vsub.f32 %v4436_v1, %v160_v34  ;;  %v4523_v43 = vsub.f32 %v4439_v2, %v161_v35  ;;  %v4526_v44 = vsub.f32 %v4442_v3, %v162_v36 }
  0x9e   :  { %v4529_v45 = vsub.f32 %v4446_v4, %v163_v37  ;;  %v4532_v46 = vsub.f32 %v4449_v5, %v164_v38  ;;  %v4535_v47 = vsub.f32 %v4453_v6, %v165_v39  ;;  %v4544_v51 = vsub.f32 %v4457_v7, %v166_v40 }
  0x9f   :  { %v213_v48 = vmul.f32 %v4517_v41, %v4517_v41  ;;  %v214_v49 = vmul.f32 %v4520_v42, %v4520_v42  ;;  %v215_v50 = vmul.f32 %v4523_v43, %v4523_v43  ;;  %v216_v52 = vmul.f32 %v4526_v44, %v4526_v44 }
  0xa0   :  { %v217_v53 = vmul.f32 %v4529_v45, %v4529_v45  ;;  %v218_v54 = vmul.f32 %v4532_v46, %v4532_v46  ;;  %v219_v55 = vmul.f32 %v4535_v47, %v4535_v47  ;;  %v220_v56 = vmul.f32 %v4544_v51, %v4544_v51 }
  0xa1   :  { %249 = vst [vmem:[#allocation1] ss:$9 sm:$0xff] %v213_v48 }
  0xa2   :  { %251 = vst [vmem:[#allocation1 + $0x1] ss:$9 sm:$0xff] %v214_v49 }
  0xa3   :  { %253 = vst [vmem:[#allocation1 + $0x2] ss:$9 sm:$0xff] %v215_v50 }
  0xa4   :  { %255 = vst [vmem:[#allocation1 + $0x3] ss:$9 sm:$0xff] %v216_v52 }
  0xa5   :  { %257 = vst [vmem:[#allocation1 + $0x4] ss:$9 sm:$0xff] %v217_v53 }
  0xa6   :  { %259 = vst [vmem:[#allocation1 + $0x5] ss:$9 sm:$0xff] %v218_v54 }
  0xa7   :  { %261 = vst [vmem:[#allocation1 + $0x6] ss:$9 sm:$0xff] %v219_v55 }
  0xa8   :  { %v141_v57 = vpop.xlane.xlu0 %140  ;;  %263 = vst [vmem:[#allocation1 + $0x7] ss:$9 sm:$0xff] %v220_v56 }
  0xa9   :  { %v154_v58 = vmul.f32 %v4513_v30, %v141_v57 }
  0xab   :  { %v167_v59 = vperm.slane %v154_v58, 0  ;;  %v168_v60 = vperm.slane %v154_v58, 1  ;;  %v169_v61 = vperm.slane %v154_v58, 2  ;;  %v170_v62 = vperm.slane %v154_v58, 3 }
  0xac   :  { %v171_v63 = vperm.slane %v154_v58, 4  ;;  %v172_v11 = vperm.slane %v154_v58, 5  ;;  %v173_v13 = vperm.slane %v154_v58, 6  ;;  %v174_v20 = vperm.slane %v154_v58, 7 }
  0xad   :  { %v4558_v21 = vsub.f32 %v4475_v10, %v169_v61  ;;  %v4561_v22 = vsub.f32 %v4478_v12, %v170_v62  ;;  %v4576_v27 = vsub.f32 %v4472_v9, %v167_v59  ;;  %v4583_v32 = vsub.f32 %v4467_v8, %v168_v60 }
  0xae   :  { %v4564_v23 = vsub.f32 %v4482_v14, %v171_v63  ;;  %v4567_v24 = vsub.f32 %v4486_v15, %v172_v11  ;;  %v4570_v25 = vsub.f32 %v4490_v16, %v173_v13  ;;  %v4573_v26 = vsub.f32 %v4494_v17, %v174_v20  ;;  %v4615_v13 = vld [vmem:[%s6492_s29] ss:$0 sm:$0xff] }
  0xaf   :  { %v223_v28 = vmul.f32 %v4558_v21, %v4558_v21  ;;  %v224_v29 = vmul.f32 %v4561_v22, %v4561_v22  ;;  %v264_v31 = vld [vmem:[#allocation1] sm:$0xff]  ;;  %v221_v40 = vmul.f32 %v4576_v27, %v4576_v27  ;;  %v222_v48 = vmul.f32 %v4583_v32, %v4583_v32 }
  0xb0   :  { %v225_v33 = vmul.f32 %v4564_v23, %v4564_v23  ;;  %v226_v34 = vmul.f32 %v4567_v24, %v4567_v24  ;;  %v227_v35 = vmul.f32 %v4570_v25, %v4570_v25  ;;  %v280_v37 = vsel %vm6452_vm0, %v264_v31, 0.0 }
  0xb1   :  { %267 = vst [vmem:[#allocation1 + $0x2] ss:$9 sm:$0xff] %v223_v28  ;;  %v145_v36 = vpop.xlane.xlu1 %144  ;;  %v228_v38 = vmul.f32 %v4573_v26, %v4573_v26  ;;  %281 = vadd.xlane.f32.xlu1 %v280_v37 }
  0xb2   :  { %268 = vst [vmem:[#allocation1 + $0x3] ss:$9 sm:$0xff] %v224_v29  ;;  %v155_v39 = vmul.f32 %v4513_v30, %v145_v36  ;;  %v4620_v29 = vld [vmem:[%s6493_s21] ss:$0 sm:$0xff]  ;;  %s6516_s21 = sld [smem:[#allocation34_spill]] }
  0xb3   :  { %269 = vst [vmem:[#allocation1 + $0x4] ss:$9 sm:$0xff] %v225_v33 }
  0xb4   :  { %270 = vst [vmem:[#allocation1 + $0x5] ss:$9 sm:$0xff] %v226_v34  ;;  %v175_v49 = vperm.slane %v155_v39, 0  ;;  %v176_v50 = vperm.slane %v155_v39, 1  ;;  %v6431_v34 = vrot.slane %v4615_v13, 2 }
  0xb5   :  { %271 = vst [vmem:[#allocation1 + $0x6] ss:$9 sm:$0xff] %v227_v35  ;;  %v6430_v35 = vrot.slane %v4615_v13, 3 }
  0xb6   :  { %272 = vst [vmem:[#allocation1 + $0x7] ss:$9 sm:$0xff] %v228_v38  ;;  %v4600_v52 = vsub.f32 %v4502_v18, %v175_v49  ;;  %v4603_v53 = vsub.f32 %v4507_v19, %v176_v50  ;;  %v6429_v38 = vrot.slane %v4615_v13, 4 }
  0xb7   :  { %265 = vst [vmem:[#allocation1] ss:$9 sm:$0xff] %v221_v40 }
  0xb8   :  { %266 = vst [vmem:[#allocation1 + $0x1] ss:$9 sm:$0xff] %v222_v48  ;;  %v229_v54 = vmul.f32 %v4600_v52, %v4600_v52  ;;  %v230_v55 = vmul.f32 %v4603_v53, %v4603_v53 }
  0xbf   :  { %v273_v56 = vld [vmem:[#allocation1] sm:$0xff] }
  0xc0   :  { %274 = vst [vmem:[#allocation1] ss:$9 sm:$0xff] %v229_v54  ;;  %v283_v57 = vsel %vm6452_vm0, %v273_v56, 0.0 }
  0xc1   :  { %275 = vst [vmem:[#allocation1 + $0x1] ss:$9 sm:$0xff] %v230_v55  ;;  %284 = vadd.xlane.f32.xlu2 %v283_v57 }
  0xc8   :  { %v276_v58 = vld [vmem:[#allocation1] sm:$0xff] }
  0xc9   :  { %v286_v59 = vsel %vm6451_vm1, %v276_v58, 0.0  ;;  %vm6454_vm1 = vcmask 1045506  }
  0xca   :  { %287 = vadd.xlane.f32.xlu2 %v286_v59 }
 0x124   :  { %v282_v60 = vpop.xlane.xlu1 %281 }
 0x125   :  { %v289_v61 = vmul.f32 %v282_v60, %v4513_v30  ;;  %v4639_v60 = vrot.slane %v4615_v13, 1 }
 0x127   :  { %v292_v62 = vadd.f32 1e-06, %v289_v61  ;;  %v4642_v61 = vrot.slane %v4620_v29, 1 }
 0x129   :  { %4241 = vrsqrt.f32 %v292_v62  ;;  %vm301_vm4 = vweird.f32 %v292_v62 }
 0x12f   :  { %v4242_v63 = vpop.eup %4241 }
 0x130   :  { %v296_v11 = vmul.f32 %v4242_v63, %v292_v62  ;;  %vm302_vm3 = vweird.f32 %v4242_v63 }
 0x131   :  { %vm303_vm5 = vmor %vm301_vm4, %vm302_vm3  ;;  %vm980_vm3 = vcmask 1041409   ;;  %vm6460_vm4 = vcmask 1044484  }
 0x132   :  { %v297_v20 = vmul.f32 %v4242_v63, %v296_v11 }
 0x134   :  { %v285_v28 = vpop.xlane.xlu2 %284  ;;  %v298_v31 = vmul.f32 0.5, %v297_v20 }
 0x135   :  { %v290_v33 = vmul.f32 %v285_v28, %v4513_v30 }
 0x136   :  { %v299_v36 = vsub.f32 1.5, %v298_v31 }
 0x137   :  { %v4625_v37 = vadd.f32 1e-06, %v290_v33 }
 0x138   :  { %v300_v50 = vmul.f32 %v4242_v63, %v299_v36 }
 0x139   :  { %4243 = vrsqrt.f32 %v4625_v37  ;;  %vm311_vm7 = vweird.f32 %v4625_v37 }
 0x13a   :  { %v304_v59 = vsel %vm303_vm5, %v4242_v63, %v300_v50  ;;  %vm986_vm5 = vcmask 1045509  }
 0x13b   :  { %v328_v62 = vperm.slane %v304_v59, 0  ;;  %v329_v11 = vperm.slane %v304_v59, 1  ;;  %v330_v20 = vperm.slane %v304_v59, 2  ;;  %v331_v28 = vperm.slane %v304_v59, 3 }
 0x13c   :  { %v332_v31 = vperm.slane %v304_v59, 4  ;;  %v333_v33 = vperm.slane %v304_v59, 5  ;;  %v334_v36 = vperm.slane %v304_v59, 6  ;;  %v335_v56 = vperm.slane %v304_v59, 7 }
 0x13d   :  { %v364_v57 = vmul.f32 %v328_v62, %v4517_v41  ;;  %v366_v55 = vmul.f32 %v330_v20, %v4523_v43  ;;  %v367_v63 = vmul.f32 %v331_v28, %v4526_v44  ;;  %v365_v50 = vmul.f32 %v329_v11, %v4520_v42 }
 0x13e   :  { %v368_v54 = vmul.f32 %v332_v31, %v4529_v45  ;;  %v369_v49 = vmul.f32 %v333_v33, %v4532_v46  ;;  %v370_v48 = vmul.f32 %v334_v36, %v4535_v47  ;;  %v371_v40 = vmul.f32 %v335_v56, %v4544_v51  ;;  %v3883_v31 = vld [vmem:[%s6497_s23 + $0x90] sm:$0xf0]  ;;  %v3833_v36 = vld [vmem:[%s6497_s23] sm:$0xf] }
 0x13f   :  { %v4244_v58 = vpop.eup %4243  ;;  %v399_v39 = vmul.f32 %v4615_v13, %v364_v57  ;;  %v401_v41 = vmul.f32 %v6431_v34, %v366_v55  ;;  %v402_v43 = vmul.f32 %v6430_v35, %v367_v63  ;;  %v6494_v45 = vrot.slane %v4615_v13, 5  ;;  %v288_v57 = vpop.xlane.xlu2 %287  ;;  %v3881_v55 = vld [vmem:[%s6497_s23 + $0x60] sm:$0xf]  ;;  %v4159_v63 = vld [vmem:[%s6497_s23 + $0x2c] sm:$0xf0] }
 0x140   :  { %v306_v44 = vmul.f32 %v4244_v58, %v4625_v37  ;;  %v403_v42 = vmul.f32 %v6429_v38, %v368_v54  ;;  %v6495_v47 = vrot.slane %v4615_v13, 6  ;;  %v6496_v51 = vrot.slane %v4615_v13, 7 }
 0x141   :  { %v404_v46 = vmul.f32 %v6494_v45, %v369_v49  ;;  %v434_v62 = vadd.f32 %v4620_v29, %v399_v39  ;;  %v6498_v11 = vrot.slane %v4620_v29, 2  ;;  %v6499_v54 = vrot.slane %v4620_v29, 3 }
 0x142   :  { %v405_v59 = vmul.f32 %v6495_v47, %v370_v48  ;;  %v406_v56 = vmul.f32 %v6496_v51, %v371_v40  ;;  %v307_v49 = vmul.f32 %v4244_v58, %v306_v44  ;;  %v4171_v48 = vld [vmem:[%s6497_s23 + $0x8c] sm:$0xf0]  ;;  %v4165_v40 = vld [vmem:[%s6497_s23 + $0x64] sm:$0xf]  ;;  %v6500_v39 = vrot.slane %v4620_v29, 4 }
 0x143   :  { %v436_v20 = vadd.f32 %v6498_v11, %v401_v41  ;;  %v437_v28 = vadd.f32 %v6499_v54, %v402_v43  ;;  %v4153_v41 = vld [vmem:[%s6497_s23 + $0x4] sm:$0xf]  ;;  %v6501_v43 = vrot.slane %v4620_v29, 5  ;;  %470 = vst [vmem:[#allocation1] ss:$9 sm:$0xff] %v434_v62  ;;  %v400_v47 = vmul.f32 %v4639_v60, %v365_v50 }
 0x144   :  { %v438_v33 = vadd.f32 %v6500_v39, %v403_v42  ;;  %v308_v45 = vmul.f32 0.5, %v307_v49  ;;  %v291_v42 = vmul.f32 %v288_v57, %v4513_v30  ;;  %v3835_v51 = vld [vmem:[%s6497_s23 + $0x30] sm:$0xf0]  ;;  %v6502_v11 = vrot.slane %v4620_v29, 6 }
 0x145   :  { %v439_v44 = vadd.f32 %v6501_v43, %v404_v46  ;;  %474 = vst [vmem:[#allocation1 + $0x2] ss:$9 sm:$0xff] %v436_v20  ;;  %v3882_v39 = vor.u32 %v4171_v48, %v3881_v55  ;;  %v3886_v38 = vor.u32 %v4165_v40, %v3883_v31  ;;  %v6503_v35 = vrot.slane %v4620_v29, 7 }
 0x146   :  { %v440_v54 = vadd.f32 %v6502_v11, %v405_v59  ;;  %476 = vst [vmem:[#allocation1 + $0x3] ss:$9 sm:$0xff] %v437_v28  ;;  %v309_v46 = vsub.f32 1.5, %v308_v45  ;;  %vm312_vm6 = vweird.f32 %v4244_v58  ;;  %v4705_v62 = vadd.f32 1e-06, %v291_v42 }
 0x147   :  { %v441_v34 = vadd.f32 %v6503_v35, %v406_v56  ;;  %478 = vst [vmem:[#allocation1 + $0x4] ss:$9 sm:$0xff] %v438_v33  ;;  %v435_v50 = vadd.f32 %v4642_v61, %v400_v47  ;;  %687 = vmatpush.bf16.msra.mxu0 %v3882_v39  ;;  %705 = vmatpush.bf16.msra.mxu1 %v3886_v38  ;;  %vm313_vm8 = vmor %vm311_vm7, %vm312_vm6  ;;  %v6504_v45 = vrot.slane %v4615_v13, 2  ;;  %v6508_v42 = vrot.slane %v4615_v13, 6 }
 0x148   :  { %v3834_v57 = vor.u32 %v4159_v63, %v3833_v36  ;;  %v3838_v49 = vor.u32 %v4153_v41, %v3835_v51  ;;  %480 = vst [vmem:[#allocation1 + $0x5] ss:$9 sm:$0xff] %v439_v44  ;;  %v310_v59 = vmul.f32 %v4244_v58, %v309_v46  ;;  %4223 = vmatpush.bf16.msra.mxu2 %v3882_v39  ;;  %4245 = vrsqrt.f32 %v4705_v62  ;;  %v4173_v39 = vld [vmem:[%s6497_s23 + $0x9c] sm:$0xf0]  ;;  %v4167_v46 = vld [vmem:[%s6497_s23 + $0x74] sm:$0xf] }
 0x149   :  { %4225 = vmatpush.bf16.msra.mxu3 %v3886_v38  ;;  %482 = vst [vmem:[#allocation1 + $0x6] ss:$9 sm:$0xff] %v440_v54  ;;  %v6509_v11 = vrot.slane %v4615_v13, 7  ;;  %vm321_vm10 = vweird.f32 %v4705_v62  ;;  %vm6459_vm6 = vcmask 1041408   ;;  %vm6458_vm7 = vcmask 1042433  }
 0x14a   :  { %484 = vst [vmem:[#allocation1 + $0x7] ss:$9 sm:$0xff] %v441_v34  ;;  %v314_v35 = vsel %vm313_vm8, %v4244_v58, %v310_v59  ;;  %vm6455_vm8 = vcmask 1043458  }
 0x14b   :  { %v336_v56 = vperm.slane %v314_v35, 0  ;;  %v337_v55 = vperm.slane %v314_v35, 1  ;;  %v338_v20 = vperm.slane %v314_v35, 2  ;;  %v339_v28 = vperm.slane %v314_v35, 3  ;;  %472 = vst [vmem:[#allocation1 + $0x1] ss:$9 sm:$0xff] %v435_v50  ;;  %688 = vmatpush.bf16.msra.mxu0 %v3834_v57  ;;  %706 = vmatpush.bf16.msra.mxu1 %v3838_v49 }
 0x14c   :  { %v340_v48 = vperm.slane %v314_v35, 4  ;;  %v341_v40 = vperm.slane %v314_v35, 5  ;;  %v342_v31 = vperm.slane %v314_v35, 6  ;;  %v343_v33 = vperm.slane %v314_v35, 7  ;;  %4224 = vmatpush.bf16.msra.mxu2 %v3834_v57  ;;  %v3899_v50 = vld [vmem:[%s6497_s23 + $0xa0] sm:$0xf0] }
 0x14d   :  { %4226 = vmatpush.bf16.msra.mxu3 %v3838_v49  ;;  %v372_v37 = vmul.f32 %v336_v56, %v4576_v27  ;;  %v374_v34 = vmul.f32 %v338_v20, %v4558_v21  ;;  %v375_v38 = vmul.f32 %v339_v28, %v4561_v22  ;;  %v373_v58 = vmul.f32 %v337_v55, %v4583_v32  ;;  %v3897_v22 = vld [vmem:[%s6497_s23 + $0x70] sm:$0xf]  ;;  %v4161_v20 = vld [vmem:[%s6497_s23 + $0x3c] sm:$0xf0] }
 0x14e   :  { %v376_v36 = vmul.f32 %v340_v48, %v4564_v23  ;;  %v377_v63 = vmul.f32 %v341_v40, %v4567_v24  ;;  %v378_v41 = vmul.f32 %v342_v31, %v4570_v25  ;;  %v379_v43 = vmul.f32 %v343_v33, %v4573_v26  ;;  %v4726_v32 = vpop.eup %4245  ;;  %v3849_v55 = vld [vmem:[%s6497_s23 + $0x10] sm:$0xf]  ;;  %v4155_v33 = vld [vmem:[%s6497_s23 + $0x14] sm:$0xf] }
 0x14f   :  { %v407_v44 = vmul.f32 %v4615_v13, %v372_v37  ;;  %v409_v47 = vmul.f32 %v6504_v45, %v374_v34  ;;  %v6505_v27 = vrot.slane %v4615_v13, 3  ;;  %v6506_v23 = vrot.slane %v4615_v13, 4  ;;  %v3851_v37 = vld [vmem:[%s6497_s23 + $0x40] sm:$0xf0] }
 0x150   :  { %v6507_v25 = vrot.slane %v4615_v13, 5  ;;  %v413_v51 = vmul.f32 %v6508_v42, %v378_v41  ;;  %v414_v54 = vmul.f32 %v6509_v11, %v379_v43  ;;  %v6510_v49 = vrot.slane %v4620_v29, 2  ;;  %v3841_v11 = vld [vmem:[%s6497_s23 + $0x8] sm:$0xf] }
 0x151   :  { %v410_v21 = vmul.f32 %v6505_v27, %v375_v38  ;;  %v411_v24 = vmul.f32 %v6506_v23, %v376_v36  ;;  %v442_v57 = vadd.f32 %v4620_v29, %v407_v44  ;;  %v6511_v35 = vrot.slane %v4620_v29, 3  ;;  %v3889_v27 = vld [vmem:[%s6497_s23 + $0x68] sm:$0xf] }
 0x152   :  { %v412_v26 = vmul.f32 %v6507_v25, %v377_v63  ;;  %v444_v59 = vadd.f32 %v6510_v49, %v409_v47  ;;  %v6512_v28 = vrot.slane %v4620_v29, 4  ;;  %v485_v40 = vld [vmem:[#allocation1] sm:$0xff]  ;;  %v408_v31 = vmul.f32 %v4639_v60, %v373_v58  ;;  %v4166_v25 = vld [vmem:[%s6497_s23 + $0x6c] sm:$0xf] }
 0x153   :  { %v445_v56 = vadd.f32 %v6511_v35, %v410_v21  ;;  %v6513_v34 = vrot.slane %v4620_v29, 5  ;;  %486 = vst [vmem:[#allocation1] ss:$9 sm:$0xff] %v442_v57  ;;  %v316_v36 = vmul.f32 %v4726_v32, %v4705_v62  ;;  %v3898_v63 = vor.u32 %v4173_v39, %v3897_v22  ;;  %v4172_v21 = vld [vmem:[%s6497_s23 + $0x94] sm:$0xf0] }
 0x154   :  { %v446_v48 = vadd.f32 %v6512_v28, %v411_v24  ;;  %v3902_v41 = vor.u32 %v4167_v46, %v3899_v50  ;;  %v6514_v43 = vrot.slane %v4620_v29, 6  ;;  %v6515_v44 = vrot.slane %v4620_v29, 7  ;;  %488 = vst [vmem:[#allocation1 + $0x2] ss:$9 sm:$0xff] %v444_v59  ;;  %v4154_v50 = vld [vmem:[%s6497_s23 + $0xc] sm:$0xf] }
 0x155   :  { %v447_v38 = vadd.f32 %v6513_v34, %v412_v26  ;;  %v3850_v47 = vor.u32 %v4161_v20, %v3849_v55  ;;  %489 = vst [vmem:[#allocation1 + $0x3] ss:$9 sm:$0xff] %v445_v56  ;;  %v317_v22 = vmul.f32 %v4726_v32, %v316_v36  ;;  %759 = vmatpush.bf16.msrb.mxu0 %v3898_v63  ;;  %v3891_v26 = vld [vmem:[%s6497_s23 + $0x98] sm:$0xf0]  ;;  %vm322_vm9 = vweird.f32 %v4726_v32  ;;  %v3913_v36 = vld [vmem:[%s6497_s23 + $0x80] sm:$0xf] }
 0x156   :  { %v448_v58 = vadd.f32 %v6514_v43, %v413_v51  ;;  %v449_v45 = vadd.f32 %v6515_v44, %v414_v54  ;;  %777 = vmatpush.bf16.msrb.mxu1 %v3902_v41  ;;  %v3854_v23 = vor.u32 %v4155_v33, %v3851_v37  ;;  %v3890_v24 = vor.u32 %v4172_v21, %v3889_v27  ;;  %v4160_v54 = vld [vmem:[%s6497_s23 + $0x34] sm:$0xf0]  ;;  %v3843_v57 = vld [vmem:[%s6497_s23 + $0x38] sm:$0xf0]  ;;  %vm323_vm11 = vmor %vm321_vm10, %vm322_vm9 }
 0x157   :  { %490 = vst [vmem:[#allocation1 + $0x4] ss:$9 sm:$0xff] %v446_v48  ;;  %v443_v42 = vadd.f32 %v4642_v61, %v408_v31  ;;  %v3894_v51 = vor.u32 %v4166_v25, %v3891_v26  ;;  %v318_v39 = vmul.f32 0.5, %v317_v22  ;;  %v3842_v46 = vor.u32 %v4160_v54, %v3841_v11  ;;  %v4175_v63 = vld [vmem:[%s6497_s23 + $0xac] sm:$0xf0] }
 0x158   :  { %491 = vst [vmem:[#allocation1 + $0x5] ss:$9 sm:$0xff] %v447_v38  ;;  %723 = vmatpush.bf16.msrb.mxu2 %v3890_v24  ;;  %v3846_v59 = vor.u32 %v4154_v50, %v3843_v57  ;;  %v4169_v41 = vld [vmem:[%s6497_s23 + $0x84] sm:$0xf]  ;;  %v3914_v43 = vor.u32 %v4175_v63, %v3913_v36  ;;  %v3867_v21 = vld [vmem:[%s6497_s23 + $0x50] sm:$0xf0] }
 0x159   :  { %492 = vst [vmem:[#allocation1 + $0x6] ss:$9 sm:$0xff] %v448_v58  ;;  %741 = vmatpush.bf16.msrb.mxu3 %v3894_v51  ;;  %v319_v49 = vsub.f32 1.5, %v318_v39  ;;  %760 = vmatpush.bf16.msrb.mxu0 %v3850_v47  ;;  %v3915_v58 = vld [vmem:[%s6497_s23 + $0xb0] sm:$0xf0]  ;;  %vm6457_vm9 = vcmask 1045504  }
 0x15a   :  { %493 = vst [vmem:[#allocation1 + $0x7] ss:$9 sm:$0xff] %v449_v45  ;;  %778 = vmatpush.bf16.msrb.mxu1 %v3854_v23  ;;  %v3918_v44 = vor.u32 %v4169_v41, %v3915_v58  ;;  %v3865_v45 = vld [vmem:[%s6497_s23 + $0x20] sm:$0xf]  ;;  %v4163_v47 = vld [vmem:[%s6497_s23 + $0x4c] sm:$0xf0] }
 0x15b   :  { %487 = vst [vmem:[#allocation1 + $0x1] ss:$9 sm:$0xff] %v443_v42  ;;  %v320_v35 = vmul.f32 %v4726_v32, %v319_v49  ;;  %v4157_v27 = vld [vmem:[%s6497_s23 + $0x24] sm:$0xf]  ;;  %v3866_v22 = vor.u32 %v4163_v47, %v3865_v45  ;;  %v3857_v24 = vld [vmem:[%s6497_s23 + $0x18] sm:$0xf] }
 0x15c   :  { %724 = vmatpush.bf16.msrb.mxu2 %v3842_v46  ;;  %v3870_v23 = vor.u32 %v4157_v27, %v3867_v21  ;;  %v4162_v25 = vld [vmem:[%s6497_s23 + $0x44] sm:$0xf0]  ;;  %v4156_v26 = vld [vmem:[%s6497_s23 + $0x1c] sm:$0xf]  ;;  %v3859_v51 = vld [vmem:[%s6497_s23 + $0x48] sm:$0xf0] }
 0x15d   :  { %742 = vmatpush.bf16.msrb.mxu3 %v3846_v59  ;;  %v324_v56 = vsel %vm323_vm11, %v4726_v32, %v320_v35  ;;  %v3858_v42 = vor.u32 %v4162_v25, %v3857_v24  ;;  %v3862_v11 = vor.u32 %v4156_v26, %v3859_v51  ;;  %v3921_v54 = vld [vmem:[%s6497_s23 + $0x88] sm:$0xf]  ;;  %v4176_v39 = vld [vmem:[%s6497_s23 + $0xb4] sm:$0xf0]  ;;  %v4170_v46 = vld [vmem:[%s6497_s23 + $0x8c] sm:$0xf] }
 0x15e   :  { %v344_v55 = vperm.slane %v324_v56, 0  ;;  %v345_v20 = vperm.slane %v324_v56, 1  ;;  %v3922_v50 = vor.u32 %v4176_v39, %v3921_v54  ;;  %v3923_v57 = vld [vmem:[%s6497_s23 + $0xb8] sm:$0xf0]  ;;  %v3873_v49 = vld [vmem:[%s6497_s23 + $0x28] sm:$0xf] }
 0x15f   :  { %v4164_v59 = vld [vmem:[%s6497_s23 + $0x54] sm:$0xf0]  ;;  %v3926_v35 = vor.u32 %v4170_v46, %v3923_v57  ;;  %v4158_v56 = vld [vmem:[%s6497_s23 + $0x2c] sm:$0xf]  ;;  %vm6462_vm10 = vcmask 1044483   ;;  %vm6461_vm11 = vcmask 1046529  }
 0x160   :  { %v380_v28 = vmul.f32 %v344_v55, %v4600_v52  ;;  %v381_v48 = vmul.f32 %v345_v20, %v4603_v53  ;;  %v3905_v52 = vld [vmem:[%s6497_s23 + $0x78] sm:$0xf]  ;;  %v4174_v53 = vld [vmem:[%s6497_s23 + $0xa4] sm:$0xf0]  ;;  %v3875_v55 = vld [vmem:[%s6497_s23 + $0x58] sm:$0xf0]  ;;  %v3874_v20 = vor.u32 %v4164_v59, %v3873_v49 }
 0x162   :  { %v494_v31 = vld [vmem:[#allocation1] sm:$0xff]  ;;  %v415_v33 = vmul.f32 %v4615_v13, %v380_v28  ;;  %v416_v37 = vmul.f32 %v4639_v60, %v381_v48  ;;  %v4168_v13 = vld [vmem:[%s6497_s23 + $0x7c] sm:$0xf]  ;;  %v3878_v28 = vor.u32 %v4158_v56, %v3875_v55 }
 0x163   :  { %v4807_v34 = vpack.c.bf16 %v494_v31, %v485_v40  ;;  %v4936_v48 = vld [vmem:[%s6516_s21] sm:$0xff] }
 0x164   :  { %v450_v62 = vadd.f32 %v4620_v29, %v415_v33  ;;  %v451_v38 = vadd.f32 %v4642_v61, %v416_v37  ;;  %v3907_v29 = vld [vmem:[%s6497_s23 + $0xa8] sm:$0xf0]  ;;  %v3906_v61 = vor.u32 %v4174_v53, %v3905_v52  ;;  %v4939_v31 = vperm.slane %v4936_v48, 1 }
 0x165   :  { %3927 = vmatmul.msk.bf16.vlgmr.msra.gmra.mxu0 %vm6452_vm0, %v4807_v34  ;;  %3929 = vmatmul.msk.bf16.vlgmr.msra.gmra.mxu1 %vm6452_vm0, %v4807_v34  ;;  %v3910_v32 = vor.u32 %v4168_v13, %v3907_v29  ;;  %v4942_v33 = vperm.slane %v4936_v48, 0  ;;  %v4987_v51 = vperm.slane %v4936_v48, 4 }
 0x166   :  { %495 = vst [vmem:[#allocation1] ss:$9 sm:$0xff] %v450_v62  ;;  %831 = vmatpush.bf16.msra.mxu0 %v3914_v43  ;;  %849 = vmatpush.bf16.msra.mxu1 %v3918_v44 }
 0x167   :  { %496 = vst [vmem:[#allocation1 + $0x1] ss:$9 sm:$0xff] %v451_v38 }
 0x16a   :  { %832 = vmatpush.bf16.msra.mxu0 %v3866_v22  ;;  %850 = vmatpush.bf16.msra.mxu1 %v3870_v23 }
 0x16e   :  { %v497_v60 = vld [vmem:[#allocation1] sm:$0xff] }
 0x16f   :  { %v4827_v40 = vpack.c.bf16 %v497_v60, %v497_v60 }
 0x171   :  { %3928 = vmatmul.msk.bf16.vlgmr.msra.gmra.mxu2 %vm6452_vm0, %v4827_v40  ;;  %3930 = vmatmul.msk.bf16.vlgmr.msra.gmra.mxu3 %vm6452_vm0, %v4827_v40 }
 0x172   :  { %795 = vmatpush.bf16.msra.mxu2 %v3906_v61  ;;  %813 = vmatpush.bf16.msra.mxu3 %v3910_v32 }
 0x175   :  { %3935 = vmatmul.msk.bf16.vlgmr.msrb.gmra.mxu0 %vm6452_vm0, %v4807_v34  ;;  %3937 = vmatmul.msk.bf16.vlgmr.msrb.gmra.mxu1 %vm6452_vm0, %v4807_v34 }
 0x176   :  { %796 = vmatpush.bf16.msra.mxu2 %v3858_v42  ;;  %814 = vmatpush.bf16.msra.mxu3 %v3862_v11  ;;  %v4990_v11 = vperm.slane %v4936_v48, 5 }
 0x181   :  { %3931 = vmatmul.msk.bf16.vlgmr.msrb.gmra.mxu2 %vm6452_vm0, %v4807_v34  ;;  %3933 = vmatmul.msk.bf16.vlgmr.msrb.gmra.mxu3 %vm6452_vm0, %v4807_v34 }
 0x182   :  { %867 = vmatpush.bf16.msrb.mxu2 %v3922_v50  ;;  %885 = vmatpush.bf16.msrb.mxu3 %v3926_v35 }
 0x185   :  { %3936 = vmatmul.msk.bf16.gmra.mxu0 %vm6452_vm0, %v4827_v40  ;;  %3938 = vmatmul.msk.bf16.gmra.mxu1 %vm6452_vm0, %v4827_v40 }
 0x186   :  { %868 = vmatpush.bf16.msrb.mxu2 %v3874_v20  ;;  %886 = vmatpush.bf16.msrb.mxu3 %v3878_v28 }
 0x191   :  { %3932 = vmatmul.msk.bf16.gmra.mxu2 %vm6452_vm0, %v4827_v40  ;;  %3934 = vmatmul.msk.bf16.gmra.mxu3 %vm6452_vm0, %v4827_v40 }
 0x195   :  { %3943 = vmatmul.msk.bf16.vlgmr.msra.gmra.mxu0 %vm6452_vm0, %v4807_v34  ;;  %3945 = vmatmul.msk.bf16.vlgmr.msra.gmra.mxu1 %vm6452_vm0, %v4807_v34 }
 0x1a1   :  { %3939 = vmatmul.msk.bf16.vlgmr.msra.gmra.mxu2 %vm6452_vm0, %v4807_v34  ;;  %3941 = vmatmul.msk.bf16.vlgmr.msra.gmra.mxu3 %vm6452_vm0, %v4807_v34 }
 0x1a5   :  { %3944 = vmatmul.msk.bf16.gmra.mxu0 %vm6452_vm0, %v4827_v40  ;;  %3946 = vmatmul.msk.bf16.gmra.mxu1 %vm6452_vm0, %v4827_v40 }
 0x1b1   :  { %3940 = vmatmul.msk.bf16.gmra.mxu2 %vm6452_vm0, %v4827_v40  ;;  %3942 = vmatmul.msk.bf16.gmra.mxu3 %vm6452_vm0, %v4827_v40 }
 0x1c1   :  { %3947 = vmatmul.msk.bf16.vlgmr.msrb.gmra.mxu2 %vm6452_vm0, %v4807_v34  ;;  %3949 = vmatmul.msk.bf16.vlgmr.msrb.gmra.mxu3 %vm6452_vm0, %v4807_v34 }
 0x1d1   :  { %3948 = vmatmul.msk.bf16.gmra.mxu2 %vm6452_vm0, %v4827_v40  ;;  %3950 = vmatmul.msk.bf16.gmra.mxu3 %vm6452_vm0, %v4827_v40  ;;  %vm6456_vm0 = vcmask 1046531  }
 0x1e2   :  { %v690_v37 = vpop.f32.mrf.mxu0  ;;  %v708_v62 = vpop.f32.mrf.mxu1 }
 0x1e3   :  { %v709_v34 = vadd.f32 %v708_v62, %v4939_v31  ;;  %v691_v38 = vadd.f32 %v690_v37, %v4942_v33 }
 0x1e5   :  { %v933_v52 = vrot.slane %v709_v34, 7  ;;  %v5007_v34 = vld [vmem:[%s6516_s21 + $0x8] sm:$0xf] }
 0x1e7   :  { %v4947_v53 = vsel %vm965_vm12, %v691_v38, %v933_v52  ;;  %v4950_v13 = vsel %vm982_vm14, %v691_v38, %v933_v52  ;;  %v4953_v29 = vsel %vm971_vm13, %v691_v38, %v933_v52  ;;  %v4956_v60 = vsel %vm6466_vm15, %v933_v52, %v691_v38 }
 0x1e8   :  { %v4959_v61 = vsel %vm963_vm2, %v691_v38, %v933_v52  ;;  %v4962_v32 = vsel %vm980_vm3, %v691_v38, %v933_v52  ;;  %v4965_v40 = vsel %vm6460_vm4, %v691_v38, %v933_v52  ;;  %v4968_v36 = vsel %vm986_vm5, %v691_v38, %v933_v52 }
 0x1e9   :  { %v540_v38 = vperm.slane %v5007_v34, 1  ;;  %v539_v52 = vperm.slane %v5007_v34, 0 }
 0x1ea   :  { %v4970_v63 = vpop.f32.mrf.mxu0  ;;  %v4972_v41 = vpop.f32.mrf.mxu1 }
 0x1f2   :  { %v4974_v43 = vpop.f32.mrf.mxu0  ;;  %v4976_v58 = vpop.f32.mrf.mxu1 }
 0x1f4   :  { %v695_v44 = vpop.f32.mrf.mxu2  ;;  %v713_v45 = vpop.f32.mrf.mxu3 }
 0x1f5   :  { %v714_v47 = vadd.f32 %v713_v45, %v4939_v31  ;;  %v696_v27 = vadd.f32 %v695_v44, %v4942_v33 }
 0x1f7   :  { %v953_v21 = vrot.slane %v714_v47, 7  ;;  %v5012_v47 = vperm.slane %v4936_v48, 2 }
 0x1f9   :  { %v1171_v22 = vsel %vm963_vm2, %v696_v27, %v953_v21  ;;  %v1181_v23 = vsel %vm980_vm3, %v696_v27, %v953_v21  ;;  %v5015_v27 = vperm.slane %v4936_v48, 3 }
 0x1fa   :  { %v4982_v24 = vpop.f32.mrf.mxu0  ;;  %v4984_v25 = vpop.f32.mrf.mxu1 }
 0x1fc   :  { %v697_v26 = vpop.f32.mrf.mxu2  ;;  %v715_v42 = vpop.f32.mrf.mxu3 }
 0x202   :  { %v767_v54 = vpop.f32.mrf.mxu0  ;;  %v785_v39 = vpop.f32.mrf.mxu1 }
 0x203   :  { %v768_v46 = vadd.f32 %v767_v54, %v4987_v51  ;;  %v786_v50 = vadd.f32 %v785_v39, %v4990_v11 }
 0x204   :  { %v726_v57 = vpop.f32.mrf.mxu2  ;;  %v744_v49 = vpop.f32.mrf.mxu3 }
 0x205   :  { %v956_v59 = vrot.slane %v768_v46, 4  ;;  %v957_v35 = vrot.slane %v786_v50, 3 }
 0x207   :  { %v4995_v56 = vsel %vm6460_vm4, %v956_v59, %v957_v35  ;;  %v4998_v55 = vsel %vm986_vm5, %v956_v59, %v957_v35 }
 0x20a   :  { %v769_v20 = vpop.f32.mrf.mxu0  ;;  %v787_v28 = vpop.f32.mrf.mxu1 }
 0x20c   :  { %v5000_v37 = vpop.f32.mrf.mxu2  ;;  %v5002_v62 = vpop.f32.mrf.mxu3 }
 0x212   :  { %v834_v44 = vpop.f32.mrf.mxu0  ;;  %v852_v45 = vpop.f32.mrf.mxu1 }
 0x213   :  { %v853_v21 = vadd.f32 %v852_v45, %v540_v38  ;;  %v835_v46 = vadd.f32 %v834_v44, %v539_v52 }
 0x214   :  { %v731_v26 = vpop.f32.mrf.mxu2  ;;  %v749_v42 = vpop.f32.mrf.mxu3 }
 0x215   :  { %v732_v54 = vadd.f32 %v731_v26, %v5012_v47  ;;  %v750_v39 = vadd.f32 %v749_v42, %v5015_v27  ;;  %v940_v50 = vrot.slane %v853_v21, 7 }
 0x217   :  { %v954_v59 = vrot.slane %v732_v54, 6  ;;  %v955_v35 = vrot.slane %v750_v39, 5  ;;  %v5020_v20 = vsel %vm963_vm2, %v835_v46, %v940_v50  ;;  %v5023_v28 = vsel %vm980_vm3, %v835_v46, %v940_v50 }
 0x218   :  { %v5026_v45 = vsel %vm965_vm12, %v835_v46, %v940_v50  ;;  %v5029_v30 = vsel %vm982_vm14, %v835_v46, %v940_v50  ;;  %v5032_v26 = vsel %vm6460_vm4, %v835_v46, %v940_v50  ;;  %v5035_v44 = vsel %vm986_vm5, %v835_v46, %v940_v50 }
 0x219   :  { %v1172_v21 = vsel %vm965_vm12, %v954_v59, %v955_v35  ;;  %v1182_v42 = vsel %vm982_vm14, %v954_v59, %v955_v35  ;;  %v5040_v54 = vsel %vm971_vm13, %v835_v46, %v940_v50  ;;  %v5043_v39 = vsel %vm6466_vm15, %v940_v50, %v835_v46 }
 0x21a   :  { %v836_v19 = vpop.f32.mrf.mxu0  ;;  %v854_v18 = vpop.f32.mrf.mxu1  ;;  %v5046_v17 = vsel %vm6459_vm6, %v1171_v22, %v1172_v21  ;;  %v5049_v16 = vsel %vm6458_vm7, %v1181_v23, %v1182_v42  ;;  %v763_v59 = vadd.f32 %v4974_v43, %v4987_v51  ;;  %v781_v46 = vadd.f32 %v4976_v58, %v4990_v11 }
 0x21b   :  { %v855_v15 = vadd.f32 %v854_v18, %v540_v38  ;;  %v837_v10 = vadd.f32 %v836_v19, %v539_v52  ;;  %v727_v50 = vadd.f32 %v726_v57, %v5012_v47  ;;  %v745_v35 = vadd.f32 %v744_v49, %v5015_v27 }
 0x21c   :  { %v733_v14 = vpop.f32.mrf.mxu2  ;;  %v751_v12 = vpop.f32.mrf.mxu3  ;;  %v5081_v58 = vrot.slane %v763_v59, 4  ;;  %v5083_v57 = vrot.slane %v781_v46, 3  ;;  %v5086_v49 = vperm.slane %v4936_v48, 6  ;;  %v5089_v21 = vperm.slane %v4936_v48, 7 }
 0x21d   :  { %v950_v8 = vrot.slane %v855_v15, 7  ;;  %v5091_v6 = vrot.slane %v727_v50, 6  ;;  %v5093_v5 = vrot.slane %v745_v35, 5 }
 0x21e   :  { %v1003_v48 = vsel %vm971_vm13, %v5081_v58, %v5083_v57  ;;  %v1056_v35 = vsel %vm965_vm12, %v5081_v58, %v5083_v57 }
 0x21f   :  { %v5058_v22 = vsel %vm963_vm2, %v837_v10, %v950_v8  ;;  %v5061_v23 = vsel %vm980_vm3, %v837_v10, %v950_v8  ;;  %v5064_v12 = vsel %vm965_vm12, %v837_v10, %v950_v8  ;;  %v5067_v14 = vsel %vm982_vm14, %v837_v10, %v950_v8 }
 0x220   :  { %6517 = vst [vmem:[#allocation21_spill] sm:$0xff] %v5061_v23  ;;  %v5070_v15 = vsel %vm6460_vm4, %v837_v10, %v950_v8  ;;  %v5073_v18 = vsel %vm986_vm5, %v837_v10, %v950_v8  ;;  %v5076_v19 = vsel %vm971_vm13, %v837_v10, %v950_v8  ;;  %v5079_v43 = vsel %vm6466_vm15, %v950_v8, %v837_v10 }
 0x221   :  { %6518 = vst [vmem:[#allocation22_spill] sm:$0xff] %v5064_v12  ;;  %v1054_v2 = vsel %vm963_vm2, %v5091_v6, %v5093_v5  ;;  %v1066_v1 = vsel %vm980_vm3, %v5091_v6, %v5093_v5 }
 0x222   :  { %6519 = vst [vmem:[#allocation23_spill] sm:$0xff] %v5067_v14  ;;  %v839_v42 = vpop.f32.mrf.mxu0  ;;  %v857_v9 = vpop.f32.mrf.mxu1 }
 0x223   :  { %6520 = vst [vmem:[#allocation24_spill] sm:$0xff] %v5070_v15  ;;  %v858_v7 = vadd.f32 %v857_v9, %v540_v38  ;;  %v840_v59 = vadd.f32 %v839_v42, %v539_v52  ;;  %v1018_v9 = vsel %vm6466_vm15, %v5083_v57, %v5081_v58 }
 0x224   :  { %6521 = vst [vmem:[#allocation25_spill] sm:$0xff] %v5073_v18  ;;  %v798_v8 = vpop.f32.mrf.mxu2  ;;  %v816_v10 = vpop.f32.mrf.mxu3 }
 0x225   :  { %6522 = vst [vmem:[#allocation26_spill] sm:$0xff] %v5076_v19  ;;  %v960_v46 = vrot.slane %v858_v7, 7  ;;  %v799_v38 = vadd.f32 %v798_v8, %v5086_v49  ;;  %v817_v50 = vadd.f32 %v816_v10, %v5089_v21  ;;  %v1068_v7 = vsel %vm982_vm14, %v5081_v58, %v5083_v57 }
 0x226   :  { %6523 = vst [vmem:[#allocation27_spill] sm:$0xff] %v5079_v43  ;;  %v1000_v8 = vsel %vm6460_vm4, %v5091_v6, %v5093_v5  ;;  %v1015_v10 = vsel %vm986_vm5, %v5091_v6, %v5093_v5 }
 0x227   :  { %v5110_v52 = vsel %vm963_vm2, %v840_v59, %v960_v46  ;;  %v5113_v42 = vsel %vm980_vm3, %v840_v59, %v960_v46  ;;  %v938_v4 = vrot.slane %v799_v38, 2  ;;  %v939_v3 = vrot.slane %v817_v50, 1 }
 0x228   :  { %6524 = vst [vmem:[#allocation28_spill] sm:$0xff] %v5110_v52  ;;  %v1002_v52 = vsel %vm6455_vm8, %v4947_v53, %v1000_v8  ;;  %v1017_v15 = vsel %vm6462_vm10, %v4950_v13, %v1015_v10  ;;  %v983_v10 = vsel %vm982_vm14, %v5091_v6, %v5093_v5 }
 0x229   :  { %6525 = vst [vmem:[#allocation29_spill] sm:$0xff] %v5113_v42  ;;  %v1004_v59 = vsel %vm963_vm2, %v938_v4, %v939_v3  ;;  %v1019_v46 = vsel %vm980_vm3, %v938_v4, %v939_v3  ;;  %v1057_v0 = vsel %vm6460_vm4, %v938_v4, %v939_v3  ;;  %v1069_v42 = vsel %vm986_vm5, %v938_v4, %v939_v3 }
 0x22a   :  { %v841_v38 = vpop.f32.mrf.mxu0  ;;  %v859_v50 = vpop.f32.mrf.mxu1  ;;  %v1006_v43 = vsel %vm6457_vm9, %v1004_v59, %v1003_v48  ;;  %v1021_v19 = vsel %vm6461_vm11, %v1019_v46, %v1018_v9  ;;  %v1058_v18 = vsel %vm6455_vm8, %v1056_v35, %v1057_v0  ;;  %v1070_v12 = vsel %vm6462_vm10, %v1068_v7, %v1069_v42 }
 0x22b   :  { %v1008_v14 = vsel %vm6454_vm1, %v1002_v52, %v1006_v43  ;;  %v1055_v38 = vsel %vm6457_vm9, %v1054_v2, %v4953_v29  ;;  %v1023_v50 = vsel %vm6456_vm0, %v1017_v15, %v1021_v19  ;;  %v1067_v48 = vsel %vm6461_vm11, %v1066_v1, %v4956_v60 }
 0x22c   :  { %v800_v23 = vpop.f32.mrf.mxu2  ;;  %v818_v53 = vpop.f32.mrf.mxu3  ;;  %v1059_v9 = vsel %vm6454_vm1, %v1058_v18, %v1055_v38  ;;  %v5146_v0 = vrot.slane %v1008_v14, 2  ;;  %v1071_v13 = vsel %vm6456_vm0, %v1070_v12, %v1067_v48  ;;  %v5149_v35 = vrot.slane %v1023_v50, 3 }
 0x22d   :  { %v5151_v43 = vrot.slane %v1059_v9, 6  ;;  %v5153_v7 = vrot.slane %v1071_v13, 7  ;;  %v972_v29 = vsel %vm971_vm13, %v938_v4, %v939_v3  ;;  %v970_v1 = vsel %vm6460_vm4, %v5081_v58, %v5083_v57 }
 0x22e   :  { %v1321_v2 = vmul.f32 0.35355338, %v5146_v0  ;;  %v1322_v15 = vmul.f32 0.35355338, %v5149_v35  ;;  %vm6465_vm1 = vcmask 1045508   ;;  %v989_v60 = vsel %vm6466_vm15, %v939_v3, %v938_v4 }
 0x22f   :  { %v1325_v12 = vmul.f32 0.35355338, %v5151_v43  ;;  %v966_v14 = vsel %vm965_vm12, %v5091_v6, %v5093_v5  ;;  %v987_v18 = vsel %vm986_vm5, %v5081_v58, %v5083_v57  ;;  %vm6464_vm8 = vcmask 1046533  }
 0x230   :  { %v1326_v42 = vmul.f32 0.35355338, %v5153_v7  ;;  %v974_v8 = vsel %vm6465_vm1, %v970_v1, %v972_v29  ;;  %vm975_vm0 = vcmask 1043456   ;;  %1467 = vst [vmem:[#allocation1 + $0x2] ss:$9 sm:$0xff] %v1321_v2  ;;  %v991_v59 = vsel %vm6464_vm8, %v987_v18, %v989_v60 }
 0x231   :  { %vm992_vm9 = vcmask 1044481   ;;  %1469 = vst [vmem:[#allocation1 + $0x3] ss:$9 sm:$0xff] %v1322_v15  ;;  %v968_v46 = vsel %vm6459_vm6, %v4959_v61, %v966_v14  ;;  %v985_v50 = vsel %vm6458_vm7, %v4962_v32, %v983_v10  ;;  %v1033_v9 = vsel %vm965_vm12, %v938_v4, %v939_v3 }
 0x232   :  { %1475 = vst [vmem:[#allocation1 + $0x6] ss:$9 sm:$0xff] %v1325_v12  ;;  %v5178_v38 = vsel %vm975_vm0, %v968_v46, %v974_v8  ;;  %v993_v48 = vsel %vm992_vm9, %v985_v50, %v991_v59  ;;  %v1045_v13 = vsel %vm982_vm14, %v938_v4, %v939_v3  ;;  %v1030_v61 = vsel %vm971_vm13, %v5091_v6, %v5093_v5 }
 0x233   :  { %1477 = vst [vmem:[#allocation1 + $0x7] ss:$9 sm:$0xff] %v1326_v42  ;;  %v1319_v2 = vmul.f32 0.35355338, %v5178_v38  ;;  %v5186_v29 = vrot.slane %v993_v48, 1  ;;  %v1032_v15 = vsel %vm963_vm2, %v5081_v58, %v5083_v57  ;;  %v1042_v3 = vsel %vm6466_vm15, %v5093_v5, %v5091_v6 }
 0x234   :  { %v803_v19 = vpop.f32.mrf.mxu2  ;;  %v821_v52 = vpop.f32.mrf.mxu3  ;;  %v1034_v60 = vsel %vm6459_vm6, %v1032_v15, %v1033_v9  ;;  %v1044_v4 = vsel %vm980_vm3, %v5081_v58, %v5083_v57  ;;  %v1031_v14 = vsel %vm6465_vm1, %v4965_v40, %v1030_v61  ;;  %v1043_v42 = vsel %vm6464_vm8, %v4968_v36, %v1042_v3 }
 0x235   :  { %1463 = vst [vmem:[#allocation1] ss:$9 sm:$0xff] %v1319_v2  ;;  %v1046_v12 = vsel %vm6458_vm7, %v1044_v4, %v1045_v13  ;;  %v1035_v18 = vsel %vm975_vm0, %v1034_v60, %v1031_v14  ;;  %v1320_v8 = vmul.f32 0.35355338, %v5186_v29  ;;  %v801_v10 = vadd.f32 %v800_v23, %v5086_v49 }
 0x236   :  { %v819_v5 = vadd.f32 %v818_v53, %v5089_v21  ;;  %v1047_v6 = vsel %vm992_vm9, %v1046_v12, %v1043_v42  ;;  %v711_v58 = vadd.f32 %v4972_v41, %v4939_v31  ;;  %v765_v57 = vadd.f32 %v4982_v24, %v4987_v51 }
 0x237   :  { %1465 = vst [vmem:[#allocation1 + $0x1] ss:$9 sm:$0xff] %v1320_v8  ;;  %v783_v40 = vadd.f32 %v4984_v25, %v4990_v11  ;;  %v729_v36 = vadd.f32 %v5000_v37, %v5012_v47  ;;  %v747_v23 = vadd.f32 %v5002_v62, %v5015_v27  ;;  %v5221_v59 = vrot.slane %v1035_v18, 4 }
 0x238   :  { %v5223_v53 = vrot.slane %v1047_v6, 5  ;;  %v5225_v46 = vrot.slane %v801_v10, 2  ;;  %v5227_v31 = vrot.slane %v819_v5, 1  ;;  %v5229_v41 = vrot.slane %v711_v58, 7 }
 0x239   :  { %v5231_v24 = vrot.slane %v765_v57, 4  ;;  %v5233_v51 = vrot.slane %v783_v40, 3  ;;  %v5235_v25 = vrot.slane %v729_v36, 6  ;;  %v5237_v11 = vrot.slane %v747_v23, 5 }
 0x23a   :  { %v1323_v37 = vmul.f32 0.35355338, %v5221_v59  ;;  %v5242_v62 = vadd.f32 %v4970_v63, %v4942_v33  ;;  %v1324_v47 = vmul.f32 0.35355338, %v5223_v53  ;;  %v1081_v27 = vsel %vm971_vm13, %v5225_v46, %v5227_v31 }
 0x23b   :  { %v1078_v33 = vsel %vm965_vm12, %v5235_v25, %v5237_v11  ;;  %v1080_v63 = vsel %vm6460_vm4, %v5231_v24, %v5233_v51  ;;  %v804_v13 = vadd.f32 %v803_v19, %v5086_v49  ;;  %v822_v2 = vadd.f32 %v821_v52, %v5089_v21 }
 0x23c   :  { %v805_v32 = vpop.f32.mrf.mxu2  ;;  %v823_v1 = vpop.f32.mrf.mxu3  ;;  %v1099_v50 = vsel %vm965_vm12, %v5242_v62, %v5229_v41  ;;  %v1111_v48 = vsel %vm982_vm14, %v5242_v62, %v5229_v41  ;;  %v1159_v9 = vsel %vm6466_vm15, %v5229_v41, %v5242_v62  ;;  %1471 = vst [vmem:[#allocation1 + $0x4] ss:$9 sm:$0xff] %v1323_v37  ;;  %v1102_v61 = vsel %vm971_vm13, %v5231_v24, %v5233_v51 }
 0x23d   :  { %v1114_v15 = vsel %vm6466_vm15, %v5233_v51, %v5231_v24  ;;  %v1077_v32 = vsel %vm963_vm2, %v5242_v62, %v5229_v41  ;;  %v1082_v1 = vsel %vm6465_vm1, %v1080_v63, %v1081_v27  ;;  %1473 = vst [vmem:[#allocation1 + $0x5] ss:$9 sm:$0xff] %v1324_v47  ;;  %v1150_v49 = vsel %vm965_vm12, %v5231_v24, %v5233_v51 }
 0x23e   :  { %v1162_v21 = vsel %vm982_vm14, %v5231_v24, %v5233_v51  ;;  %v1112_v19 = vsel %vm986_vm5, %v5235_v25, %v5237_v11  ;;  %v1115_v52 = vsel %vm980_vm3, %v5225_v46, %v5227_v31  ;;  %v1100_v60 = vsel %vm6460_vm4, %v5235_v25, %v5237_v11 }
 0x23f   :  { %v1160_v3 = vsel %vm980_vm3, %v5235_v25, %v5237_v11  ;;  %v1079_v4 = vsel %vm6459_vm6, %v1077_v32, %v1078_v33  ;;  %v1163_v12 = vsel %vm986_vm5, %v5225_v46, %v5227_v31  ;;  %v1103_v18 = vsel %vm963_vm2, %v5225_v46, %v5227_v31 }
 0x240   :  { %v5298_v14 = vsel %vm975_vm0, %v1079_v4, %v1082_v1  ;;  %v958_v42 = vrot.slane %v804_v13, 2  ;;  %v959_v8 = vrot.slane %v822_v2, 1  ;;  %v1113_v10 = vsel %vm6462_vm10, %v1111_v48, %v1112_v19 }
 0x241   :  { %v1148_v5 = vsel %vm963_vm2, %v5235_v25, %v5237_v11  ;;  %v1116_v6 = vsel %vm6461_vm11, %v1115_v52, %v1114_v15  ;;  %v1151_v58 = vsel %vm6460_vm4, %v5225_v46, %v5227_v31  ;;  %v1161_v57 = vsel %vm6461_vm11, %v1160_v3, %v1159_v9 }
 0x242   :  { %v1164_v40 = vsel %vm6462_vm10, %v1162_v21, %v1163_v12  ;;  %v1175_v36 = vsel %vm971_vm13, %v958_v42, %v959_v8  ;;  %v1185_v23 = vsel %vm6466_vm15, %v959_v8, %v958_v42  ;;  %vm6526_vm7 = vcmask 1045504  }
 0x243   :  { %v1104_v37 = vsel %vm6526_vm7, %v1103_v18, %v1102_v61  ;;  %v1327_v47 = vmul.f32 0.35355338, %v5298_v14  ;;  %v1176_v27 = vsel %vm6465_vm1, %v4995_v56, %v1175_v36  ;;  %v1186_v48 = vsel %vm6464_vm8, %v4998_v55, %v1185_v23 }
 0x244   :  { %vm6527_vm6 = vcmask 1046531   ;;  %vm6528_vm4 = vcmask 1043458   ;;  %v5323_v63 = vld [vmem:[#allocation1] sm:$0xff]  ;;  %v5327_v13 = vsel %vm975_vm0, %v5046_v17, %v1176_v27  ;;  %v1187_v2 = vsel %vm992_vm9, %v5049_v16, %v1186_v48 }
 0x245   :  { %v1117_v33 = vsel %vm6527_vm6, %v1113_v10, %v1116_v6  ;;  %v1152_v9 = vsel %vm6528_vm4, %v1150_v49, %v1151_v58  ;;  %v1147_v56 = vsel %vm971_vm13, %v5242_v62, %v5229_v41  ;;  %vm6529_vm7 = vmmov %vm6528_vm4  ;;  %1479 = vst [vmem:[#allocation1] ss:$9 sm:$0xff] %v1327_v47  ;;  %vm6532_vm4 = vcmask 1045506  }
 0x246   :  { %v1101_v61 = vsel %vm6529_vm7, %v1099_v50, %v1100_v60  ;;  %vm6530_vm11 = vmmov %vm6527_vm6  ;;  %vm6531_vm6 = vcmask 1045504   ;;  %v5338_v1 = vrot.slane %v1117_v33, 3  ;;  %v1091_v50 = vsel %vm6466_vm15, %v5227_v31, %v5225_v46 }
 0x247   :  { %v1165_v55 = vsel %vm6530_vm11, %v1164_v40, %v1161_v57  ;;  %v1149_v15 = vsel %vm6531_vm6, %v1148_v5, %v1147_v56  ;;  %v1105_v32 = vsel %vm6532_vm4, %v1101_v61, %v1104_v37  ;;  %vm6533_vm10 = vmmov %vm6532_vm4  ;;  %v1087_v52 = vsel %vm980_vm3, %v5242_v62, %v5229_v41 }
 0x248   :  { %v1153_v17 = vsel %vm6533_vm10, %v1152_v9, %v1149_v15  ;;  %v5341_v49 = vrot.slane %v1165_v55, 7  ;;  %v5343_v16 = vrot.slane %v1105_v32, 2  ;;  %v1330_v19 = vmul.f32 0.35355338, %v5338_v1 }
 0x249   :  { %v5345_v21 = vrot.slane %v1153_v17, 6  ;;  %v1127_v60 = vsel %vm965_vm12, %v5225_v46, %v5227_v31  ;;  %v1088_v12 = vsel %vm982_vm14, %v5235_v25, %v5237_v11  ;;  %v1090_v18 = vsel %vm986_vm5, %v5231_v24, %v5233_v51 }
 0x24a   :  { %v1334_v3 = vmul.f32 0.35355338, %v5341_v49  ;;  %v1139_v42 = vsel %vm982_vm14, %v5225_v46, %v5227_v31  ;;  %v1329_v8 = vmul.f32 0.35355338, %v5343_v16  ;;  %v1092_v10 = vsel %vm6464_vm8, %v1090_v18, %v1091_v50 }
 0x24b   :  { %v1124_v5 = vsel %vm971_vm13, %v5235_v25, %v5237_v11  ;;  %v1126_v6 = vsel %vm963_vm2, %v5231_v24, %v5233_v51  ;;  %v1333_v58 = vmul.f32 0.35355338, %v5345_v21  ;;  %vm6534_vm10 = vcmask 1041408  }
 0x24c   :  { %v5358_v4 = vld [vmem:[#allocation1] sm:$0xff]  ;;  %v1128_v57 = vsel %vm6534_vm10, %v1126_v6, %v1127_v60  ;;  %v1136_v46 = vsel %vm6466_vm15, %v5237_v11, %v5235_v25  ;;  %v1138_v31 = vsel %vm980_vm3, %v5231_v24, %v5233_v51  ;;  %vm6535_vm11 = vcmask 1042433   ;;  %vm6539_vm4 = vmmov %vm6534_vm10 }
 0x24d   :  { %1483 = vst [vmem:[#allocation1 + $0x2] ss:$9 sm:$0xff] %v1330_v19  ;;  %v1089_v40 = vsel %vm6535_vm11, %v1087_v52, %v1088_v12  ;;  %vm6536_vm7 = vcmask 1044484   ;;  %vm6537_vm6 = vmmov %vm6535_vm11  ;;  %v1135_v25 = vsel %vm986_vm5, %v5242_v62, %v5229_v41  ;;  %v1211_v32 = vrot.slane %v5178_v38, 1 }
 0x24e   :  { %1487 = vst [vmem:[#allocation1 + $0x6] ss:$9 sm:$0xff] %v1334_v3  ;;  %v1123_v36 = vsel %vm6536_vm7, %v5242_v62, %v5229_v41  ;;  %v1140_v23 = vsel %vm6537_vm6, %v1138_v31, %v1139_v42  ;;  %v1093_v37 = vsel %vm992_vm9, %v1089_v40, %v1092_v10  ;;  %v1137_v51 = vsel %vm6464_vm8, %v1135_v25, %v1136_v46  ;;  %vm6540_vm10 = vmmov %vm6537_vm6 }
 0x24f   :  { %1482 = vst [vmem:[#allocation1 + $0x1] ss:$9 sm:$0xff] %v1329_v8  ;;  %v1125_v47 = vsel %vm6465_vm1, %v1123_v36, %v1124_v5  ;;  %v1141_v11 = vsel %vm992_vm9, %v1140_v23, %v1137_v51  ;;  %v5398_v27 = vrot.slane %v1093_v37, 1  ;;  %v1335_v41 = vmul.f32 0.35355338, %v5327_v13  ;;  %vm6538_vm9 = vmmov %vm6536_vm7 }
 0x250   :  { %1486 = vst [vmem:[#allocation1 + $0x5] ss:$9 sm:$0xff] %v1333_v58  ;;  %v1129_v24 = vsel %vm975_vm0, %v1128_v57, %v1125_v47  ;;  %v5402_v33 = vrot.slane %v1141_v11, 5  ;;  %v5408_v62 = vrot.slane %v1187_v2, 1  ;;  %v1212_v17 = vrot.slane %v5186_v29, 1 }
 0x251   :  { %v5400_v48 = vrot.slane %v1129_v24, 4  ;;  %v1328_v9 = vmul.f32 0.35355338, %v5398_v27  ;;  %1488 = vst [vmem:[#allocation1 + $0x7] ss:$9 sm:$0xff] %v1335_v41  ;;  %v1213_v50 = vrot.slane %v5146_v0, 1 }
 0x252   :  { %v1332_v61 = vmul.f32 0.35355338, %v5402_v33  ;;  %v1336_v55 = vmul.f32 0.35355338, %v5408_v62  ;;  %v1214_v19 = vrot.slane %v5149_v35, 1  ;;  %v1215_v52 = vrot.slane %v5221_v59, 1 }
 0x253   :  { %v1331_v56 = vmul.f32 0.35355338, %v5400_v48  ;;  %1481 = vst [vmem:[#allocation1] ss:$9 sm:$0xff] %v1328_v9  ;;  %v1337_v60 = vmul.f32 0.35355338, %v1211_v32 }
 0x254   :  { %1485 = vst [vmem:[#allocation1 + $0x4] ss:$9 sm:$0xff] %v1332_v61  ;;  %v1216_v3 = vrot.slane %v5223_v53, 1  ;;  %v1338_v2 = vmul.f32 0.35355338, %v1212_v17  ;;  %v1217_v18 = vrot.slane %v5151_v43, 1 }
 0x255   :  { %1484 = vst [vmem:[#allocation1 + $0x3] ss:$9 sm:$0xff] %v1331_v56  ;;  %v1339_v42 = vmul.f32 0.35355338, %v1213_v50  ;;  %v1218_v8 = vrot.slane %v5153_v7, 1  ;;  %v1219_v46 = vrot.slane %v5298_v14, 1 }
 0x256   :  { %v1340_v10 = vmul.f32 0.35355338, %v1214_v19  ;;  %v1341_v5 = vmul.f32 0.35355338, %v1215_v52  ;;  %v1342_v6 = vmul.f32 0.35355338, %v1216_v3 }
 0x257   :  { %v1343_v58 = vmul.f32 0.35355338, %v1217_v18  ;;  %v1344_v57 = vmul.f32 0.35355338, %v1218_v8  ;;  %v1345_v31 = vmul.f32 0.35355338, %v1219_v46 }
 0x258   :  { %v1220_v36 = vrot.slane %v5398_v27, 1  ;;  %v1221_v23 = vrot.slane %v5343_v16, 1  ;;  %v1222_v37 = vrot.slane %v5338_v1, 1  ;;  %v1223_v47 = vrot.slane %v5400_v48, 1 }
 0x259   :  { %v1224_v25 = vrot.slane %v5402_v33, 1  ;;  %v1225_v51 = vrot.slane %v5345_v21, 1  ;;  %v1226_v56 = vrot.slane %v5341_v49, 1  ;;  %v1227_v41 = vrot.slane %v5327_v13, 1 }
 0x25a   :  { %v1346_v24 = vmul.f32 0.35355338, %v1220_v36  ;;  %v1347_v11 = vmul.f32 0.35355338, %v1221_v23  ;;  %v1348_v61 = vmul.f32 0.35355338, %v1222_v37 }
 0x25b   :  { %v1350_v32 = vmul.f32 0.35355338, %v1224_v25  ;;  %v1351_v17 = vmul.f32 0.35355338, %v1225_v51  ;;  %v1352_v50 = vmul.f32 0.35355338, %v1226_v56 }
 0x25c   :  { %v5411_v15 = vld [vmem:[#allocation1] sm:$0xff]  ;;  %v1353_v19 = vmul.f32 0.35355338, %v1227_v41  ;;  %v1228_v52 = vrot.slane %v5408_v62, 1  ;;  %v1248_v18 = vrot.slane %v5186_v29, 2  ;;  %v1250_v8 = vrot.slane %v5149_v35, 2  ;;  %v888_v41 = vpop.f32.mrf.mxu3 }
 0x25d   :  { %1490 = vst [vmem:[#allocation1] ss:$9 sm:$0xff] %v1336_v55  ;;  %v1349_v55 = vmul.f32 0.35355338, %v1223_v47  ;;  %v1253_v46 = vrot.slane %v5151_v43, 2  ;;  %v1254_v36 = vrot.slane %v5153_v7, 2 }
 0x25e   :  { %v1358_v23 = vmul.f32 0.35355338, %v1250_v8  ;;  %v5450_v51 = vperm.slane %v5007_v34, 2  ;;  %v1255_v56 = vrot.slane %v5298_v14, 2  ;;  %vm6541_vm11 = vcmask 1043458  }
 0x25f   :  { %v1361_v25 = vmul.f32 0.35355338, %v1253_v46  ;;  %vm6542_vm7 = vcmask 1044483   ;;  %vm6543_vm6 = vcmask 1045504  }
 0x264   :  { %v5419_v12 = vld [vmem:[#allocation1] sm:$0xff] }
 0x265   :  { %1492 = vst [vmem:[#allocation1] ss:$9 sm:$0xff] %v1337_v60  ;;  %v1354_v60 = vmul.f32 0.35355338, %v1228_v52 }
 0x266   :  { %1493 = vst [vmem:[#allocation1 + $0x1] ss:$9 sm:$0xff] %v1338_v2  ;;  %v1247_v2 = vrot.slane %v5178_v38, 2 }
 0x267   :  { %1494 = vst [vmem:[#allocation1 + $0x2] ss:$9 sm:$0xff] %v1339_v42  ;;  %v1249_v42 = vrot.slane %v5146_v0, 2 }
 0x268   :  { %1495 = vst [vmem:[#allocation1 + $0x3] ss:$9 sm:$0xff] %v1340_v10  ;;  %v1251_v10 = vrot.slane %v5221_v59, 2 }
 0x269   :  { %1496 = vst [vmem:[#allocation1 + $0x4] ss:$9 sm:$0xff] %v1341_v5  ;;  %v1355_v5 = vmul.f32 0.35355338, %v1247_v2 }
 0x26a   :  { %1497 = vst [vmem:[#allocation1 + $0x5] ss:$9 sm:$0xff] %v1342_v6  ;;  %v1252_v6 = vrot.slane %v5223_v53, 2  ;;  %v1359_v37 = vmul.f32 0.35355338, %v1251_v10 }
 0x26b   :  { %1498 = vst [vmem:[#allocation1 + $0x6] ss:$9 sm:$0xff] %v1343_v58  ;;  %v1356_v58 = vmul.f32 0.35355338, %v1248_v18 }
 0x26c   :  { %1499 = vst [vmem:[#allocation1 + $0x7] ss:$9 sm:$0xff] %v1344_v57  ;;  %v1360_v47 = vmul.f32 0.35355338, %v1252_v6 }
 0x273   :  { %v5424_v40 = vld [vmem:[#allocation1] sm:$0xff] }
 0x274   :  { %1501 = vst [vmem:[#allocation1] ss:$9 sm:$0xff] %v1345_v31  ;;  %v1357_v31 = vmul.f32 0.35355338, %v1249_v42 }
 0x27b   :  { %v5432_v9 = vld [vmem:[#allocation1] sm:$0xff] }
 0x27c   :  { %1503 = vst [vmem:[#allocation1] ss:$9 sm:$0xff] %v1346_v24  ;;  %v1362_v24 = vmul.f32 0.35355338, %v1254_v36  ;;  %v1257_v36 = vrot.slane %v5343_v16, 2 }
 0x27d   :  { %1504 = vst [vmem:[#allocation1 + $0x1] ss:$9 sm:$0xff] %v1347_v11  ;;  %v5453_v11 = vperm.slane %v5007_v34, 3 }
 0x27e   :  { %1505 = vst [vmem:[#allocation1 + $0x2] ss:$9 sm:$0xff] %v1348_v61  ;;  %v870_v61 = vpop.f32.mrf.mxu2 }
 0x27f   :  { %1506 = vst [vmem:[#allocation1 + $0x3] ss:$9 sm:$0xff] %v1349_v55  ;;  %v871_v55 = vadd.f32 %v870_v61, %v5450_v51 }
 0x280   :  { %1507 = vst [vmem:[#allocation1 + $0x4] ss:$9 sm:$0xff] %v1350_v32  ;;  %v889_v32 = vadd.f32 %v888_v41, %v5453_v11  ;;  %v890_v41 = vpop.f32.mrf.mxu3 }
 0x281   :  { %1508 = vst [vmem:[#allocation1 + $0x5] ss:$9 sm:$0xff] %v1351_v17  ;;  %v941_v17 = vrot.slane %v871_v55, 6  ;;  %v1263_v55 = vrot.slane %v5327_v13, 2 }
 0x282   :  { %1509 = vst [vmem:[#allocation1 + $0x6] ss:$9 sm:$0xff] %v1352_v50  ;;  %v942_v50 = vrot.slane %v889_v32, 5 }
 0x283   :  { %1510 = vst [vmem:[#allocation1 + $0x7] ss:$9 sm:$0xff] %v1353_v19  ;;  %v1363_v19 = vmul.f32 0.35355338, %v1255_v56 }
 0x284   :  { %v978_v52 = vsel %vm965_vm12, %v941_v17, %v942_v50  ;;  %v1011_v2 = vsel %vm6538_vm9, %v941_v17, %v942_v50  ;;  %v1026_v34 = vsel %vm986_vm5, %v941_v17, %v942_v50  ;;  %v1038_v6 = vsel %vm971_vm13, %v941_v17, %v942_v50 }
 0x285   :  { %v5466_v42 = vsel %vm6539_vm4, %v5020_v20, %v978_v52  ;;  %v5474_v10 = vsel %vm6541_vm11, %v5026_v45, %v1011_v2  ;;  %v1050_v20 = vsel %vm6466_vm15, %v942_v50, %v941_v17  ;;  %v1074_v46 = vsel %vm980_vm3, %v941_v17, %v942_v50 }
 0x286   :  { %v1256_v45 = vrot.slane %v5398_v27, 2  ;;  %vm6544_vm9 = vcmask 1046529   ;;  %vm6545_vm4 = vcmask 1044484   ;;  %vm6548_vm11 = vcmask 1042433  }
 0x28a   :  { %v5437_v3 = vld [vmem:[#allocation1] sm:$0xff] }
 0x28b   :  { %1512 = vst [vmem:[#allocation1] ss:$9 sm:$0xff] %v1354_v60  ;;  %v996_v60 = vsel %vm982_vm14, %v941_v17, %v942_v50 }
 0x28c   :  { %v5470_v8 = vsel %vm6540_vm10, %v5023_v28, %v996_v60  ;;  %v1062_v28 = vsel %vm963_vm2, %v941_v17, %v942_v50  ;;  %vm6546_vm10 = vcmask 1041408  }
 0x292   :  { %v5445_v57 = vld [vmem:[#allocation1] sm:$0xff] }
 0x293   :  { %1514 = vst [vmem:[#allocation1] ss:$9 sm:$0xff] %v1355_v5  ;;  %v5478_v5 = vsel %vm6542_vm7, %v5029_v30, %v1026_v34  ;;  %v5495_v30 = vsel %vm6543_vm6, %v1062_v28, %v5040_v54  ;;  %v1262_v54 = vrot.slane %v5341_v49, 2  ;;  %vm6550_vm7 = vcmask 1043458  }
 0x294   :  { %1515 = vst [vmem:[#allocation1 + $0x1] ss:$9 sm:$0xff] %v1356_v58  ;;  %v5483_v58 = vsel %vm6465_vm1, %v5032_v26, %v1038_v6  ;;  %v5499_v26 = vsel %vm6544_vm9, %v1074_v46, %v5043_v39  ;;  %v872_v39 = vpop.f32.mrf.mxu2  ;;  %v1371_v6 = vmul.f32 0.35355338, %v1263_v55  ;;  %vm6552_vm6 = vcmask 1044483  }
 0x295   :  { %1516 = vst [vmem:[#allocation1 + $0x2] ss:$9 sm:$0xff] %v1357_v31  ;;  %v5491_v31 = vsel %vm6464_vm8, %v5035_v44, %v1050_v20  ;;  %v1261_v44 = vrot.slane %v5345_v21, 2  ;;  %v873_v17 = vadd.f32 %v872_v39, %v5450_v51  ;;  %v1370_v2 = vmul.f32 0.35355338, %v1262_v54  ;;  %v6553_v39 = vld [vmem:[#allocation24_spill] sm:$0xff] }
 0x296   :  { %1517 = vst [vmem:[#allocation1 + $0x3] ss:$9 sm:$0xff] %v1358_v23  ;;  %v1258_v23 = vrot.slane %v5338_v1, 2  ;;  %v1264_v54 = vrot.slane %v5408_v62, 2  ;;  %vm6558_vm9 = vcmask 1045504  }
 0x297   :  { %1518 = vst [vmem:[#allocation1 + $0x4] ss:$9 sm:$0xff] %v1359_v37  ;;  %v1259_v37 = vrot.slane %v5400_v48, 2  ;;  %v1369_v52 = vmul.f32 0.35355338, %v1261_v44  ;;  %v951_v60 = vrot.slane %v873_v17, 6 }
 0x298   :  { %1519 = vst [vmem:[#allocation1 + $0x5] ss:$9 sm:$0xff] %v1360_v47  ;;  %v1260_v47 = vrot.slane %v5402_v33, 2  ;;  %v1366_v61 = vmul.f32 0.35355338, %v1258_v23  ;;  %v6547_v23 = vld [vmem:[#allocation21_spill] sm:$0xff] }
 0x299   :  { %1520 = vst [vmem:[#allocation1 + $0x6] ss:$9 sm:$0xff] %v1361_v25  ;;  %v1364_v25 = vmul.f32 0.35355338, %v1256_v45  ;;  %v1367_v32 = vmul.f32 0.35355338, %v1259_v37 }
 0x29a   :  { %1521 = vst [vmem:[#allocation1 + $0x7] ss:$9 sm:$0xff] %v1362_v24  ;;  %v1365_v24 = vmul.f32 0.35355338, %v1257_v36  ;;  %v1368_v50 = vmul.f32 0.35355338, %v1260_v47 }
 0x29b   :  { %v6549_v47 = vld [vmem:[#allocation22_spill] sm:$0xff]  ;;  %v6551_v44 = vld [vmem:[#allocation23_spill] sm:$0xff]  ;;  %v6555_v17 = vld [vmem:[#allocation25_spill] sm:$0xff] }
 0x2a1   :  { %v5462_v18 = vld [vmem:[#allocation1] sm:$0xff] }
 0x2a2   :  { %1523 = vst [vmem:[#allocation1] ss:$9 sm:$0xff] %v1363_v19  ;;  %v891_v19 = vadd.f32 %v890_v41, %v5453_v11 }
 0x2a4   :  { %v952_v34 = vrot.slane %v891_v19, 5  ;;  %v6557_v19 = vld [vmem:[#allocation26_spill] sm:$0xff] }
 0x2a6   :  { %v1085_v20 = vsel %vm965_vm12, %v951_v60, %v952_v34  ;;  %v1096_v28 = vsel %vm982_vm14, %v951_v60, %v952_v34  ;;  %v1108_v46 = vsel %vm6545_vm4, %v951_v60, %v952_v34  ;;  %v1120_v45 = vsel %vm986_vm5, %v951_v60, %v952_v34 }
 0x2a7   :  { %v5518_v36 = vsel %vm6546_vm10, %v5058_v22, %v1085_v20  ;;  %v5522_v37 = vsel %vm6548_vm11, %v6547_v23, %v1096_v28  ;;  %v1144_v41 = vsel %vm6466_vm15, %v952_v34, %v951_v60  ;;  %v1156_v55 = vsel %vm963_vm2, %v951_v60, %v952_v34 }
 0x2a8   :  { %vm6561_vm4 = vcmask 1046529   ;;  %v1372_v20 = vmul.f32 0.35355338, %v1264_v54  ;;  %v1284_v23 = vrot.slane %v5186_v29, 3  ;;  %v1287_v54 = vrot.slane %v5221_v59, 3 }
 0x2a9   :  { %v5506_v56 = vld [vmem:[#allocation1] sm:$0xff] }
 0x2aa   :  { %1525 = vst [vmem:[#allocation1] ss:$9 sm:$0xff] %v1364_v25  ;;  %v5526_v25 = vsel %vm6550_vm7, %v6549_v47, %v1108_v46  ;;  %v875_v46 = vpop.f32.mrf.mxu2  ;;  %vm2609_vm7 = vcmask 1044480  }
 0x2ab   :  { %1526 = vst [vmem:[#allocation1 + $0x1] ss:$9 sm:$0xff] %v1365_v24  ;;  %v5530_v24 = vsel %vm6552_vm6, %v6551_v44, %v1120_v45  ;;  %v893_v45 = vpop.f32.mrf.mxu3  ;;  %v1285_v44 = vrot.slane %v5146_v0, 3  ;;  %vm2182_vm6 = vcmask 65536  }
 0x2ac   :  { %1527 = vst [vmem:[#allocation1 + $0x2] ss:$9 sm:$0xff] %v1366_v61  ;;  %v1132_v61 = vsel %vm971_vm13, %v951_v60, %v952_v34  ;;  %v894_v47 = vadd.f32 %v893_v45, %v5453_v11 }
 0x2ad   :  { %1528 = vst [vmem:[#allocation1 + $0x3] ss:$9 sm:$0xff] %v1367_v32  ;;  %v5536_v22 = vsel %vm6465_vm1, %v6553_v39, %v1132_v61  ;;  %v1168_v32 = vsel %vm980_vm3, %v951_v60, %v952_v34  ;;  %v1283_v60 = vrot.slane %v5178_v38, 3  ;;  %v876_v34 = vadd.f32 %v875_v46, %v5450_v51 }
 0x2ae   :  { %1529 = vst [vmem:[#allocation1 + $0x4] ss:$9 sm:$0xff] %v1368_v50  ;;  %v5543_v50 = vsel %vm6464_vm8, %v6555_v17, %v1144_v41  ;;  %v1286_v39 = vrot.slane %v5149_v35, 3  ;;  %v962_v41 = vrot.slane %v894_v47, 5  ;;  %v1374_v17 = vmul.f32 0.35355338, %v1284_v23 }
 0x2af   :  { %1530 = vst [vmem:[#allocation1 + $0x5] ss:$9 sm:$0xff] %v1369_v52  ;;  %v5547_v52 = vsel %vm6558_vm9, %v1156_v55, %v6557_v19  ;;  %v961_v61 = vrot.slane %v876_v34, 6  ;;  %v1373_v55 = vmul.f32 0.35355338, %v1283_v60  ;;  %v1289_v46 = vrot.slane %v5151_v43, 3 }
 0x2b0   :  { %1531 = vst [vmem:[#allocation1 + $0x6] ss:$9 sm:$0xff] %v1370_v2  ;;  %v6560_v2 = vld [vmem:[#allocation27_spill] sm:$0xff]  ;;  %v1375_v45 = vmul.f32 0.35355338, %v1285_v44  ;;  %v6563_v34 = vld [vmem:[#allocation28_spill] sm:$0xff] }
 0x2b1   :  { %1532 = vst [vmem:[#allocation1 + $0x7] ss:$9 sm:$0xff] %v1371_v6  ;;  %v5551_v6 = vsel %vm6561_vm4, %v1168_v32, %v6560_v2  ;;  %v1288_v32 = vrot.slane %v5223_v53, 3  ;;  %v1179_v51 = vsel %vm965_vm12, %v961_v61, %v962_v41  ;;  %v1190_v2 = vsel %vm982_vm14, %v961_v61, %v962_v41  ;;  %v6565_v60 = vld [vmem:[#allocation29_spill] sm:$0xff] }
 0x2b2   :  { %6554 = vst [vmem:[#allocation21_spill] sm:$0xff] %v5536_v22  ;;  %v5570_v47 = vsel %vm6546_vm10, %v6563_v34, %v1179_v51  ;;  %v1290_v23 = vrot.slane %v5153_v7, 3  ;;  %v1379_v41 = vmul.f32 0.35355338, %v1289_v46 }
 0x2b3   :  { %6556 = vst [vmem:[#allocation22_spill] sm:$0xff] %v5543_v50  ;;  %v895_v11 = vpop.f32.mrf.mxu3  ;;  %v1377_v50 = vmul.f32 0.35355338, %v1287_v54  ;;  %v1378_v61 = vmul.f32 0.35355338, %v1288_v32  ;;  %v1294_v54 = vrot.slane %v5338_v1, 3 }
 0x2b4   :  { %6559 = vst [vmem:[#allocation23_spill] sm:$0xff] %v5547_v52  ;;  %v1376_v52 = vmul.f32 0.35355338, %v1286_v39  ;;  %v1380_v44 = vmul.f32 0.35355338, %v1290_v23  ;;  %v1293_v39 = vrot.slane %v5343_v16, 3 }
 0x2b5   :  { %6562 = vst [vmem:[#allocation24_spill] sm:$0xff] %v5551_v6  ;;  %v5574_v6 = vsel %vm6548_vm11, %v6565_v60, %v1190_v2  ;;  %v1292_v2 = vrot.slane %v5398_v27, 3  ;;  %v1384_v34 = vmul.f32 0.35355338, %v1294_v54  ;;  %v1299_v60 = vrot.slane %v5327_v13, 3 }
 0x2b6   :  { %6564 = vst [vmem:[#allocation25_spill] sm:$0xff] %v5570_v47  ;;  %v1383_v11 = vmul.f32 0.35355338, %v1293_v39  ;;  %v1590_v54 = vrot.slane %v5178_v38, 4 }
 0x2b7   :  { %6566 = vst [vmem:[#allocation26_spill] sm:$0xff] %v5574_v6  ;;  %v1382_v32 = vmul.f32 0.35355338, %v1292_v2 }
 0x2b8   :  { %v5553_v28 = vld [vmem:[#allocation1] sm:$0xff] }
 0x2b9   :  { %1534 = vst [vmem:[#allocation1] ss:$9 sm:$0xff] %v1372_v20  ;;  %v877_v20 = vpop.f32.mrf.mxu2 }
 0x2c0   :  { %v5563_v19 = vld [vmem:[#allocation1] sm:$0xff] }
 0x2c1   :  { %1536 = vst [vmem:[#allocation1] ss:$9 sm:$0xff] %v1373_v55  ;;  %v1291_v55 = vrot.slane %v5298_v14, 3 }
 0x2c2   :  { %1537 = vst [vmem:[#allocation1 + $0x1] ss:$9 sm:$0xff] %v1374_v17  ;;  %v1297_v17 = vrot.slane %v5345_v21, 3 }
 0x2c3   :  { %1538 = vst [vmem:[#allocation1 + $0x2] ss:$9 sm:$0xff] %v1375_v45  ;;  %v1381_v51 = vmul.f32 0.35355338, %v1291_v55  ;;  %v1298_v45 = vrot.slane %v5341_v49, 3 }
 0x2c4   :  { %1539 = vst [vmem:[#allocation1 + $0x3] ss:$9 sm:$0xff] %v1376_v52  ;;  %v1295_v52 = vrot.slane %v5400_v48, 3  ;;  %v1389_v55 = vmul.f32 0.35355338, %v1299_v60  ;;  %v1597_v60 = vrot.slane %v5153_v7, 4 }
 0x2c5   :  { %1540 = vst [vmem:[#allocation1 + $0x4] ss:$9 sm:$0xff] %v1377_v50  ;;  %v1296_v50 = vrot.slane %v5402_v33, 3 }
 0x2c6   :  { %1541 = vst [vmem:[#allocation1 + $0x5] ss:$9 sm:$0xff] %v1378_v61  ;;  %v1385_v23 = vmul.f32 0.35355338, %v1295_v52 }
 0x2c7   :  { %1542 = vst [vmem:[#allocation1 + $0x6] ss:$9 sm:$0xff] %v1379_v41  ;;  %v1386_v61 = vmul.f32 0.35355338, %v1296_v50  ;;  %v1387_v41 = vmul.f32 0.35355338, %v1297_v17 }
 0x2c8   :  { %1543 = vst [vmem:[#allocation1 + $0x7] ss:$9 sm:$0xff] %v1380_v44  ;;  %v1388_v44 = vmul.f32 0.35355338, %v1298_v45  ;;  %v1591_v50 = vrot.slane %v5186_v29, 4  ;;  %v1593_v17 = vrot.slane %v5149_v35, 4 }
 0x2c9   :  { %v1595_v45 = vrot.slane %v5223_v53, 4 }
 0x2cf   :  { %v5578_v20 = vld [vmem:[#allocation1] sm:$0xff] }
 0x2d0   :  { %1545 = vst [vmem:[#allocation1] ss:$9 sm:$0xff] %v1381_v51  ;;  %v1300_v51 = vrot.slane %v5408_v62, 3 }
 0x2d2   :  { %v1390_v2 = vmul.f32 0.35355338, %v1300_v51  ;;  %v1601_v51 = vrot.slane %v5338_v1, 4 }
 0x2d7   :  { %v5586_v46 = vld [vmem:[#allocation1] sm:$0xff] }
 0x2d8   :  { %1547 = vst [vmem:[#allocation1] ss:$9 sm:$0xff] %v1382_v32  ;;  %v1592_v32 = vrot.slane %v5146_v0, 4 }
 0x2d9   :  { %1548 = vst [vmem:[#allocation1 + $0x1] ss:$9 sm:$0xff] %v1383_v11  ;;  %v1594_v11 = vrot.slane %v5221_v59, 4 }
 0x2da   :  { %1549 = vst [vmem:[#allocation1 + $0x2] ss:$9 sm:$0xff] %v1384_v34  ;;  %v1596_v34 = vrot.slane %v5151_v43, 4 }
 0x2db   :  { %1550 = vst [vmem:[#allocation1 + $0x3] ss:$9 sm:$0xff] %v1385_v23  ;;  %v1598_v23 = vrot.slane %v5298_v14, 4 }
 0x2dc   :  { %1551 = vst [vmem:[#allocation1 + $0x4] ss:$9 sm:$0xff] %v1386_v61 }
 0x2dd   :  { %1552 = vst [vmem:[#allocation1 + $0x5] ss:$9 sm:$0xff] %v1387_v41  ;;  %v1599_v41 = vrot.slane %v5398_v27, 4 }
 0x2de   :  { %1553 = vst [vmem:[#allocation1 + $0x6] ss:$9 sm:$0xff] %v1388_v44  ;;  %v1600_v44 = vrot.slane %v5343_v16, 4 }
 0x2df   :  { %1554 = vst [vmem:[#allocation1 + $0x7] ss:$9 sm:$0xff] %v1389_v55 }
 0x2e6   :  { %v5591_v39 = vld [vmem:[#allocation1] sm:$0xff] }
 0x2e7   :  { %1556 = vst [vmem:[#allocation1] ss:$9 sm:$0xff] %v1390_v2  ;;  %v1602_v2 = vrot.slane %v5400_v48, 4 }
 0x2ee   :  { %v5594_v52 = vld [vmem:[#allocation1] sm:$0xff] }
 0x2ef   :  { %1662 = vst [vmem:[#allocation1] ss:$9 sm:$0xff] %v1590_v54  ;;  %v1603_v54 = vrot.slane %v5402_v33, 4 }
 0x2f0   :  { %1664 = vst [vmem:[#allocation1 + $0x1] ss:$9 sm:$0xff] %v1591_v50  ;;  %v1604_v50 = vrot.slane %v5345_v21, 4 }
 0x2f1   :  { %1666 = vst [vmem:[#allocation1 + $0x2] ss:$9 sm:$0xff] %v1592_v32  ;;  %v1605_v32 = vrot.slane %v5341_v49, 4 }
 0x2f2   :  { %1668 = vst [vmem:[#allocation1 + $0x3] ss:$9 sm:$0xff] %v1593_v17  ;;  %v1606_v17 = vrot.slane %v5327_v13, 4 }
 0x2f3   :  { %1670 = vst [vmem:[#allocation1 + $0x4] ss:$9 sm:$0xff] %v1594_v11  ;;  %v1607_v11 = vrot.slane %v5408_v62, 4 }
 0x2f4   :  { %1672 = vst [vmem:[#allocation1 + $0x5] ss:$9 sm:$0xff] %v1595_v45 }
 0x2f5   :  { %1674 = vst [vmem:[#allocation1 + $0x6] ss:$9 sm:$0xff] %v1596_v34  ;;  %v1608_v34 = vrot.slane %v5178_v38, 5 }
 0x2f6   :  { %1676 = vst [vmem:[#allocation1 + $0x7] ss:$9 sm:$0xff] %v1597_v60  ;;  %v1609_v60 = vrot.slane %v5186_v29, 5 }
 0x2fd   :  { %v1677_v61 = vld [vmem:[#allocation1] sm:$0xff] }
 0x2fe   :  { %1678 = vst [vmem:[#allocation1] ss:$9 sm:$0xff] %v1598_v23 }
 0x305   :  { %v1679_v55 = vld [vmem:[#allocation1] sm:$0xff] }
 0x306   :  { %1680 = vst [vmem:[#allocation1] ss:$9 sm:$0xff] %v1599_v41  ;;  %v1610_v41 = vrot.slane %v5146_v0, 5  ;;  %v1774_v6 = vpack.c.bf16 %v1679_v55, %v1679_v55  ;;  %v1626_v55 = vrot.slane %v5178_v38, 6 }
 0x307   :  { %1681 = vst [vmem:[#allocation1 + $0x1] ss:$9 sm:$0xff] %v1600_v44  ;;  %v1611_v44 = vrot.slane %v5149_v35, 5 }
 0x308   :  { %1682 = vst [vmem:[#allocation1 + $0x2] ss:$9 sm:$0xff] %v1601_v51  ;;  %v1612_v51 = vrot.slane %v5221_v59, 5  ;;  %v1979_v47 = vunpack.c.l.b16 %v1774_v6 }
 0x309   :  { %1683 = vst [vmem:[#allocation1 + $0x3] ss:$9 sm:$0xff] %v1602_v2  ;;  %v1613_v2 = vrot.slane %v5223_v53, 5 }
 0x30a   :  { %1684 = vst [vmem:[#allocation1 + $0x4] ss:$9 sm:$0xff] %v1603_v54  ;;  %v1614_v54 = vrot.slane %v5151_v43, 5 }
 0x30b   :  { %1685 = vst [vmem:[#allocation1 + $0x5] ss:$9 sm:$0xff] %v1604_v50  ;;  %v1615_v50 = vrot.slane %v5153_v7, 5 }
 0x30c   :  { %1686 = vst [vmem:[#allocation1 + $0x6] ss:$9 sm:$0xff] %v1605_v32  ;;  %v1616_v32 = vrot.slane %v5298_v14, 5 }
 0x30d   :  { %1687 = vst [vmem:[#allocation1 + $0x7] ss:$9 sm:$0xff] %v1606_v17 }
 0x314   :  { %v5613_v45 = vld [vmem:[#allocation1] sm:$0xff] }
 0x315   :  { %1689 = vst [vmem:[#allocation1] ss:$9 sm:$0xff] %v1607_v11  ;;  %v1617_v11 = vrot.slane %v5398_v27, 5  ;;  %v1775_v6 = vpack.c.bf16 %v5613_v45, %v5613_v45  ;;  %v1577_v45 = vpack.c.bf16 %v5419_v12, %v5419_v12  ;;  %v1634_v12 = vrot.slane %v5298_v14, 6 }
 0x31c   :  { %v1690_v23 = vld [vmem:[#allocation1] sm:$0xff] }
 0x31d   :  { %1691 = vst [vmem:[#allocation1] ss:$9 sm:$0xff] %v1608_v34  ;;  %v1618_v34 = vrot.slane %v5343_v16, 5 }
 0x31e   :  { %1692 = vst [vmem:[#allocation1 + $0x1] ss:$9 sm:$0xff] %v1609_v60 }
 0x31f   :  { %1693 = vst [vmem:[#allocation1 + $0x2] ss:$9 sm:$0xff] %v1610_v41  ;;  %v1619_v41 = vrot.slane %v5338_v1, 5 }
 0x320   :  { %1694 = vst [vmem:[#allocation1 + $0x3] ss:$9 sm:$0xff] %v1611_v44  ;;  %v1620_v44 = vrot.slane %v5400_v48, 5 }
 0x321   :  { %1695 = vst [vmem:[#allocation1 + $0x4] ss:$9 sm:$0xff] %v1612_v51  ;;  %v1621_v51 = vrot.slane %v5402_v33, 5 }
 0x322   :  { %1696 = vst [vmem:[#allocation1 + $0x5] ss:$9 sm:$0xff] %v1613_v2  ;;  %v1622_v2 = vrot.slane %v5345_v21, 5 }
 0x323   :  { %1697 = vst [vmem:[#allocation1 + $0x6] ss:$9 sm:$0xff] %v1614_v54  ;;  %v1623_v54 = vrot.slane %v5341_v49, 5 }
 0x324   :  { %1698 = vst [vmem:[#allocation1 + $0x7] ss:$9 sm:$0xff] %v1615_v50  ;;  %v1773_v50 = vpack.c.bf16 %v1677_v61, %v1677_v61 }
 0x32b   :  { %v5624_v17 = vld [vmem:[#allocation1] sm:$0xff] }
 0x32c   :  { %1700 = vst [vmem:[#allocation1] ss:$9 sm:$0xff] %v1616_v32  ;;  %v1624_v32 = vrot.slane %v5327_v13, 5 }
 0x333   :  { %v5628_v60 = vld [vmem:[#allocation1] sm:$0xff] }
 0x334   :  { %1702 = vst [vmem:[#allocation1] ss:$9 sm:$0xff] %v1617_v11  ;;  %v1978_v11 = vunpack.c.l.b16 %v1773_v50  ;;  %v1776_v50 = vpack.c.bf16 %v1690_v23, %v1690_v23  ;;  %v1632_v23 = vrot.slane %v5151_v43, 6 }
 0x335   :  { %1703 = vst [vmem:[#allocation1 + $0x1] ss:$9 sm:$0xff] %v1618_v34  ;;  %v1575_v34 = vpack.c.bf16 %v5358_v4, %v5358_v4  ;;  %v1627_v4 = vrot.slane %v5186_v29, 6 }
 0x336   :  { %1704 = vst [vmem:[#allocation1 + $0x2] ss:$9 sm:$0xff] %v1619_v41  ;;  %v1980_v22 = vpack.c.b16 %v1979_v47, %v1978_v11  ;;  %v1574_v41 = vpack.c.bf16 %v5323_v63, %v5323_v63  ;;  %v1628_v63 = vrot.slane %v5146_v0, 6  ;;  %v2005_v11 = vunpack.c.l.b16 %v1776_v50 }
 0x337   :  { %1705 = vst [vmem:[#allocation1 + $0x3] ss:$9 sm:$0xff] %v1620_v44  ;;  %v1625_v44 = vrot.slane %v5408_v62, 5 }
 0x338   :  { %1706 = vst [vmem:[#allocation1 + $0x4] ss:$9 sm:$0xff] %v1621_v51  ;;  %1989 = vmatpush.bf16.xpose.msrb.mxu0 %v1980_v22  ;;  %v1973_v51 = vunpack.c.l.b16 %v1575_v34  ;;  %v1629_v22 = vrot.slane %v5149_v35, 6  ;;  %v1630_v34 = vrot.slane %v5221_v59, 6 }
 0x339   :  { %1707 = vst [vmem:[#allocation1 + $0x5] ss:$9 sm:$0xff] %v1622_v2  ;;  %v1972_v2 = vunpack.c.l.b16 %v1574_v41  ;;  %v1631_v41 = vrot.slane %v5223_v53, 6 }
 0x33a   :  { %1708 = vst [vmem:[#allocation1 + $0x6] ss:$9 sm:$0xff] %v1623_v54 }
 0x33b   :  { %1709 = vst [vmem:[#allocation1 + $0x7] ss:$9 sm:$0xff] %v1624_v32  ;;  %v1974_v54 = vpack.c.b16 %v1973_v51, %v1972_v2  ;;  %v2004_v32 = vunpack.c.l.b16 %v1775_v6  ;;  %v1576_v51 = vpack.c.bf16 %v5411_v15, %v5411_v15  ;;  %v1633_v2 = vrot.slane %v5153_v7, 6 }
 0x33c   :  { %v1778_v15 = vpack.c.bf16 %v5628_v60, %v5628_v60  ;;  %v1638_v60 = vrot.slane %v5400_v48, 6 }
 0x33d   :  { %v1998_v6 = vunpack.c.l.b16 %v1576_v51 }
 0x33f   :  { %1990 = vmatmul.bf16.vlgmr.msrb.gmra.mxu0 %v1974_v54  ;;  %v1999_v54 = vunpack.c.l.b16 %v1577_v45  ;;  %v1635_v45 = vrot.slane %v5398_v27, 6 }
 0x342   :  { %v5641_v61 = vld [vmem:[#allocation1] sm:$0xff] }
 0x343   :  { %1711 = vst [vmem:[#allocation1] ss:$9 sm:$0xff] %v1625_v44  ;;  %v2006_v44 = vpack.c.b16 %v2005_v11, %v2004_v32  ;;  %v1579_v32 = vpack.c.bf16 %v5432_v9, %v5432_v9  ;;  %v1639_v9 = vrot.slane %v5402_v33, 6 }
 0x345   :  { %2015 = vmatpush.bf16.xpose.msrb.mxu1 %v2006_v44  ;;  %v2025_v44 = vunpack.c.l.b16 %v1579_v32  ;;  %v1643_v32 = vrot.slane %v5408_v62, 6 }
 0x34a   :  { %v1712_v47 = vld [vmem:[#allocation1] sm:$0xff] }
 0x34b   :  { %1713 = vst [vmem:[#allocation1] ss:$9 sm:$0xff] %v1626_v55  ;;  %v2000_v55 = vpack.c.b16 %v1999_v54, %v1998_v6  ;;  %v1641_v54 = vrot.slane %v5341_v49, 6  ;;  %v1642_v6 = vrot.slane %v5327_v13, 6 }
 0x34c   :  { %1714 = vst [vmem:[#allocation1 + $0x1] ss:$9 sm:$0xff] %v1627_v4  ;;  %v1777_v4 = vpack.c.bf16 %v5624_v17, %v5624_v17 }
 0x34d   :  { %1715 = vst [vmem:[#allocation1 + $0x2] ss:$9 sm:$0xff] %v1628_v63  ;;  %2016 = vmatmul.bf16.vlgmr.msrb.gmra.mxu1 %v2000_v55  ;;  %v1779_v55 = vpack.c.bf16 %v5641_v61, %v5641_v61  ;;  %v1644_v61 = vrot.slane %v5178_v38, 7 }
 0x34e   :  { %1716 = vst [vmem:[#allocation1 + $0x3] ss:$9 sm:$0xff] %v1629_v22  ;;  %v2030_v63 = vunpack.c.l.b16 %v1777_v4  ;;  %v2031_v22 = vunpack.c.l.b16 %v1778_v15 }
 0x34f   :  { %1717 = vst [vmem:[#allocation1 + $0x4] ss:$9 sm:$0xff] %v1630_v34  ;;  %v1578_v34 = vpack.c.bf16 %v5424_v40, %v5424_v40  ;;  %v2056_v4 = vunpack.c.l.b16 %v1779_v55 }
 0x350   :  { %1718 = vst [vmem:[#allocation1 + $0x5] ss:$9 sm:$0xff] %v1631_v41  ;;  %v2032_v11 = vpack.c.b16 %v2031_v22, %v2030_v63  ;;  %v1636_v41 = vrot.slane %v5343_v16, 6  ;;  %v1581_v63 = vpack.c.bf16 %v5445_v57, %v5445_v57  ;;  %v1646_v57 = vrot.slane %v5146_v0, 7 }
 0x351   :  { %1719 = vst [vmem:[#allocation1 + $0x6] ss:$9 sm:$0xff] %v1632_v23  ;;  %v1637_v23 = vrot.slane %v5338_v1, 6  ;;  %v2024_v51 = vunpack.c.l.b16 %v1578_v34  ;;  %v1651_v0 = vrot.slane %v5153_v7, 7 }
 0x352   :  { %1720 = vst [vmem:[#allocation1 + $0x7] ss:$9 sm:$0xff] %v1633_v2  ;;  %2041 = vmatpush.bf16.xpose.msra.mxu2 %v2032_v11  ;;  %v1640_v2 = vrot.slane %v5345_v21, 6  ;;  %v1580_v11 = vpack.c.bf16 %v5437_v3, %v5437_v3 }
 0x353   :  { %v2026_v40 = vpack.c.b16 %v2025_v44, %v2024_v51  ;;  %v1647_v51 = vrot.slane %v5149_v35, 7 }
 0x359   :  { %v1721_v50 = vld [vmem:[#allocation1] sm:$0xff]  ;;  %2042 = vmatmul.bf16.vlgmr.msra.gmra.mxu2 %v2026_v40 }
 0x35a   :  { %1722 = vst [vmem:[#allocation1] ss:$9 sm:$0xff] %v1634_v12  ;;  %v1780_v12 = vpack.c.bf16 %v1712_v47, %v1712_v47  ;;  %v1645_v47 = vrot.slane %v5186_v29, 7  ;;  %v1583_v29 = vpack.c.bf16 %v5506_v56, %v5506_v56 }
 0x35c   :  { %v2057_v15 = vunpack.c.l.b16 %v1780_v12 }
 0x35e   :  { %v2058_v22 = vpack.c.b16 %v2057_v15, %v2056_v4  ;;  %v1585_v4 = vpack.c.bf16 %v5563_v19, %v5563_v19  ;;  %v1653_v15 = vrot.slane %v5398_v27, 7  ;;  %v1658_v27 = vrot.slane %v5345_v21, 7 }
 0x35f   :  { %v1587_v21 = vpack.c.bf16 %v5586_v46, %v5586_v46  ;;  %v5723_v46 = vrot.slane %v5483_v58, 4 }
 0x360   :  { %2067 = vmatpush.bf16.xpose.msra.mxu3 %v2058_v22 }
 0x361   :  { %v1723_v17 = vld [vmem:[#allocation1] sm:$0xff] }
 0x362   :  { %1724 = vst [vmem:[#allocation1] ss:$9 sm:$0xff] %v1635_v45  ;;  %v2051_v45 = vunpack.c.l.b16 %v1581_v63  ;;  %v1782_v3 = vpack.c.bf16 %v1723_v17, %v1723_v17  ;;  %v1654_v63 = vrot.slane %v5343_v16, 7  ;;  %v1659_v16 = vrot.slane %v5341_v49, 7 }
 0x363   :  { %1725 = vst [vmem:[#allocation1 + $0x1] ss:$9 sm:$0xff] %v1636_v41  ;;  %v2050_v41 = vunpack.c.l.b16 %v1580_v11  ;;  %v1656_v11 = vrot.slane %v5400_v48, 7  ;;  %v2129_v49 = vunpack.c.l.b16 %v1587_v21 }
 0x364   :  { %1726 = vst [vmem:[#allocation1 + $0x2] ss:$9 sm:$0xff] %v1637_v23  ;;  %v2083_v38 = vunpack.c.l.b16 %v1782_v3  ;;  %v5712_v3 = vrot.slane %v5470_v8, 1  ;;  %v5727_v8 = vrot.slane %v5491_v31, 5  ;;  %v1589_v31 = vpack.c.bf16 %v5594_v52, %v5594_v52 }
 0x365   :  { %1727 = vst [vmem:[#allocation1 + $0x3] ss:$9 sm:$0xff] %v1638_v60  ;;  %v2052_v44 = vpack.c.b16 %v2051_v45, %v2050_v41  ;;  %v1781_v60 = vpack.c.bf16 %v1721_v50, %v1721_v50  ;;  %v1657_v45 = vrot.slane %v5402_v33, 7  ;;  %v1661_v33 = vrot.slane %v5408_v62, 7 }
 0x366   :  { %1728 = vst [vmem:[#allocation1 + $0x4] ss:$9 sm:$0xff] %v1639_v9  ;;  %v1648_v9 = vrot.slane %v5221_v59, 7  ;;  %v1582_v59 = vpack.c.bf16 %v5462_v18, %v5462_v18  ;;  %v5719_v62 = vrot.slane %v5478_v5, 3  ;;  %v5735_v5 = vrot.slane %v5499_v26, 7 }
 0x367   :  { %1729 = vst [vmem:[#allocation1 + $0x5] ss:$9 sm:$0xff] %v1640_v2  ;;  %2068 = vmatmul.bf16.vlgmr.msra.gmra.mxu3 %v2052_v44  ;;  %v1649_v2 = vrot.slane %v5223_v53, 7  ;;  %v2082_v40 = vunpack.c.l.b16 %v1781_v60  ;;  %v2077_v53 = vunpack.c.l.b16 %v1583_v29  ;;  %v5749_v52 = vrot.slane %v5526_v25, 2 }
 0x368   :  { %1730 = vst [vmem:[#allocation1 + $0x6] ss:$9 sm:$0xff] %v1641_v54  ;;  %v1650_v54 = vrot.slane %v5151_v43, 7  ;;  %v2076_v50 = vunpack.c.l.b16 %v1582_v59  ;;  %v1792_v21 = vrot.slane %v5719_v62, 1 }
 0x369   :  { %1731 = vst [vmem:[#allocation1 + $0x7] ss:$9 sm:$0xff] %v1642_v6  ;;  %v2084_v35 = vpack.c.b16 %v2083_v38, %v2082_v40  ;;  %v1652_v6 = vrot.slane %v5298_v14, 7  ;;  %v1655_v14 = vrot.slane %v5338_v1, 7 }
 0x36a   :  { %v2078_v17 = vpack.c.b16 %v2077_v53, %v2076_v50  ;;  %v5752_v50 = vrot.slane %v5530_v24, 3 }
 0x36b   :  { %2093 = vmatpush.bf16.xpose.msra.mxu0 %v2084_v35  ;;  %v5746_v35 = vrot.slane %v5522_v37, 1  ;;  %v6568_v37 = vld [vmem:[#allocation22_spill] sm:$0xff] }
 0x370   :  { %v1732_v34 = vld [vmem:[#allocation1] sm:$0xff] }
 0x371   :  { %1733 = vst [vmem:[#allocation1] ss:$9 sm:$0xff] %v1643_v32  ;;  %v1783_v55 = vpack.c.bf16 %v1732_v34, %v1732_v34  ;;  %v1584_v32 = vpack.c.bf16 %v5553_v28, %v5553_v28  ;;  %v2103_v34 = vunpack.c.l.b16 %v1585_v4  ;;  %v1660_v28 = vrot.slane %v5327_v13, 7 }
 0x372   :  { %2094 = vmatmul.bf16.vlgmr.msra.gmra.mxu0 %v2078_v17  ;;  %v1586_v13 = vpack.c.bf16 %v5578_v20, %v5578_v20  ;;  %v4324_v17 = vmov 65535  }
 0x373   :  { %v2108_v12 = vunpack.c.l.b16 %v1783_v55  ;;  %v2102_v19 = vunpack.c.l.b16 %v1584_v32 }
 0x374   :  { %v2128_v60 = vunpack.c.l.b16 %v1586_v13 }
 0x375   :  { %v2104_v1 = vpack.c.b16 %v2103_v34, %v2102_v19  ;;  %v6572_v34 = vld [vmem:[#allocation26_spill] sm:$0xff] }
 0x378   :  { %v1734_v23 = vld [vmem:[#allocation1] sm:$0xff] }
 0x379   :  { %1735 = vst [vmem:[#allocation1] ss:$9 sm:$0xff] %v1644_v61  ;;  %v1784_v56 = vpack.c.bf16 %v1734_v23, %v1734_v23 }
 0x37a   :  { %1736 = vst [vmem:[#allocation1 + $0x1] ss:$9 sm:$0xff] %v1645_v47 }
 0x37b   :  { %1737 = vst [vmem:[#allocation1 + $0x2] ss:$9 sm:$0xff] %v1646_v57  ;;  %v2109_v7 = vunpack.c.l.b16 %v1784_v56  ;;  %v2130_v57 = vpack.c.b16 %v2129_v49, %v2128_v60  ;;  %v5761_v56 = vrot.slane %v6568_v37, 5  ;;  %v1794_v49 = vrot.slane %v5727_v8, 1 }
 0x37c   :  { %1738 = vst [vmem:[#allocation1 + $0x3] ss:$9 sm:$0xff] %v1647_v51 }
 0x37d   :  { %1739 = vst [vmem:[#allocation1 + $0x4] ss:$9 sm:$0xff] %v1648_v9  ;;  %v2110_v18 = vpack.c.b16 %v2109_v7, %v2108_v12  ;;  %v5715_v9 = vrot.slane %v5474_v10, 2  ;;  %v6569_v12 = vld [vmem:[#allocation23_spill] sm:$0xff] }
 0x37e   :  { %1740 = vst [vmem:[#allocation1 + $0x5] ss:$9 sm:$0xff] %v1649_v2  ;;  %v5731_v2 = vrot.slane %v5495_v30, 6  ;;  %v1588_v30 = vpack.c.bf16 %v5591_v39, %v5591_v39  ;;  %v5765_v7 = vrot.slane %v6569_v12, 6 }
 0x37f   :  { %1741 = vst [vmem:[#allocation1 + $0x6] ss:$9 sm:$0xff] %v1650_v54  ;;  %2119 = vmatpush.bf16.xpose.msra.mxu1 %v2110_v18  ;;  %v2155_v54 = vunpack.c.l.b16 %v1589_v31 }
 0x380   :  { %1742 = vst [vmem:[#allocation1 + $0x7] ss:$9 sm:$0xff] %v1651_v0  ;;  %v2154_v29 = vunpack.c.l.b16 %v1588_v30  ;;  %v1795_v60 = vrot.slane %v5731_v2, 1  ;;  %v1803_v37 = vrot.slane %v5765_v7, 1 }
 0x382   :  { %v2156_v0 = vpack.c.b16 %v2155_v54, %v2154_v29  ;;  %v1799_v29 = vrot.slane %v5749_v52, 1 }
 0x386   :  { %2120 = vmatmul.bf16.vlgmr.msra.gmra.mxu1 %v2104_v1 }
 0x387   :  { %v1743_v43 = vld [vmem:[#allocation1] sm:$0xff] }
 0x388   :  { %1744 = vst [vmem:[#allocation1] ss:$9 sm:$0xff] %v1652_v6  ;;  %v1785_v48 = vpack.c.bf16 %v1743_v43, %v1743_v43  ;;  %v2610_v6 = vsel %vm975_vm0, 4294967295, %v4324_v17  ;;  %v6567_v43 = vld [vmem:[#allocation21_spill] sm:$0xff]  ;;  %vm2178_vm0 = vcmask 72704   ;;  %v1802_v17 = vrot.slane %v5761_v56, 1 }
 0x389   :  { %v5757_v55 = vrot.slane %v6567_v43, 4  ;;  %v5768_v4 = vsel %vm2609_vm7, %v2610_v6, 0 }
 0x38a   :  { %v2134_v44 = vunpack.c.l.b16 %v1785_v48  ;;  %v1790_v48 = vrot.slane %v5712_v3, 1 }
 0x38f   :  { %v1745_v22 = vld [vmem:[#allocation1] sm:$0xff] }
 0x390   :  { %1746 = vst [vmem:[#allocation1] ss:$9 sm:$0xff] %v1653_v15  ;;  %v1786_v41 = vpack.c.bf16 %v1745_v22, %v1745_v22  ;;  %v6570_v15 = vld [vmem:[#allocation24_spill] sm:$0xff] }
 0x391   :  { %1747 = vst [vmem:[#allocation1 + $0x1] ss:$9 sm:$0xff] %v1654_v63  ;;  %v5771_v18 = vrot.slane %v6570_v15, 7 }
 0x392   :  { %1748 = vst [vmem:[#allocation1 + $0x2] ss:$9 sm:$0xff] %v1655_v14  ;;  %v2135_v61 = vunpack.c.l.b16 %v1786_v41  ;;  %v6571_v14 = vld [vmem:[#allocation25_spill] sm:$0xff] }
 0x393   :  { %1749 = vst [vmem:[#allocation1 + $0x3] ss:$9 sm:$0xff] %v1656_v11  ;;  %v1805_v12 = vrot.slane %v6571_v14, 1 }
 0x394   :  { %1750 = vst [vmem:[#allocation1 + $0x4] ss:$9 sm:$0xff] %v1657_v45  ;;  %v2136_v23 = vpack.c.b16 %v2135_v61, %v2134_v44  ;;  %v5783_v45 = vrot.slane %v6572_v34, 1  ;;  %v1791_v61 = vrot.slane %v5715_v9, 1 }
 0x395   :  { %1751 = vst [vmem:[#allocation1 + $0x5] ss:$9 sm:$0xff] %v1658_v27 }
 0x396   :  { %1752 = vst [vmem:[#allocation1 + $0x6] ss:$9 sm:$0xff] %v1659_v16  ;;  %2145 = vmatpush.bf16.xpose.msrb.mxu2 %v2136_v23  ;;  %v1806_v34 = vrot.slane %v5783_v45, 1 }
 0x397   :  { %1753 = vst [vmem:[#allocation1 + $0x7] ss:$9 sm:$0xff] %v1660_v28  ;;  %v1789_v28 = vrot.slane %v5466_v42, 1 }
 0x39d   :  { %2146 = vmatmul.bf16.vlgmr.msrb.gmra.mxu2 %v2130_v57 }
 0x39e   :  { %v1754_v47 = vld [vmem:[#allocation1] sm:$0xff] }
 0x39f   :  { %1755 = vst [vmem:[#allocation1] ss:$9 sm:$0xff] %v1661_v33  ;;  %v1787_v20 = vpack.c.bf16 %v1754_v47, %v1754_v47  ;;  %v1793_v47 = vrot.slane %v5723_v46, 1 }
 0x3a1   :  { %v2160_v58 = vunpack.c.l.b16 %v1787_v20 }
 0x3a6   :  { %v1756_v51 = vld [vmem:[#allocation1] sm:$0xff] }
 0x3a7   :  { %1843 = vst [vmem:[#allocation1] ss:$9 sm:$0xff] %v5466_v42  ;;  %v1788_v10 = vpack.c.bf16 %v1756_v51, %v1756_v51  ;;  %v1796_v51 = vrot.slane %v5735_v5, 1 }
 0x3a8   :  { %1845 = vst [vmem:[#allocation1 + $0x1] ss:$9 sm:$0xff] %v5712_v3 }
 0x3a9   :  { %1847 = vst [vmem:[#allocation1 + $0x2] ss:$9 sm:$0xff] %v5715_v9  ;;  %v2161_v40 = vunpack.c.l.b16 %v1788_v10 }
 0x3aa   :  { %1849 = vst [vmem:[#allocation1 + $0x3] ss:$9 sm:$0xff] %v5719_v62 }
 0x3ab   :  { %1851 = vst [vmem:[#allocation1 + $0x4] ss:$9 sm:$0xff] %v5723_v46  ;;  %v2162_v38 = vpack.c.b16 %v2161_v40, %v2160_v58  ;;  %v1797_v40 = vrot.slane %v5518_v36, 1 }
 0x3ac   :  { %1853 = vst [vmem:[#allocation1 + $0x5] ss:$9 sm:$0xff] %v5727_v8 }
 0x3ad   :  { %1855 = vst [vmem:[#allocation1 + $0x6] ss:$9 sm:$0xff] %v5731_v2  ;;  %2171 = vmatpush.bf16.xpose.msrb.mxu3 %v2162_v38  ;;  %v1798_v38 = vrot.slane %v5746_v35, 1 }
 0x3ae   :  { %1857 = vst [vmem:[#allocation1 + $0x7] ss:$9 sm:$0xff] %v5735_v5 }
 0x3b4   :  { %2172 = vmatmul.bf16.vlgmr.msrb.gmra.mxu3 %v2156_v0 }
 0x3b5   :  { %v1858_v26 = vld [vmem:[#allocation1] sm:$0xff] }
 0x3b6   :  { %1859 = vst [vmem:[#allocation1] ss:$9 sm:$0xff] %v5518_v36  ;;  %v1954_v59 = vpack.c.bf16 %v1858_v26, %v1858_v26 }
 0x3b8   :  { %v2603_v25 = vunpack.c.l.b16 %v1954_v59  ;;  %v1800_v59 = vrot.slane %v5752_v50, 1 }
 0x3bc   :  { %v5777_v32 = vpop.f32.mrf.mxu0 }
 0x3bd   :  { %v1860_v53 = vld [vmem:[#allocation1] sm:$0xff]  ;;  %v2179_v11 = vsel %vm2178_vm0, %v5777_v32, -inf }
 0x3be   :  { %1861 = vst [vmem:[#allocation1] ss:$9 sm:$0xff] %v5746_v35  ;;  %v1955_v39 = vpack.c.bf16 %v1860_v53, %v1860_v53  ;;  %2180 = vmax.xlane.f32.xlu2 %v2179_v11 }
 0x3bf   :  { %1862 = vst [vmem:[#allocation1 + $0x1] ss:$9 sm:$0xff] %v5749_v52 }
 0x3c0   :  { %1863 = vst [vmem:[#allocation1 + $0x2] ss:$9 sm:$0xff] %v5752_v50  ;;  %v2604_v24 = vunpack.c.l.b16 %v1955_v39  ;;  %v1801_v39 = vrot.slane %v5757_v55, 1 }
 0x3c1   :  { %1864 = vst [vmem:[#allocation1 + $0x3] ss:$9 sm:$0xff] %v5757_v55 }
 0x3c2   :  { %1865 = vst [vmem:[#allocation1 + $0x4] ss:$9 sm:$0xff] %v5761_v56  ;;  %v2605_v63 = vpack.c.b16 %v2604_v24, %v2603_v25  ;;  %v1804_v25 = vrot.slane %v5771_v18, 1 }
 0x3c3   :  { %1866 = vst [vmem:[#allocation1 + $0x5] ss:$9 sm:$0xff] %v5765_v7 }
 0x3c4   :  { %1867 = vst [vmem:[#allocation1 + $0x6] ss:$9 sm:$0xff] %v5771_v18  ;;  %v2613_v22 = vand.u32 %v5768_v4, %v2605_v63  ;;  %v5785_v19 = vpop.f32.mrf.mxu0 }
 0x3c5   :  { %1868 = vst [vmem:[#allocation1 + $0x7] ss:$9 sm:$0xff] %v6571_v14  ;;  %v2183_v16 = vsel %vm2182_vm6, %v5785_v19, -inf }
 0x3c6   :  { %2622 = vmatpush.bf16.msrb.mxu0 %v2613_v22  ;;  %2184 = vmax.xlane.f32.xlu0 %v2183_v16 }
 0x3ca   :  { %v5792_v44 = vpop.f32.mrf.mxu1 }
 0x3cb   :  { %v2186_v22 = vsel %vm2178_vm0, %v5792_v44, -inf }
 0x3cc   :  { %v1869_v27 = vld [vmem:[#allocation1] sm:$0xff] }
 0x3cd   :  { %1870 = vst [vmem:[#allocation1] ss:$9 sm:$0xff] %v5783_v45  ;;  %v1956_v1 = vpack.c.bf16 %v1869_v27, %v1869_v27 }
 0x3cf   :  { %v2636_v23 = vunpack.c.l.b16 %v1956_v1  ;;  %v1807_v1 = vrot.slane %v5466_v42, 2 }
 0x3d2   :  { %v5801_v10 = vpop.f32.mrf.mxu1 }
 0x3d3   :  { %v2189_v58 = vsel %vm2182_vm6, %v5801_v10, -inf }
 0x3d4   :  { %v1871_v41 = vld [vmem:[#allocation1] sm:$0xff]  ;;  %2190 = vmax.xlane.f32.xlu1 %v2189_v58  ;;  %v1812_v58 = vrot.slane %v5727_v8, 2 }
 0x3d5   :  { %1872 = vst [vmem:[#allocation1] ss:$9 sm:$0xff] %v1789_v28  ;;  %v1957_v33 = vpack.c.bf16 %v1871_v41, %v1871_v41  ;;  %v1808_v41 = vrot.slane %v5712_v3, 2 }
 0x3d6   :  { %1873 = vst [vmem:[#allocation1 + $0x1] ss:$9 sm:$0xff] %v1790_v48 }
 0x3d7   :  { %1874 = vst [vmem:[#allocation1 + $0x2] ss:$9 sm:$0xff] %v1791_v61  ;;  %v2637_v13 = vunpack.c.l.b16 %v1957_v33 }
 0x3d8   :  { %1875 = vst [vmem:[#allocation1 + $0x3] ss:$9 sm:$0xff] %v1792_v21  ;;  %v1809_v21 = vrot.slane %v5715_v9, 2 }
 0x3d9   :  { %1876 = vst [vmem:[#allocation1 + $0x4] ss:$9 sm:$0xff] %v1793_v47  ;;  %v2638_v57 = vpack.c.b16 %v2637_v13, %v2636_v23  ;;  %v1810_v13 = vrot.slane %v5719_v62, 2 }
 0x3da   :  { %1877 = vst [vmem:[#allocation1 + $0x5] ss:$9 sm:$0xff] %v1794_v49 }
 0x3db   :  { %1878 = vst [vmem:[#allocation1 + $0x6] ss:$9 sm:$0xff] %v1795_v60  ;;  %v2643_v20 = vand.u32 %v2638_v57, %v5768_v4  ;;  %v1811_v60 = vrot.slane %v5723_v46, 2 }
 0x3dc   :  { %1879 = vst [vmem:[#allocation1 + $0x7] ss:$9 sm:$0xff] %v1796_v51  ;;  %v5807_v54 = vpop.f32.mrf.mxu2 }
 0x3dd   :  { %2652 = vmatpush.bf16.msrb.mxu1 %v2643_v20  ;;  %v2192_v0 = vsel %vm2178_vm0, %v5807_v54, -inf }
 0x3de   :  { %2193 = vmax.xlane.f32.xlu0 %v2192_v0  ;;  %v1816_v0 = vrot.slane %v5746_v35, 2 }
 0x3e3   :  { %v1880_v31 = vld [vmem:[#allocation1] sm:$0xff] }
 0x3e4   :  { %1881 = vst [vmem:[#allocation1] ss:$9 sm:$0xff] %v1797_v40  ;;  %v1958_v30 = vpack.c.bf16 %v1880_v31, %v1880_v31  ;;  %v5819_v63 = vpop.f32.mrf.mxu2  ;;  %v1813_v40 = vrot.slane %v5731_v2, 2 }
 0x3e5   :  { %v2195_v11 = vsel %vm2182_vm6, %v5819_v63, -inf }
 0x3e6   :  { %v2666_v6 = vunpack.c.l.b16 %v1958_v30  ;;  %2187 = vmax.xlane.f32.xlu0 %v2186_v22  ;;  %2196 = vmax.xlane.f32.xlu1 %v2195_v11  ;;  %v1823_v11 = vrot.slane %v6571_v14, 2 }
 0x3ea   :  { %v5826_v16 = vpop.f32.mrf.mxu3 }
 0x3eb   :  { %v1882_v26 = vld [vmem:[#allocation1] sm:$0xff]  ;;  %v2198_v28 = vsel %vm2178_vm0, %v5826_v16, -inf }
 0x3ec   :  { %1883 = vst [vmem:[#allocation1] ss:$9 sm:$0xff] %v1798_v38  ;;  %v1959_v53 = vpack.c.bf16 %v1882_v26, %v1882_v26  ;;  %v1814_v38 = vrot.slane %v5735_v5, 2 }
 0x3ed   :  { %1884 = vst [vmem:[#allocation1 + $0x1] ss:$9 sm:$0xff] %v1799_v29  ;;  %v1815_v29 = vrot.slane %v5518_v36, 2 }
 0x3ee   :  { %1885 = vst [vmem:[#allocation1 + $0x2] ss:$9 sm:$0xff] %v1800_v59  ;;  %v2667_v43 = vunpack.c.l.b16 %v1959_v53  ;;  %2199 = vmax.xlane.f32.xlu1 %v2198_v28  ;;  %v1817_v53 = vrot.slane %v5749_v52, 2 }
 0x3ef   :  { %1886 = vst [vmem:[#allocation1 + $0x3] ss:$9 sm:$0xff] %v1801_v39  ;;  %v5838_v49 = vpop.f32.mrf.mxu0 }
 0x3f0   :  { %1887 = vst [vmem:[#allocation1 + $0x4] ss:$9 sm:$0xff] %v1802_v17  ;;  %v2668_v24 = vpack.c.b16 %v2667_v43, %v2666_v6  ;;  %v2204_v20 = vsel %vm2178_vm0, %v5838_v49, -inf  ;;  %v1818_v17 = vrot.slane %v5752_v50, 2  ;;  %v1819_v43 = vrot.slane %v5757_v55, 2 }
 0x3f1   :  { %1888 = vst [vmem:[#allocation1 + $0x5] ss:$9 sm:$0xff] %v1803_v37  ;;  %v1820_v37 = vrot.slane %v5761_v56, 2 }
 0x3f2   :  { %1889 = vst [vmem:[#allocation1 + $0x6] ss:$9 sm:$0xff] %v1804_v25  ;;  %v2673_v15 = vand.u32 %v2668_v24, %v5768_v4  ;;  %v5832_v33 = vpop.f32.mrf.mxu3 }
 0x3f3   :  { %1890 = vst [vmem:[#allocation1 + $0x7] ss:$9 sm:$0xff] %v1805_v12  ;;  %v2201_v23 = vsel %vm2182_vm6, %v5832_v33, -inf  ;;  %v1821_v12 = vrot.slane %v5765_v7, 2 }
 0x3f4   :  { %2682 = vmatpush.bf16.msra.mxu2 %v2673_v15  ;;  %2202 = vmax.xlane.f32.xlu2 %v2201_v23  ;;  %v1822_v15 = vrot.slane %v5771_v18, 2 }
 0x3f6   :  { %2205 = vmax.xlane.f32.xlu1 %v2204_v20  ;;  %v1831_v20 = vrot.slane %v5731_v2, 3 }
 0x3fa   :  { %v1891_v27 = vld [vmem:[#allocation1] sm:$0xff] }
 0x3fb   :  { %1892 = vst [vmem:[#allocation1] ss:$9 sm:$0xff] %v1806_v34  ;;  %v1960_v48 = vpack.c.bf16 %v1891_v27, %v1891_v27  ;;  %v1824_v27 = vrot.slane %v5783_v45, 2 }
 0x3fd   :  { %v2696_v57 = vunpack.c.l.b16 %v1960_v48 }
 0x402   :  { %v1893_v61 = vld [vmem:[#allocation1] sm:$0xff] }
 0x403   :  { %1894 = vst [vmem:[#allocation1] ss:$9 sm:$0xff] %v1807_v1  ;;  %v1961_v47 = vpack.c.bf16 %v1893_v61, %v1893_v61  ;;  %v1825_v1 = vrot.slane %v5466_v42, 3 }
 0x404   :  { %1895 = vst [vmem:[#allocation1 + $0x1] ss:$9 sm:$0xff] %v1808_v41  ;;  %v1826_v41 = vrot.slane %v5712_v3, 3  ;;  %v1830_v3 = vrot.slane %v5727_v8, 3  ;;  %v1833_v8 = vrot.slane %v5518_v36, 3 }
 0x405   :  { %1896 = vst [vmem:[#allocation1 + $0x2] ss:$9 sm:$0xff] %v1809_v21  ;;  %v2697_v51 = vunpack.c.l.b16 %v1961_v47  ;;  %v1827_v47 = vrot.slane %v5715_v9, 3 }
 0x406   :  { %1897 = vst [vmem:[#allocation1 + $0x3] ss:$9 sm:$0xff] %v1810_v13 }
 0x407   :  { %1898 = vst [vmem:[#allocation1 + $0x4] ss:$9 sm:$0xff] %v1811_v60  ;;  %v2698_v31 = vpack.c.b16 %v2697_v51, %v2696_v57  ;;  %v1828_v60 = vrot.slane %v5719_v62, 3  ;;  %v1829_v57 = vrot.slane %v5723_v46, 3 }
 0x408   :  { %1899 = vst [vmem:[#allocation1 + $0x5] ss:$9 sm:$0xff] %v1812_v58  ;;  %v1832_v58 = vrot.slane %v5735_v5, 3 }
 0x409   :  { %1900 = vst [vmem:[#allocation1 + $0x6] ss:$9 sm:$0xff] %v1813_v40  ;;  %v2703_v30 = vand.u32 %v2698_v31, %v5768_v4  ;;  %v5870_v40 = vpop.f32.mrf.mxu0  ;;  %v5876_v31 = vpop.f32.mrf.mxu1 }
 0x40a   :  { %1901 = vst [vmem:[#allocation1 + $0x7] ss:$9 sm:$0xff] %v1814_v38  ;;  %v2207_v46 = vsel %vm2182_vm6, %v5870_v40, -inf  ;;  %v2210_v5 = vsel %vm2178_vm0, %v5876_v31, -inf }
 0x40b   :  { %2712 = vmatpush.bf16.msra.mxu3 %v2703_v30  ;;  %v1834_v30 = vrot.slane %v5746_v35, 3 }
 0x411   :  { %v1902_v26 = vld [vmem:[#allocation1] sm:$0xff] }
 0x412   :  { %1903 = vst [vmem:[#allocation1] ss:$9 sm:$0xff] %v1815_v29  ;;  %v1962_v59 = vpack.c.bf16 %v1902_v26, %v1902_v26  ;;  %v1835_v26 = vrot.slane %v5749_v52, 3 }
 0x414   :  { %v2726_v25 = vunpack.c.l.b16 %v1962_v59 }
 0x419   :  { %v1904_v39 = vld [vmem:[#allocation1] sm:$0xff] }
 0x41a   :  { %v1963_v6 = vpack.c.bf16 %v1904_v39, %v1904_v39  ;;  %1905 = vst [vmem:[#allocation1] ss:$9 sm:$0xff] %v1816_v0 }
 0x41b   :  { %1906 = vst [vmem:[#allocation1 + $0x1] ss:$9 sm:$0xff] %v1817_v53  ;;  %v1836_v53 = vrot.slane %v5752_v50, 3  ;;  %v1840_v50 = vrot.slane %v5771_v18, 3 }
 0x41c   :  { %v2727_v24 = vunpack.c.l.b16 %v1963_v6  ;;  %1907 = vst [vmem:[#allocation1 + $0x2] ss:$9 sm:$0xff] %v1818_v17  ;;  %v1837_v6 = vrot.slane %v5757_v55, 3 }
 0x41d   :  { %1908 = vst [vmem:[#allocation1 + $0x3] ss:$9 sm:$0xff] %v1819_v43  ;;  %v1838_v43 = vrot.slane %v5761_v56, 3 }
 0x41e   :  { %v2728_v22 = vpack.c.b16 %v2727_v24, %v2726_v25  ;;  %1909 = vst [vmem:[#allocation1 + $0x4] ss:$9 sm:$0xff] %v1820_v37  ;;  %v1839_v24 = vrot.slane %v5765_v7, 3 }
 0x41f   :  { %1910 = vst [vmem:[#allocation1 + $0x5] ss:$9 sm:$0xff] %v1821_v12 }
 0x420   :  { %v2733_v34 = vand.u32 %v2728_v22, %v5768_v4  ;;  %1911 = vst [vmem:[#allocation1 + $0x6] ss:$9 sm:$0xff] %v1822_v15  ;;  %v5860_v21 = vpop.f32.mrf.mxu2  ;;  %v1841_v22 = vrot.slane %v6571_v14, 3 }
 0x421   :  { %1912 = vst [vmem:[#allocation1 + $0x7] ss:$9 sm:$0xff] %v1823_v11  ;;  %v2216_v13 = vsel %vm2178_vm0, %v5860_v21, -inf }
 0x422   :  { %2742 = vmatpush.bf16.msra.mxu0 %v2733_v34  ;;  %2217 = vmax.xlane.f32.xlu2 %v2216_v13 }
 0x428   :  { %v1913_v28 = vld [vmem:[#allocation1] sm:$0xff]  ;;  %v5880_v38 = vpop.f32.mrf.mxu2 }
 0x429   :  { %1914 = vst [vmem:[#allocation1] ss:$9 sm:$0xff] %v1824_v27  ;;  %v1964_v48 = vpack.c.bf16 %v1913_v28, %v1913_v28  ;;  %v2219_v59 = vsel %vm2182_vm6, %v5880_v38, -inf  ;;  %v5906_v27 = vpop.f32.mrf.mxu1 }
 0x42a   :  { %2208 = vmax.xlane.f32.xlu2 %v2207_v46  ;;  %2220 = vmax.xlane.f32.xlu0 %v2219_v59 }
 0x42b   :  { %v2756_v42 = vunpack.c.l.b16 %v1964_v48 }
 0x430   :  { %v1915_v61 = vld [vmem:[#allocation1] sm:$0xff] }
 0x431   :  { %v1965_v23 = vpack.c.bf16 %v1915_v61, %v1915_v61  ;;  %1916 = vst [vmem:[#allocation1] ss:$9 sm:$0xff] %v1825_v1  ;;  %v2181_v25 = vpop.xlane.xlu2 %2180  ;;  %v1842_v1 = vrot.slane %v5783_v45, 3  ;;  %v2213_v61 = vsel %vm2182_vm6, %v5906_v27, -inf }
 0x432   :  { %1917 = vst [vmem:[#allocation1 + $0x1] ss:$9 sm:$0xff] %v1826_v41  ;;  %2211 = vmax.xlane.f32.xlu2 %v2210_v5  ;;  %v2228_v55 = vsub.f32 %v5777_v32, %v2181_v25 }
 0x433   :  { %v2757_v51 = vunpack.c.l.b16 %v1965_v23  ;;  %1918 = vst [vmem:[#allocation1 + $0x2] ss:$9 sm:$0xff] %v1827_v47 }
 0x434   :  { %1919 = vst [vmem:[#allocation1 + $0x3] ss:$9 sm:$0xff] %v1828_v60  ;;  %v2244_v11 = vmul.f32 1.442695, %v2228_v55 }
 0x435   :  { %v2758_v9 = vpack.c.b16 %v2757_v51, %v2756_v42  ;;  %1920 = vst [vmem:[#allocation1 + $0x4] ss:$9 sm:$0xff] %v1829_v57 }
 0x436   :  { %1921 = vst [vmem:[#allocation1 + $0x5] ss:$9 sm:$0xff] %v1830_v3 }
 0x437   :  { %v2763_v62 = vand.u32 %v2758_v9, %v5768_v4  ;;  %1922 = vst [vmem:[#allocation1 + $0x6] ss:$9 sm:$0xff] %v1831_v20  ;;  %v5886_v36 = vpop.f32.mrf.mxu3 }
 0x438   :  { %1923 = vst [vmem:[#allocation1 + $0x7] ss:$9 sm:$0xff] %v1832_v58  ;;  %v2222_v56 = vsel %vm2178_vm0, %v5886_v36, -inf }
 0x439   :  { %2772 = vmatpush.bf16.msra.mxu1 %v2763_v62  ;;  %v2185_v17 = vpop.xlane.xlu0 %2184  ;;  %2223 = vmax.xlane.f32.xlu0 %v2222_v56 }
 0x43a   :  { %v2229_v35 = vsub.f32 %v5785_v19, %v2185_v17 }
 0x43c   :  { %v2246_v12 = vmul.f32 1.442695, %v2229_v35 }
 0x43e   :  { %4247 = vpow2.f32 %v2246_v12 }
 0x43f   :  { %v1924_v2 = vld [vmem:[#allocation1] sm:$0xff]  ;;  %v5899_v7 = vpop.f32.mrf.mxu3  ;;  %4249 = vpow2.f32 %v2244_v11 }
 0x440   :  { %1925 = vst [vmem:[#allocation1] ss:$9 sm:$0xff] %v1833_v8  ;;  %v1966_v29 = vpack.c.bf16 %v1924_v2, %v1924_v2  ;;  %v2225_v18 = vsel %vm2182_vm6, %v5899_v7, -inf }
 0x441   :  { %2226 = vmax.xlane.f32.xlu1 %v2225_v18  ;;  %2214 = vmax.xlane.f32.xlu0 %v2213_v61 }
 0x442   :  { %v2786_v52 = vunpack.c.l.b16 %v1966_v29 }
 0x444   :  { %v5904_v34 = vpop.eup %4247 }
 0x445   :  { %v2279_v41 = vsel %vm2182_vm6, %v5904_v34, 0.0 }
 0x447   :  { %v1926_v0 = vld [vmem:[#allocation1] sm:$0xff]  ;;  %v2191_v14 = vpop.xlane.xlu1 %2190 }
 0x448   :  { %v1967_v39 = vpack.c.bf16 %v1926_v0, %v1926_v0  ;;  %1927 = vst [vmem:[#allocation1] ss:$9 sm:$0xff] %v1834_v30  ;;  %v2231_v32 = vsub.f32 %v5801_v10, %v2191_v14  ;;  %v5913_v10 = vpop.eup %4249 }
 0x449   :  { %1928 = vst [vmem:[#allocation1 + $0x1] ss:$9 sm:$0xff] %v1835_v26  ;;  %2280 = vadd.xlane.f32.xlu1 %v2279_v41  ;;  %v2276_v57 = vsel %vm2178_vm0, %v5913_v10, 0.0 }
 0x44a   :  { %v2787_v37 = vunpack.c.l.b16 %v1967_v39  ;;  %1929 = vst [vmem:[#allocation1 + $0x2] ss:$9 sm:$0xff] %v1836_v53  ;;  %v2250_v28 = vmul.f32 1.442695, %v2231_v32  ;;  %2277 = vadd.xlane.f32.xlu0 %v2276_v57 }
 0x44b   :  { %1930 = vst [vmem:[#allocation1 + $0x3] ss:$9 sm:$0xff] %v1837_v6 }
 0x44c   :  { %v2788_v15 = vpack.c.b16 %v2787_v37, %v2786_v52  ;;  %1931 = vst [vmem:[#allocation1 + $0x4] ss:$9 sm:$0xff] %v1838_v43  ;;  %4251 = vpow2.f32 %v2250_v28 }
 0x44d   :  { %1932 = vst [vmem:[#allocation1 + $0x5] ss:$9 sm:$0xff] %v1839_v24 }
 0x44e   :  { %v2793_v19 = vand.u32 %v2788_v15, %v5768_v4  ;;  %1933 = vst [vmem:[#allocation1 + $0x6] ss:$9 sm:$0xff] %v1840_v50 }
 0x44f   :  { %1934 = vst [vmem:[#allocation1 + $0x7] ss:$9 sm:$0xff] %v1841_v22 }
 0x450   :  { %2802 = vmatpush.bf16.msrb.mxu2 %v2793_v19 }
 0x451   :  { %v2194_v42 = vpop.xlane.xlu0 %2193 }
 0x452   :  { %v5915_v47 = vpop.eup %4251  ;;  %v2232_v51 = vsub.f32 %v5807_v54, %v2194_v42 }
 0x453   :  { %v2285_v45 = vsel %vm2182_vm6, %v5915_v47, 0.0 }
 0x454   :  { %2286 = vadd.xlane.f32.xlu2 %v2285_v45  ;;  %v2252_v9 = vmul.f32 1.442695, %v2232_v51 }
 0x456   :  { %v1935_v48 = vld [vmem:[#allocation1] sm:$0xff]  ;;  %4253 = vpow2.f32 %v2252_v9 }
 0x457   :  { %1936 = vst [vmem:[#allocation1] ss:$9 sm:$0xff] %v1842_v1  ;;  %v1968_v23 = vpack.c.bf16 %v1935_v48, %v1935_v48 }
 0x459   :  { %v2816_v3 = vunpack.c.l.b16 %v1968_v23  ;;  %v2188_v46 = vpop.xlane.xlu0 %2187  ;;  %v2197_v2 = vpop.xlane.xlu1 %2196 }
 0x45a   :  { %v2230_v8 = vsub.f32 %v5792_v44, %v2188_v46  ;;  %v2233_v5 = vsub.f32 %v5819_v63, %v2197_v2 }
 0x45c   :  { %v5925_v30 = vpop.eup %4253  ;;  %v2248_v29 = vmul.f32 1.442695, %v2230_v8  ;;  %v2254_v26 = vmul.f32 1.442695, %v2233_v5 }
 0x45d   :  { %v2288_v54 = vsel %vm2178_vm0, %v5925_v30, 0.0 }
 0x45e   :  { %v1937_v13 = vld [vmem:[#allocation1] sm:$0xff]  ;;  %4255 = vpow2.f32 %v2248_v29  ;;  %2289 = vadd.xlane.f32.xlu1 %v2288_v54 }
 0x45f   :  { %v1969_v60 = vpack.c.bf16 %v1937_v13, %v1937_v13  ;;  %4257 = vpow2.f32 %v2254_v26 }
 0x461   :  { %v2817_v20 = vunpack.c.l.b16 %v1969_v60  ;;  %v2200_v0 = vpop.xlane.xlu1 %2199 }
 0x463   :  { %v2818_v58 = vpack.c.b16 %v2817_v20, %v2816_v3 }
 0x464   :  { %v5930_v59 = vpop.eup %4255 }
 0x465   :  { %v2823_v62 = vand.u32 %v2818_v58, %v5768_v4  ;;  %v2234_v4 = vsub.f32 %v5826_v16, %v2200_v0  ;;  %v5932_v53 = vpop.eup %4257  ;;  %v2282_v63 = vsel %vm2178_vm0, %v5930_v59, 0.0 }
 0x466   :  { %v2291_v39 = vsel %vm2182_vm6, %v5932_v53, 0.0  ;;  %2283 = vadd.xlane.f32.xlu1 %v2282_v63 }
 0x467   :  { %2832 = vmatpush.bf16.msrb.mxu3 %v2823_v62  ;;  %v2256_v44 = vmul.f32 1.442695, %v2234_v4  ;;  %2292 = vadd.xlane.f32.xlu2 %v2291_v39  ;;  %v2203_v17 = vpop.xlane.xlu2 %2202 }
 0x468   :  { %v2235_v6 = vsub.f32 %v5832_v33, %v2203_v17 }
 0x469   :  { %4259 = vpow2.f32 %v2256_v44  ;;  %v2206_v35 = vpop.xlane.xlu1 %2205 }
 0x46a   :  { %v2258_v43 = vmul.f32 1.442695, %v2235_v6  ;;  %v2236_v16 = vsub.f32 %v5838_v49, %v2206_v35 }
 0x46c   :  { %4261 = vpow2.f32 %v2258_v43  ;;  %v2260_v37 = vmul.f32 1.442695, %v2236_v16 }
 0x46e   :  { %4263 = vpow2.f32 %v2260_v37 }
 0x46f   :  { %v5940_v52 = vpop.eup %4259 }
 0x470   :  { %v2294_v25 = vsel %vm2178_vm0, %v5940_v52, 0.0 }
 0x471   :  { %2295 = vadd.xlane.f32.xlu2 %v2294_v25 }
 0x472   :  { %v5944_v24 = vpop.eup %4261 }
 0x473   :  { %v2297_v12 = vsel %vm2182_vm6, %v5944_v24, 0.0 }
 0x474   :  { %v5948_v50 = vpop.eup %4263  ;;  %2298 = vadd.xlane.f32.xlu0 %v2297_v12 }
 0x475   :  { %v2300_v33 = vsel %vm2178_vm0, %v5948_v50, 0.0 }
 0x479   :  { %2301 = vadd.xlane.f32.xlu2 %v2300_v33 }
 0x495   :  { %v2218_v49 = vpop.xlane.xlu2 %2217 }
 0x496   :  { %v2240_v15 = vsub.f32 %v5860_v21, %v2218_v49 }
 0x498   :  { %v2268_v22 = vmul.f32 1.442695, %v2240_v15 }
 0x49a   :  { %4265 = vpow2.f32 %v2268_v22 }
 0x49d   :  { %v2209_v55 = vpop.xlane.xlu2 %2208 }
 0x49e   :  { %v2237_v56 = vsub.f32 %v5870_v40, %v2209_v55  ;;  %v2221_v40 = vpop.xlane.xlu0 %2220 }
 0x49f   :  { %v2241_v48 = vsub.f32 %v5880_v38, %v2221_v40 }
 0x4a0   :  { %v5954_v19 = vpop.eup %4265  ;;  %v2262_v18 = vmul.f32 1.442695, %v2237_v56 }
 0x4a1   :  { %v2312_v11 = vsel %vm2178_vm0, %v5954_v19, 0.0  ;;  %v2270_v41 = vmul.f32 1.442695, %v2241_v48 }
 0x4a2   :  { %4267 = vpow2.f32 %v2262_v18  ;;  %2313 = vadd.xlane.f32.xlu0 %v2312_v11 }
 0x4a5   :  { %v2212_v14 = vpop.xlane.xlu2 %2211 }
 0x4a6   :  { %v2238_v32 = vsub.f32 %v5876_v31, %v2212_v14 }
 0x4a8   :  { %v5959_v28 = vpop.eup %4267  ;;  %v2264_v1 = vmul.f32 1.442695, %v2238_v32 }
 0x4a9   :  { %v2303_v21 = vsel %vm2182_vm6, %v5959_v28, 0.0 }
 0x4aa   :  { %4269 = vpow2.f32 %v2264_v1  ;;  %2304 = vadd.xlane.f32.xlu0 %v2303_v21 }
 0x4ab   :  { %4271 = vpow2.f32 %v2270_v41 }
 0x4ac   :  { %v2224_v31 = vpop.xlane.xlu0 %2223 }
 0x4ad   :  { %v2242_v45 = vsub.f32 %v5886_v36, %v2224_v31 }
 0x4af   :  { %v2272_v42 = vmul.f32 1.442695, %v2242_v45 }
 0x4b0   :  { %v5964_v61 = vpop.eup %4269 }
 0x4b1   :  { %v2306_v23 = vsel %vm2178_vm0, %v5964_v61, 0.0  ;;  %v5970_v57 = vpop.eup %4271  ;;  %4273 = vpow2.f32 %v2272_v42 }
 0x4b2   :  { %2307 = vadd.xlane.f32.xlu0 %v2306_v23  ;;  %v2315_v38 = vsel %vm2182_vm6, %v5970_v57, 0.0 }
 0x4b3   :  { %2316 = vadd.xlane.f32.xlu1 %v2315_v38 }
 0x4b4   :  { %v2227_v13 = vpop.xlane.xlu1 %2226  ;;  %v2215_v3 = vpop.xlane.xlu0 %2214 }
 0x4b5   :  { %v2243_v60 = vsub.f32 %v5899_v7, %v2227_v13  ;;  %v2239_v20 = vsub.f32 %v5906_v27, %v2215_v3 }
 0x4b7   :  { %v2274_v51 = vmul.f32 1.442695, %v2243_v60  ;;  %v5975_v58 = vpop.eup %4273  ;;  %v2266_v36 = vmul.f32 1.442695, %v2239_v20 }
 0x4b8   :  { %v2318_v7 = vsel %vm2178_vm0, %v5975_v58, 0.0 }
 0x4b9   :  { %4275 = vpow2.f32 %v2274_v51 }
 0x4bb   :  { %2319 = vadd.xlane.f32.xlu1 %v2318_v7 }
 0x4bc   :  { %v2281_v9 = vpop.xlane.xlu1 %2280 }
 0x4bd   :  { %4277 = vrcp.f32 %v2281_v9  ;;  %v2278_v27 = vpop.xlane.xlu0 %2277  ;;  %v2350_v0 = vand.u32 2147483648, %v2281_v9  ;;  %v2348_v44 = vand.u32 2147483647, %v2281_v9  ;;  %vm2344_vm4 = vweird.f32 %v2281_v9 }
 0x4be   :  { %4279 = vpow2.f32 %v2266_v36  ;;  %v2335_v37 = vand.u32 2147483648, %v2278_v27  ;;  %v2333_v49 = vand.u32 2147483647, %v2278_v27 }
 0x4bf   :  { %v5977_v62 = vpop.eup %4275  ;;  %4281 = vrcp.f32 %v2278_v27  ;;  %v2351_v35 = vor.u32 1.1754944e-38, %v2350_v0  ;;  %vm2349_vm11 = vcmp.eq.f32.partialorder %v2348_v44, 8.507059e+37 }
 0x4c0   :  { %v2321_v46 = vsel %vm2182_vm6, %v5977_v62, 0.0  ;;  %v2336_v56 = vor.u32 1.1754944e-38, %v2335_v37 }
 0x4c1   :  { %2322 = vadd.xlane.f32.xlu2 %v2321_v46 }
 0x4c3   :  { %v4278_v2 = vpop.eup %4277 }
 0x4c4   :  { %v2340_v5 = vmul.f32 %v4278_v2, %v2281_v9  ;;  %v5986_v29 = vpop.eup %4279  ;;  %vm2345_vm9 = vweird.f32 %v4278_v2 }
 0x4c5   :  { %v2309_v54 = vsel %vm2182_vm6, %v5986_v29, 0.0  ;;  %v4282_v63 = vpop.eup %4281  ;;  %vm2346_vm10 = vmor %vm2344_vm4, %vm2345_vm9  ;;  %vm2329_vm6 = vweird.f32 %v2278_v27  ;;  %vm2334_vm9 = vcmp.eq.f32.partialorder %v2333_v49, 8.507059e+37 }
 0x4c6   :  { %v2341_v26 = vsub.f32 1.0, %v2340_v5  ;;  %2310 = vadd.xlane.f32.xlu1 %v2309_v54  ;;  %v2325_v17 = vmul.f32 %v4282_v63, %v2278_v27  ;;  %vm2330_vm7 = vweird.f32 %v4282_v63 }
 0x4c7   :  { %v5983_v8 = vpop.xlane.xlu2 %2286  ;;  %vm2331_vm8 = vmor %vm2329_vm6, %vm2330_vm7 }
 0x4c8   :  { %4283 = vrcp.f32 %v5983_v8  ;;  %v2342_v4 = vmul.f32 %v4278_v2, %v2341_v26  ;;  %v2326_v43 = vsub.f32 1.0, %v2325_v17  ;;  %v2380_v42 = vand.u32 2147483648, %v5983_v8 }
 0x4c9   :  { %vm2374_vm4 = vweird.f32 %v5983_v8  ;;  %v2378_v51 = vand.u32 2147483647, %v5983_v8 }
 0x4ca   :  { %v2343_v6 = vadd.f32 %v4278_v2, %v2342_v4  ;;  %v2327_v33 = vmul.f32 %v4282_v63, %v2326_v43  ;;  %v2381_v27 = vor.u32 1.1754944e-38, %v2380_v42 }
 0x4cc   :  { %v2347_v16 = vsel %vm2346_vm10, %v4278_v2, %v2343_v6  ;;  %v2328_v55 = vadd.f32 %v4282_v63, %v2327_v33 }
 0x4cd   :  { %v2352_v25 = vsel %vm2349_vm11, %v2351_v35, %v2347_v16 }
 0x4ce   :  { %v5990_v39 = vpop.eup %4283  ;;  %v2565_v15 = vmul.f32 %v5904_v34, %v2352_v25  ;;  %v2332_v11 = vsel %vm2331_vm8, %v4282_v63, %v2328_v55 }
 0x4cf   :  { %v2370_v12 = vmul.f32 %v5990_v39, %v5983_v8  ;;  %v2337_v32 = vsel %vm2334_vm9, %v2336_v56, %v2332_v11  ;;  %vm2375_vm8 = vweird.f32 %v5990_v39  ;;  %vm2379_vm9 = vcmp.eq.f32.partialorder %v2378_v51, 8.507059e+37 }
 0x4d0   :  { %v2581_v14 = vpack.c.bf16 %v2565_v15, %v2565_v15  ;;  %v2564_v1 = vmul.f32 %v5913_v10, %v2337_v32  ;;  %vm6002_vm11 = vmor %vm2374_vm4, %vm2375_vm8 }
 0x4d1   :  { %v2290_v22 = vpop.xlane.xlu1 %2289  ;;  %v2371_v18 = vsub.f32 1.0, %v2370_v12 }
 0x4d2   :  { %4285 = vrcp.f32 %v2290_v22  ;;  %v2580_v48 = vpack.c.bf16 %v2564_v1, %v2564_v1  ;;  %v2599_v41 = vunpack.c.l.b16 %v2581_v14  ;;  %v2395_v9 = vand.u32 2147483648, %v2290_v22 }
 0x4d3   :  { %v2372_v40 = vmul.f32 %v5990_v39, %v2371_v18  ;;  %vm2389_vm7 = vweird.f32 %v2290_v22  ;;  %v2393_v46 = vand.u32 2147483647, %v2290_v22 }
 0x4d4   :  { %v2598_v45 = vunpack.c.l.b16 %v2580_v48  ;;  %v2396_v4 = vor.u32 1.1754944e-38, %v2395_v9 }
 0x4d5   :  { %v2373_v60 = vadd.f32 %v5990_v39, %v2372_v40  ;;  %vm2394_vm8 = vcmp.eq.f32.partialorder %v2393_v46, 8.507059e+37 }
 0x4d6   :  { %v2600_v38 = vpack.c.b16 %v2599_v41, %v2598_v45 }
 0x4d7   :  { %v2377_v7 = vsel %vm6002_vm11, %v5990_v39, %v2373_v60 }
 0x4d8   :  { %v4286_v21 = vpop.eup %4285  ;;  %3951 = vmatmul.msk.bf16.vlgmr.msrb.gmra.mxu0 %vm2178_vm0, %v2600_v38  ;;  %v2382_v0 = vsel %vm2379_vm9, %v2381_v27, %v2377_v7 }
 0x4d9   :  { %v2385_v23 = vmul.f32 %v4286_v21, %v2290_v22  ;;  %v2284_v34 = vpop.xlane.xlu1 %2283  ;;  %vm2390_vm10 = vweird.f32 %v4286_v21  ;;  %v2567_v25 = vmul.f32 %v5915_v47, %v2382_v0 }
 0x4da   :  { %v2293_v31 = vpop.xlane.xlu2 %2292  ;;  %4287 = vrcp.f32 %v2284_v34  ;;  %vm2391_vm6 = vmor %vm2389_vm7, %vm2390_vm10  ;;  %v2363_v17 = vand.u32 2147483647, %v2284_v34  ;;  %v2365_v6 = vand.u32 2147483648, %v2284_v34  ;;  %vm2359_vm10 = vweird.f32 %v2284_v34 }
 0x4db   :  { %v2386_v13 = vsub.f32 1.0, %v2385_v23  ;;  %4289 = vrcp.f32 %v2293_v31  ;;  %v2410_v39 = vand.u32 2147483648, %v2293_v31  ;;  %v2408_v37 = vand.u32 2147483647, %v2293_v31 }
 0x4dc   :  { %vm2404_vm7 = vweird.f32 %v2293_v31  ;;  %v2366_v15 = vor.u32 1.1754944e-38, %v2365_v6  ;;  %v2583_v1 = vpack.c.bf16 %v2567_v25, %v2567_v25 }
 0x4dd   :  { %v2387_v10 = vmul.f32 %v4286_v21, %v2386_v13  ;;  %v2411_v55 = vor.u32 1.1754944e-38, %v2410_v39  ;;  %vm2409_vm1 = vcmp.eq.f32.partialorder %v2408_v37, 8.507059e+37 }
 0x4df   :  { %v2388_v20 = vadd.f32 %v4286_v21, %v2387_v10 }
 0x4e0   :  { %v4288_v36 = vpop.eup %4287 }
 0x4e1   :  { %v4290_v2 = vpop.eup %4289  ;;  %v2355_v8 = vmul.f32 %v4288_v36, %v2284_v34  ;;  %v2392_v5 = vsel %vm2391_vm6, %v4286_v21, %v2388_v20  ;;  %vm2360_vm4 = vweird.f32 %v4288_v36 }
 0x4e2   :  { %v2400_v26 = vmul.f32 %v4290_v2, %v2293_v31  ;;  %v2397_v35 = vsel %vm2394_vm8, %v2396_v4, %v2392_v5  ;;  %vm2405_vm11 = vweird.f32 %v4290_v2  ;;  %vm2361_vm6 = vmor %vm2359_vm10, %vm2360_vm4  ;;  %vm2364_vm8 = vcmp.eq.f32.partialorder %v2363_v17, 8.507059e+37 }
 0x4e3   :  { %v2356_v44 = vsub.f32 1.0, %v2355_v8  ;;  %v2568_v33 = vmul.f32 %v5925_v30, %v2397_v35  ;;  %vm2406_vm9 = vmor %vm2404_vm7, %vm2405_vm11  ;;  %v2632_v31 = vunpack.c.l.b16 %v2583_v1 }
 0x4e4   :  { %v2296_v54 = vpop.xlane.xlu2 %2295  ;;  %v2401_v63 = vsub.f32 1.0, %v2400_v26 }
 0x4e5   :  { %4291 = vrcp.f32 %v2296_v54  ;;  %v2357_v43 = vmul.f32 %v4288_v36, %v2356_v44  ;;  %v2584_v30 = vpack.c.bf16 %v2568_v33, %v2568_v33  ;;  %vm2419_vm11 = vweird.f32 %v2296_v54 }
 0x4e6   :  { %v2402_v16 = vmul.f32 %v4290_v2, %v2401_v63  ;;  %v2425_v13 = vand.u32 2147483648, %v2296_v54  ;;  %v2423_v10 = vand.u32 2147483647, %v2296_v54 }
 0x4e7   :  { %v2358_v12 = vadd.f32 %v4288_v36, %v2357_v43  ;;  %v2299_v18 = vpop.xlane.xlu0 %2298  ;;  %v2661_v60 = vunpack.c.l.b16 %v2584_v30 }
 0x4e8   :  { %v2403_v49 = vadd.f32 %v4290_v2, %v2402_v16  ;;  %4293 = vrcp.f32 %v2299_v18  ;;  %vm2424_vm10 = vcmp.eq.f32.partialorder %v2423_v10, 8.507059e+37  ;;  %v2440_v46 = vand.u32 2147483648, %v2299_v18 }
 0x4e9   :  { %v2362_v56 = vsel %vm2361_vm6, %v4288_v36, %v2358_v12  ;;  %v2438_v27 = vand.u32 2147483647, %v2299_v18  ;;  %vm2434_vm6 = vweird.f32 %v2299_v18 }
 0x4ea   :  { %v2407_v11 = vsel %vm2406_vm9, %v4290_v2, %v2403_v49  ;;  %v2367_v14 = vsel %vm2364_vm8, %v2366_v15, %v2362_v56  ;;  %v2441_v26 = vor.u32 1.1754944e-38, %v2440_v46 }
 0x4eb   :  { %v4292_v22 = vpop.eup %4291  ;;  %v2412_v47 = vsel %vm2409_vm1, %v2411_v55, %v2407_v11  ;;  %v2566_v21 = vmul.f32 %v5930_v59, %v2367_v14  ;;  %vm2439_vm8 = vcmp.eq.f32.partialorder %v2438_v27, 8.507059e+37 }
 0x4ec   :  { %v2415_v32 = vmul.f32 %v4292_v22, %v2296_v54  ;;  %v2569_v40 = vmul.f32 %v5932_v53, %v2412_v47  ;;  %vm2420_vm4 = vweird.f32 %v4292_v22  ;;  %v2426_v53 = vor.u32 1.1754944e-38, %v2425_v13  ;;  %v2302_v39 = vpop.xlane.xlu2 %2301 }
 0x4ed   :  { %v2582_v41 = vpack.c.bf16 %v2566_v21, %v2566_v21  ;;  %vm2421_vm1 = vmor %vm2419_vm11, %vm2420_vm4  ;;  %4295 = vrcp.f32 %v2302_v39  ;;  %v2455_v15 = vand.u32 2147483648, %v2302_v39  ;;  %vm2449_vm11 = vweird.f32 %v2302_v39 }
 0x4ee   :  { %v2416_v48 = vsub.f32 1.0, %v2415_v32  ;;  %v2585_v23 = vpack.c.bf16 %v2569_v40, %v2569_v40  ;;  %v4294_v51 = vpop.eup %4293  ;;  %v2453_v55 = vand.u32 2147483647, %v2302_v39 }
 0x4ef   :  { %v2631_v45 = vunpack.c.l.b16 %v2582_v41  ;;  %v2430_v20 = vmul.f32 %v4294_v51, %v2299_v18  ;;  %vm2435_vm7 = vweird.f32 %v4294_v51  ;;  %v2456_v32 = vor.u32 1.1754944e-38, %v2455_v15 }
 0x4f0   :  { %v2417_v34 = vmul.f32 %v4292_v22, %v2416_v48  ;;  %v2662_v42 = vunpack.c.l.b16 %v2585_v23  ;;  %vm2436_vm9 = vmor %vm2434_vm6, %vm2435_vm7 }
 0x4f1   :  { %v2633_v59 = vpack.c.b16 %v2632_v31, %v2631_v45  ;;  %v2431_v36 = vsub.f32 1.0, %v2430_v20 }
 0x4f2   :  { %v2418_v38 = vadd.f32 %v4292_v22, %v2417_v34  ;;  %v2663_v9 = vpack.c.b16 %v2662_v42, %v2661_v60 }
 0x4f3   :  { %3952 = vmatmul.msk.bf16.vlgmr.msrb.gmra.mxu1 %vm2178_vm0, %v2633_v59  ;;  %v2432_v2 = vmul.f32 %v4294_v51, %v2431_v36  ;;  %v4296_v43 = vpop.eup %4295 }
 0x4f4   :  { %v2422_v3 = vsel %vm2421_vm1, %v4292_v22, %v2418_v38  ;;  %3953 = vmatmul.msk.bf16.vlgmr.msra.gmra.mxu2 %vm2178_vm0, %v2663_v9  ;;  %v2445_v16 = vmul.f32 %v4296_v43, %v2302_v39  ;;  %vm2450_vm4 = vweird.f32 %v4296_v43 }
 0x4f5   :  { %v2427_v7 = vsel %vm2424_vm10, %v2426_v53, %v2422_v3  ;;  %v2433_v5 = vadd.f32 %v4294_v51, %v2432_v2  ;;  %vm2451_vm1 = vmor %vm2449_vm11, %vm2450_vm4  ;;  %vm2454_vm10 = vcmp.eq.f32.partialorder %v2453_v55, 8.507059e+37 }
 0x4f6   :  { %v2570_v8 = vmul.f32 %v5940_v52, %v2427_v7  ;;  %v2446_v37 = vsub.f32 1.0, %v2445_v16 }
 0x4f7   :  { %v2437_v54 = vsel %vm2436_vm9, %v4294_v51, %v2433_v5 }
 0x4f8   :  { %v2442_v0 = vsel %vm2439_vm8, %v2441_v26, %v2437_v54  ;;  %v2586_v4 = vpack.c.bf16 %v2570_v8, %v2570_v8  ;;  %v2447_v12 = vmul.f32 %v4296_v43, %v2446_v37 }
 0x4f9   :  { %v2571_v44 = vmul.f32 %v5944_v24, %v2442_v0 }
 0x4fa   :  { %v2691_v17 = vunpack.c.l.b16 %v2586_v4  ;;  %v2448_v49 = vadd.f32 %v4296_v43, %v2447_v12 }
 0x4fb   :  { %v2587_v63 = vpack.c.bf16 %v2571_v44, %v2571_v44 }
 0x4fc   :  { %v2452_v11 = vsel %vm2451_vm1, %v4296_v43, %v2448_v49 }
 0x4fd   :  { %v2692_v6 = vunpack.c.l.b16 %v2587_v63  ;;  %v2457_v21 = vsel %vm2454_vm10, %v2456_v32, %v2452_v11 }
 0x4fe   :  { %v2572_v34 = vmul.f32 %v5948_v50, %v2457_v21 }
 0x4ff   :  { %v2693_v35 = vpack.c.b16 %v2692_v6, %v2691_v17 }
 0x500   :  { %v2588_v51 = vpack.c.bf16 %v2572_v34, %v2572_v34 }
 0x501   :  { %3954 = vmatmul.msk.bf16.vlgmr.msra.gmra.mxu3 %vm2178_vm0, %v2693_v35 }
 0x502   :  { %v2721_v2 = vunpack.c.l.b16 %v2588_v51 }
 0x515   :  { %v2314_v52 = vpop.xlane.xlu0 %2313 }
 0x516   :  { %4297 = vrcp.f32 %v2314_v52  ;;  %v2515_v38 = vand.u32 2147483648, %v2314_v52  ;;  %vm2509_vm11 = vweird.f32 %v2314_v52  ;;  %v2513_v59 = vand.u32 2147483647, %v2314_v52 }
 0x518   :  { %v2516_v53 = vor.u32 1.1754944e-38, %v2515_v38  ;;  %vm2514_vm10 = vcmp.eq.f32.partialorder %v2513_v59, 8.507059e+37 }
 0x51c   :  { %v4298_v33 = vpop.eup %4297 }
 0x51d   :  { %v2305_v25 = vpop.xlane.xlu0 %2304  ;;  %v2505_v24 = vmul.f32 %v4298_v33, %v2314_v52  ;;  %vm2510_vm4 = vweird.f32 %v4298_v33 }
 0x51e   :  { %4299 = vrcp.f32 %v2305_v25  ;;  %v2470_v47 = vand.u32 2147483648, %v2305_v25  ;;  %v2468_v40 = vand.u32 2147483647, %v2305_v25  ;;  %vm2464_vm6 = vweird.f32 %v2305_v25  ;;  %vm2511_vm1 = vmor %vm2509_vm11, %vm2510_vm4 }
 0x51f   :  { %v2506_v14 = vsub.f32 1.0, %v2505_v24 }
 0x520   :  { %v2471_v31 = vor.u32 1.1754944e-38, %v2470_v47  ;;  %vm2469_vm8 = vcmp.eq.f32.partialorder %v2468_v40, 8.507059e+37 }
 0x521   :  { %v2507_v48 = vmul.f32 %v4298_v33, %v2506_v14 }
 0x523   :  { %v2508_v60 = vadd.f32 %v4298_v33, %v2507_v48 }
 0x524   :  { %v4300_v22 = vpop.eup %4299 }
 0x525   :  { %v2460_v56 = vmul.f32 %v4300_v22, %v2305_v25  ;;  %v6019_v18 = vpop.xlane.xlu0 %2307  ;;  %vm2465_vm7 = vweird.f32 %v4300_v22  ;;  %v2512_v9 = vsel %vm2511_vm1, %v4298_v33, %v2508_v60 }
 0x526   :  { %4301 = vrcp.f32 %v6019_v18  ;;  %v2317_v23 = vpop.xlane.xlu1 %2316  ;;  %vm2466_vm9 = vmor %vm2464_vm6, %vm2465_vm7  ;;  %v2483_v52 = vand.u32 2147483647, %v6019_v18  ;;  %v2485_v15 = vand.u32 2147483648, %v6019_v18 }
 0x527   :  { %v2461_v1 = vsub.f32 1.0, %v2460_v56  ;;  %4303 = vrcp.f32 %v2317_v23  ;;  %v2530_v26 = vand.u32 2147483648, %v2317_v23  ;;  %v2528_v0 = vand.u32 2147483647, %v2317_v23 }
 0x528   :  { %vm2524_vm6 = vweird.f32 %v2317_v23 }
 0x529   :  { %v2462_v30 = vmul.f32 %v4300_v22, %v2461_v1  ;;  %v2531_v35 = vor.u32 1.1754944e-38, %v2530_v26  ;;  %vm2529_vm4 = vcmp.eq.f32.partialorder %v2528_v0, 8.507059e+37 }
 0x52b   :  { %v2463_v41 = vadd.f32 %v4300_v22, %v2462_v30 }
 0x52c   :  { %v6023_v13 = vpop.eup %4301 }
 0x52d   :  { %v2467_v45 = vsel %vm2466_vm9, %v4300_v22, %v2463_v41  ;;  %v2475_v50 = vmul.f32 %v6023_v13, %v6019_v18  ;;  %v4304_v20 = vpop.eup %4303  ;;  %vm2480_vm11 = vweird.f32 %v6023_v13 }
 0x52e   :  { %v2472_v42 = vsel %vm2469_vm8, %v2471_v31, %v2467_v45  ;;  %v2520_v7 = vmul.f32 %v4304_v20, %v2317_v23  ;;  %v2320_v46 = vpop.xlane.xlu1 %2319  ;;  %vm2525_vm7 = vweird.f32 %v4304_v20  ;;  %vm2479_vm8 = vweird.f32 %v6019_v18 }
 0x52f   :  { %v2573_v10 = vmul.f32 %v5959_v28, %v2472_v42  ;;  %4305 = vrcp.f32 %v2320_v46  ;;  %v2517_v28 = vsel %vm2514_vm10, %v2516_v53, %v2512_v9  ;;  %v2476_v5 = vsub.f32 1.0, %v2475_v50  ;;  %vm2526_vm9 = vmor %vm2524_vm6, %vm2525_vm7 }
 0x530   :  { %v2521_v8 = vsub.f32 1.0, %v2520_v7  ;;  %v2576_v44 = vmul.f32 %v5954_v19, %v2517_v28  ;;  %v2543_v22 = vand.u32 2147483647, %v2320_v46  ;;  %v2545_v55 = vand.u32 2147483648, %v2320_v46  ;;  %vm6047_vm10 = vmor %vm2479_vm8, %vm2480_vm11 }
 0x531   :  { %v2589_v3 = vpack.c.bf16 %v2573_v10, %v2573_v10  ;;  %v2477_v17 = vmul.f32 %v6023_v13, %v2476_v5  ;;  %vm2539_vm6 = vweird.f32 %v2320_v46  ;;  %v2486_v42 = vor.u32 1.1754944e-38, %v2485_v15  ;;  %v4181_v15 = vld [vmem:[%s6410_s5 + $0x20] sm:$0xff] }
 0x532   :  { %v2522_v54 = vmul.f32 %v4304_v20, %v2521_v8  ;;  %v2592_v19 = vpack.c.bf16 %v2576_v44, %v2576_v44  ;;  %v2546_v23 = vor.u32 1.1754944e-38, %v2545_v55 }
 0x533   :  { %v2722_v36 = vunpack.c.l.b16 %v2589_v3  ;;  %v2478_v49 = vadd.f32 %v6023_v13, %v2477_v17  ;;  %v4184_v17 = vld [vmem:[%s6410_s5 + $0x38] sm:$0xff] }
 0x534   :  { %v6028_v27 = vpop.xlane.xlu2 %2322  ;;  %v2523_v63 = vadd.f32 %v4304_v20, %v2522_v54  ;;  %v2781_v1 = vunpack.c.l.b16 %v2592_v19  ;;  %3248 = vmatpush.bf16.msrb.mxu0 %v4184_v17  ;;  %v4182_v19 = vld [vmem:[%s6410_s5 + $0x28] sm:$0xff] }
 0x535   :  { %4307 = vrcp.f32 %v6028_v27  ;;  %v2723_v4 = vpack.c.b16 %v2722_v36, %v2721_v2  ;;  %v4306_v6 = vpop.eup %4305  ;;  %v2560_v32 = vand.u32 2147483648, %v6028_v27  ;;  %v2558_v21 = vand.u32 2147483647, %v6028_v27 }
 0x536   :  { %v2527_v43 = vsel %vm2526_vm9, %v4304_v20, %v2523_v63  ;;  %v2535_v16 = vmul.f32 %v4306_v6, %v2320_v46  ;;  %vm2540_vm1 = vweird.f32 %v4306_v6  ;;  %v2482_v40 = vsel %vm6047_vm10, %v6023_v13, %v2478_v49 }
 0x537   :  { %3955 = vmatmul.msk.bf16.vlgmr.msra.gmra.mxu0 %vm2178_vm0, %v2723_v4  ;;  %v2532_v25 = vsel %vm2529_vm4, %v2531_v35, %v2527_v43  ;;  %vm2541_vm9 = vmor %vm2539_vm6, %vm2540_vm1  ;;  %vm2544_vm4 = vcmp.eq.f32.partialorder %v2543_v22, 8.507059e+37  ;;  %vm2554_vm8 = vweird.f32 %v6028_v27  ;;  %v2561_v31 = vor.u32 1.1754944e-38, %v2560_v32  ;;  %v4183_v43 = vld [vmem:[%s6410_s5 + $0x30] sm:$0xff]  ;;  %v4189_v22 = vld [vmem:[%s6410_s5 + $0x60] sm:$0xff] }
 0x538   :  { %v2577_v33 = vmul.f32 %v5970_v57, %v2532_v25  ;;  %v2536_v24 = vsub.f32 1.0, %v2535_v16  ;;  %vm2559_vm15 = vcmp.eq.f32.partialorder %v2558_v21, 8.507059e+37  ;;  %vm2484_vm10 = vcmp.eq.f32.partialorder %v2483_v52, 8.507059e+37  ;;  %v4191_v52 = vld [vmem:[%s6410_s5 + $0x70] sm:$0xff]  ;;  %3249 = vmatpush.bf16.msrb.mxu0 %v4183_v43  ;;  %v4190_v25 = vld [vmem:[%s6410_s5 + $0x68] sm:$0xff]  ;;  %v4180_v32 = vld [vmem:[%s6410_s5 + $0x18] sm:$0xff] }
 0x539   :  { %v6036_v37 = vpop.xlane.xlu1 %2310  ;;  %v2487_v3 = vsel %vm2484_vm10, %v2486_v42, %v2482_v40  ;;  %v4199_v16 = vld [vmem:[%s6410_s5 + $0xb0] sm:$0xff]  ;;  %v4204_v21 = vld [vmem:[%s6410_s5 + $0xd8] sm:$0xff]  ;;  %vm6582_vm10 = vcmask 1043458  }
 0x53a   :  { %4309 = vrcp.f32 %v6036_v37  ;;  %v2593_v11 = vpack.c.bf16 %v2577_v33, %v2577_v33  ;;  %v2537_v14 = vmul.f32 %v4306_v6, %v2536_v24  ;;  %v2500_v20 = vand.u32 2147483648, %v6036_v37  ;;  %v4206_v33 = vld [vmem:[%s6410_s5 + $0xe8] sm:$0xff]  ;;  %v4179_v40 = vld [vmem:[%s6410_s5 + $0x10] sm:$0xff] }
 0x53b   :  { %v4308_v39 = vpop.eup %4307  ;;  %v2498_v36 = vand.u32 2147483647, %v6036_v37  ;;  %v2574_v46 = vmul.f32 %v5964_v61, %v2487_v3 }
 0x53c   :  { %v2550_v12 = vmul.f32 %v4308_v39, %v6028_v27  ;;  %vm2555_vm7 = vweird.f32 %v4308_v39  ;;  %v2782_v30 = vunpack.c.l.b16 %v2593_v11  ;;  %v2538_v48 = vadd.f32 %v4306_v6, %v2537_v14  ;;  %3250 = vmatpush.bf16.msrb.mxu0 %v4182_v19  ;;  %v4197_v11 = vld [vmem:[%s6410_s5 + $0xa0] sm:$0xff] }
 0x53d   :  { %vm2556_vm11 = vmor %vm2554_vm8, %vm2555_vm7  ;;  %vm2494_vm7 = vweird.f32 %v6036_v37  ;;  %v2501_v28 = vor.u32 1.1754944e-38, %v2500_v20  ;;  %vm2499_vm6 = vcmp.eq.f32.partialorder %v2498_v36, 8.507059e+37  ;;  %v2590_v26 = vpack.c.bf16 %v2574_v46, %v2574_v46  ;;  %v4205_v14 = vld [vmem:[%s6410_s5 + $0xe0] sm:$0xff] }
 0x53e   :  { %v2551_v56 = vsub.f32 1.0, %v2550_v12  ;;  %v2542_v34 = vsel %vm2541_vm9, %v4306_v6, %v2538_v48  ;;  %v2783_v60 = vpack.c.b16 %v2782_v30, %v2781_v1  ;;  %v4192_v6 = vld [vmem:[%s6410_s5 + $0x78] sm:$0xff]  ;;  %v4198_v12 = vld [vmem:[%s6410_s5 + $0xa8] sm:$0xff]  ;;  %vm6578_vm9 = vcmask 1046528  }
 0x53f   :  { %v2547_v38 = vsel %vm2544_vm4, %v2546_v23, %v2542_v34  ;;  %v2751_v4 = vunpack.c.l.b16 %v2590_v26  ;;  %3266 = vmatpush.bf16.msrb.mxu1 %v4192_v6  ;;  %v4188_v1 = vld [vmem:[%s6410_s5 + $0x58] sm:$0xff]  ;;  %vm6580_vm8 = vcmask 1041408  }
 0x540   :  { %v2552_v47 = vmul.f32 %v4308_v39, %v2551_v56  ;;  %v4310_v41 = vpop.eup %4309  ;;  %v2578_v13 = vmul.f32 %v5975_v58, %v2547_v38  ;;  %3957 = vmatmul.msk.bf16.vlgmr.msrb.gmra.mxu2 %vm2178_vm0, %v2783_v60  ;;  %3251 = vmatpush.bf16.msrb.mxu0 %v4181_v15  ;;  %v4195_v38 = vld [vmem:[%s6410_s5 + $0x90] sm:$0xff] }
 0x541   :  { %v2490_v45 = vmul.f32 %v4310_v41, %v6036_v37  ;;  %vm2495_vm1 = vweird.f32 %v4310_v41  ;;  %v4207_v37 = vld [vmem:[%s6410_s5 + $0xf0] sm:$0xff] }
 0x542   :  { %v2553_v18 = vadd.f32 %v4308_v39, %v2552_v47  ;;  %v2594_v9 = vpack.c.bf16 %v2578_v13, %v2578_v13  ;;  %v4196_v47 = vld [vmem:[%s6410_s5 + $0x98] sm:$0xff] }
 0x543   :  { %v2491_v59 = vsub.f32 1.0, %v2490_v45  ;;  %3267 = vmatpush.bf16.msrb.mxu1 %v4191_v52 }
 0x544   :  { %v2557_v10 = vsel %vm2556_vm11, %v4308_v39, %v2553_v18  ;;  %v2811_v58 = vunpack.c.l.b16 %v2594_v9  ;;  %v4208_v39 = vld [vmem:[%s6410_s5 + $0xf8] sm:$0xff]  ;;  %3252 = vmatpush.bf16.msrb.mxu0 %v4180_v32  ;;  %v4187_v18 = vld [vmem:[%s6410_s5 + $0x50] sm:$0xff]  ;;  %vm6581_vm11 = vcmask 1042433  }
 0x545   :  { %v2562_v51 = vsel %vm2559_vm15, %v2561_v31, %v2557_v10  ;;  %v2492_v53 = vmul.f32 %v4310_v41, %v2491_v59  ;;  %vm2496_vm15 = vmor %vm2494_vm7, %vm2495_vm1  ;;  %3302 = vmatpush.bf16.msra.mxu3 %v4208_v39  ;;  %v4203_v10 = vld [vmem:[%s6410_s5 + $0xd0] sm:$0xff]  ;;  %vm6583_vm1 = vcmask 1044483   ;;  %vm6584_vm7 = vcmask 1045508   ;;  %v4177_v39 = vld [vmem:[%s6410_s5] sm:$0xff] }
 0x546   :  { %v2579_v50 = vmul.f32 %v5977_v62, %v2562_v51 }
 0x547   :  { %v2493_v2 = vadd.f32 %v4310_v41, %v2492_v53  ;;  %3268 = vmatpush.bf16.msrb.mxu1 %v4190_v25 }
 0x548   :  { %v2595_v7 = vpack.c.bf16 %v2579_v50, %v2579_v50  ;;  %3253 = vmatpush.bf16.msrb.mxu0 %v4179_v40 }
 0x549   :  { %v2497_v8 = vsel %vm2496_vm15, %v4310_v41, %v2493_v2  ;;  %3303 = vmatpush.bf16.msra.mxu3 %v4207_v37  ;;  %vm6585_vm15 = vmmov %vm6578_vm9 }
 0x54a   :  { %v2812_v27 = vunpack.c.l.b16 %v2595_v7  ;;  %v2502_v62 = vsel %vm2499_vm6, %v2501_v28, %v2497_v8  ;;  %v4178_v7 = vld [vmem:[%s6410_s5 + $0x8] sm:$0xff]  ;;  %vm6586_vm6 = vcmask 1046533  }
 0x54b   :  { %v2575_v54 = vmul.f32 %v5986_v29, %v2502_v62  ;;  %v4200_v29 = vld [vmem:[%s6410_s5 + $0xb8] sm:$0xff]  ;;  %3269 = vmatpush.bf16.msrb.mxu1 %v4189_v22  ;;  %v4186_v28 = vld [vmem:[%s6410_s5 + $0x48] sm:$0xff]  ;;  %v4201_v22 = vld [vmem:[%s6410_s5 + $0xc0] sm:$0xff] }
 0x54c   :  { %v2813_v5 = vpack.c.b16 %v2812_v27, %v2811_v58  ;;  %3284 = vmatpush.bf16.msra.mxu2 %v4200_v29  ;;  %v4194_v8 = vld [vmem:[%s6410_s5 + $0x88] sm:$0xff]  ;;  %3254 = vmatpush.bf16.msrb.mxu0 %v4178_v7 }
 0x54d   :  { %v2591_v0 = vpack.c.bf16 %v2575_v54, %v2575_v54  ;;  %3304 = vmatpush.bf16.msra.mxu3 %v4206_v33  ;;  %v4193_v33 = vld [vmem:[%s6410_s5 + $0x80] sm:$0xff] }
 0x54e   :  { %3958 = vmatmul.msk.bf16.vlgmr.msrb.gmra.mxu3 %vm2178_vm0, %v2813_v5 }
 0x54f   :  { %v2752_v44 = vunpack.c.l.b16 %v2591_v0  ;;  %3270 = vmatpush.bf16.msrb.mxu1 %v4188_v1  ;;  %v4202_v0 = vld [vmem:[%s6410_s5 + $0xc8] sm:$0xff] }
 0x550   :  { %3285 = vmatpush.bf16.msra.mxu2 %v4199_v16  ;;  %v4185_v16 = vld [vmem:[%s6410_s5 + $0x40] sm:$0xff]  ;;  %3255 = vmatpush.bf16.msrb.mxu0 %v4177_v39 }
 0x551   :  { %v2753_v61 = vpack.c.b16 %v2752_v44, %v2751_v4  ;;  %3305 = vmatpush.bf16.msra.mxu3 %v4205_v14 }
 0x553   :  { %3956 = vmatmul.msk.bf16.vlgmr.msra.gmra.mxu1 %vm2178_vm0, %v2753_v61  ;;  %vm6577_vm0 = vcmask 1044484  }
 0x554   :  { %3286 = vmatpush.bf16.msra.mxu2 %v4198_v12  ;;  %vm6579_vm4 = vmmov %vm6577_vm0  ;;  %3271 = vmatpush.bf16.msrb.mxu1 %v4187_v18 }
 0x555   :  { %v6067_v63 = vpop.f32.mrf.mxu0  ;;  %3306 = vmatpush.bf16.msra.mxu3 %v4204_v21 }
 0x558   :  { %3287 = vmatpush.bf16.msra.mxu2 %v4197_v11  ;;  %3272 = vmatpush.bf16.msrb.mxu1 %v4186_v28 }
 0x559   :  { %3307 = vmatpush.bf16.msra.mxu3 %v4203_v10 }
 0x55c   :  { %3288 = vmatpush.bf16.msra.mxu2 %v4196_v47  ;;  %3273 = vmatpush.bf16.msrb.mxu1 %v4185_v16 }
 0x55d   :  { %v6105_v49 = vpop.f32.mrf.mxu0  ;;  %3308 = vmatpush.bf16.msra.mxu3 %v4202_v0 }
 0x560   :  { %3289 = vmatpush.bf16.msra.mxu2 %v4195_v38 }
 0x561   :  { %3309 = vmatpush.bf16.msra.mxu3 %v4201_v22 }
 0x564   :  { %3290 = vmatpush.bf16.msra.mxu2 %v4194_v8 }
 0x568   :  { %3291 = vmatpush.bf16.msra.mxu2 %v4193_v33 }
 0x570   :  { %v6115_v55 = vpop.f32.mrf.mxu1 }
 0x577   :  { %v2684_v35 = vpop.f32.mrf.mxu2 }
 0x578   :  { %v2855_v57 = vrot.slane %v2684_v35, 7  ;;  %v6167_v50 = vpop.f32.mrf.mxu1 }
 0x57a   :  { %v2867_v48 = vsel %vm963_vm2, %v6067_v63, %v2855_v57  ;;  %v2870_v41 = vsel %vm980_vm3, %v6067_v63, %v2855_v57  ;;  %v2874_v34 = vsel %vm965_vm12, %v6067_v63, %v2855_v57  ;;  %v2878_v31 = vsel %vm982_vm14, %v6067_v63, %v2855_v57 }
 0x57b   :  { %v2882_v13 = vsel %vm6577_vm0, %v6067_v63, %v2855_v57  ;;  %v2886_v51 = vsel %vm986_vm5, %v6067_v63, %v2855_v57  ;;  %v2890_v59 = vsel %vm971_vm13, %v6067_v63, %v2855_v57  ;;  %v2894_v3 = vsel %vm6578_vm9, %v2855_v57, %v6067_v63 }
 0x57c   :  { %vm6587_vm0 = vcmask 1045504   ;;  %vm6588_vm9 = vcmask 1046529  }
 0x57f   :  { %v6117_v56 = vpop.f32.mrf.mxu2 }
 0x580   :  { %v2858_v11 = vrot.slane %v6117_v56, 7 }
 0x584   :  { %v6107_v24 = vpop.f32.mrf.mxu3 }
 0x585   :  { %v2861_v14 = vrot.slane %v6107_v24, 7 }
 0x587   :  { %v2904_v24 = vsel %vm980_vm3, %v6115_v55, %v2861_v14  ;;  %v2924_v7 = vsel %vm971_vm13, %v6115_v55, %v2861_v14 }
 0x58c   :  { %v6151_v45 = vpop.f32.mrf.mxu3 }
 0x5b4   :  { %v2744_v30 = vpop.f32.mrf.mxu0 }
 0x5b5   :  { %v2856_v60 = vrot.slane %v2744_v30, 6  ;;  %v2898_v30 = vsel %vm963_vm2, %v6105_v49, %v2858_v11  ;;  %v2912_v49 = vsel %vm982_vm14, %v6115_v55, %v2861_v14 }
 0x5bc   :  { %v2746_v1 = vpop.f32.mrf.mxu0 }
 0x5bd   :  { %v2859_v56 = vrot.slane %v2746_v1, 6  ;;  %v6604_v1 = vld [vmem:[#allocation4_spill] sm:$0xff] }
 0x5c3   :  { %v2804_v23 = vpop.f32.mrf.mxu2 }
 0x5c4   :  { %v2857_v42 = vrot.slane %v2804_v23, 5 }
 0x5c6   :  { %v2868_v20 = vsel %vm965_vm12, %v2856_v60, %v2857_v42  ;;  %v2871_v9 = vsel %vm982_vm14, %v2856_v60, %v2857_v42  ;;  %v2875_v53 = vsel %vm6579_vm4, %v2856_v60, %v2857_v42  ;;  %v2879_v36 = vsel %vm986_vm5, %v2856_v60, %v2857_v42 }
 0x5c7   :  { %v2869_v46 = vsel %vm6580_vm8, %v2867_v48, %v2868_v20  ;;  %v2872_v2 = vsel %vm6581_vm11, %v2870_v41, %v2871_v9  ;;  %v2876_v58 = vsel %vm6582_vm10, %v2874_v34, %v2875_v53  ;;  %v2880_v27 = vsel %vm6583_vm1, %v2878_v31, %v2879_v36  ;;  %vm6589_vm8 = vmmov %vm6581_vm11 }
 0x5c8   :  { %v2873_v62 = vrot.slane %v2872_v2, 1  ;;  %v2877_v5 = vrot.slane %v2876_v58, 2  ;;  %v2881_v26 = vrot.slane %v2880_v27, 3  ;;  %v2883_v54 = vsel %vm971_vm13, %v2856_v60, %v2857_v42  ;;  %2935 = vst [vmem:[#allocation1] ss:$9 sm:$0xff] %v2869_v46  ;;  %vm6590_vm11 = vmmov %vm6582_vm10 }
 0x5c9   :  { %v2884_v4 = vsel %vm6584_vm7, %v2882_v13, %v2883_v54  ;;  %v2887_v44 = vsel %vm6585_vm15, %v2857_v42, %v2856_v60  ;;  %v2891_v61 = vsel %vm963_vm2, %v2856_v60, %v2857_v42  ;;  %v2895_v63 = vsel %vm980_vm3, %v2856_v60, %v2857_v42  ;;  %vm6591_vm10 = vmmov %vm6585_vm15 }
 0x5ca   :  { %v2885_v17 = vrot.slane %v2884_v4, 4  ;;  %v2888_v6 = vsel %vm6586_vm6, %v2886_v51, %v2887_v44  ;;  %v2892_v29 = vsel %vm6587_vm0, %v2891_v61, %v2890_v59  ;;  %v2896_v35 = vsel %vm6588_vm9, %v2895_v63, %v2894_v3  ;;  %2937 = vst [vmem:[#allocation1 + $0x1] ss:$9 sm:$0xff] %v2873_v62  ;;  %vm6592_vm1 = vmmov %vm6579_vm4 }
 0x5cb   :  { %v2889_v43 = vrot.slane %v2888_v6, 5  ;;  %v2893_v52 = vrot.slane %v2892_v29, 6  ;;  %2939 = vst [vmem:[#allocation1 + $0x2] ss:$9 sm:$0xff] %v2877_v5  ;;  %v2897_v37 = vrot.slane %v2896_v35, 7  ;;  %v2806_v15 = vpop.f32.mrf.mxu2  ;;  %v2908_v48 = vsel %vm965_vm12, %v6115_v55, %v2861_v14 }
 0x5cc   :  { %2941 = vst [vmem:[#allocation1 + $0x3] ss:$9 sm:$0xff] %v2881_v26  ;;  %v2860_v57 = vrot.slane %v2806_v15, 5  ;;  %v2901_v42 = vsel %vm963_vm2, %v6115_v55, %v2861_v14  ;;  %v2916_v38 = vsel %vm6592_vm1, %v6115_v55, %v2861_v14  ;;  %vm6593_vm7 = vcmask 1044483   ;;  %v4210_v26 = vld [vmem:[%s6411_s6 + $0x8] sm:$0xff] }
 0x5cd   :  { %2943 = vst [vmem:[#allocation1 + $0x4] ss:$9 sm:$0xff] %v2885_v17  ;;  %v2920_v51 = vsel %vm986_vm5, %v6115_v55, %v2861_v14  ;;  %vm6595_vm15 = vcmask 1045508   ;;  %vm6597_vm0 = vcmask 1046533   ;;  %vm6598_vm9 = vcmask 1045504   ;;  %3354 = vmatpush.bf16.msra.mxu0 %v4210_v26 }
 0x5ce   :  { %2945 = vst [vmem:[#allocation1 + $0x5] ss:$9 sm:$0xff] %v2889_v43  ;;  %v2899_v34 = vsel %vm965_vm12, %v2859_v56, %v2860_v57  ;;  %v2864_v17 = vrot.slane %v6151_v45, 7  ;;  %v6605_v57 = vld [vmem:[#allocation5_spill] sm:$0xff]  ;;  %vm6625_vm1 = vcmask 254976  }
 0x5cf   :  { %2947 = vst [vmem:[#allocation1 + $0x6] ss:$9 sm:$0xff] %v2893_v52 }
 0x5d0   :  { %v2774_v25 = vpop.f32.mrf.mxu1  ;;  %2949 = vst [vmem:[#allocation1 + $0x7] ss:$9 sm:$0xff] %v2897_v37  ;;  %v2932_v37 = vsel %vm963_vm2, %v6167_v50, %v2864_v17  ;;  %v6603_v50 = vld [vmem:[#allocation3_spill] sm:$0xff] }
 0x5d1   :  { %v2834_v19 = vpop.f32.mrf.mxu3  ;;  %v2862_v32 = vrot.slane %v2774_v25, 6 }
 0x5d2   :  { %v6203_v12 = vrot.slane %v2834_v19, 5 }
 0x5d4   :  { %v2905_v47 = vsel %vm982_vm14, %v2862_v32, %v6203_v12  ;;  %v2909_v21 = vsel %vm6579_vm4, %v2862_v32, %v6203_v12  ;;  %v2913_v40 = vsel %vm986_vm5, %v2862_v32, %v6203_v12  ;;  %v2902_v41 = vsel %vm965_vm12, %v2862_v32, %v6203_v12 }
 0x5d5   :  { %v2906_v23 = vsel %vm6589_vm8, %v2904_v24, %v2905_v47  ;;  %v2917_v18 = vsel %vm971_vm13, %v2862_v32, %v6203_v12  ;;  %v2910_v31 = vsel %vm6590_vm11, %v2908_v48, %v2909_v21  ;;  %v2921_v60 = vsel %vm6591_vm10, %v6203_v12, %v2862_v32  ;;  %vm6599_vm13 = vmmov %vm6591_vm10  ;;  %v6606_v47 = vld [vmem:[#allocation6_spill] sm:$0xff]  ;;  %v6607_v24 = vld [vmem:[#allocation7_spill] sm:$0xff] }
 0x5d6   :  { %v2914_v10 = vsel %vm6593_vm7, %v2912_v49, %v2913_v40  ;;  %v2925_v13 = vsel %vm963_vm2, %v2862_v32, %v6203_v12  ;;  %vm6594_vm14 = vcmask 1041408   ;;  %v2907_v3 = vrot.slane %v2906_v23, 1  ;;  %v6608_v48 = vld [vmem:[#allocation8_spill] sm:$0xff]  ;;  %v4209_v23 = vld [vmem:[%s6411_s6] sm:$0xff] }
 0x5d7   :  { %v2903_v59 = vsel %vm6594_vm14, %v2901_v42, %v2902_v41  ;;  %v2918_v20 = vsel %vm6595_vm15, %v2916_v38, %v2917_v18  ;;  %v2950_v9 = vld [vmem:[#allocation1] sm:$0xff]  ;;  %v2951_v53 = vld [vmem:[#allocation1 + $0x9] sm:$0xff]  ;;  %v2952_v36 = vld [vmem:[#allocation1 + $0x12] sm:$0xff]  ;;  %v2911_v2 = vrot.slane %v2910_v31, 2  ;;  %v2922_v58 = vsel %vm6597_vm0, %v2920_v51, %v2921_v60  ;;  %3355 = vmatpush.bf16.msra.mxu0 %v4209_v23 }
 0x5d8   :  { %vm6596_vm6 = vmmov %vm6594_vm14  ;;  %v2953_v27 = vld [vmem:[#allocation1 + $0x1b] sm:$0xff]  ;;  %v2915_v28 = vrot.slane %v2914_v10, 3  ;;  %v2926_v8 = vsel %vm6598_vm9, %v2925_v13, %v2924_v7  ;;  %v2919_v62 = vrot.slane %v2918_v20, 4  ;;  %v2923_v5 = vrot.slane %v2922_v58, 5  ;;  %v2776_v44 = vpop.f32.mrf.mxu1 }
 0x5d9   :  { %v2900_v46 = vsel %vm6596_vm6, %v2898_v30, %v2899_v34  ;;  %2955 = vst [vmem:[#allocation1 + $0x1] ss:$9 sm:$0xff] %v2903_v59  ;;  %v2927_v54 = vrot.slane %v2926_v8, 6  ;;  %v2836_v0 = vpop.f32.mrf.mxu3  ;;  %v2929_v4 = vsel %vm980_vm3, %v2862_v32, %v6203_v12  ;;  %v2928_v63 = vsel %vm6599_vm13, %v2861_v14, %v6115_v55  ;;  %vm6601_vm3 = vmmov %vm6596_vm6  ;;  %v6602_v32 = vld [vmem:[#allocation2_spill] sm:$0xff]  ;;  %v6609_v41 = vld [vmem:[#allocation9_spill] sm:$0xff] }
 0x5da   :  { %2954 = vst [vmem:[#allocation1] ss:$9 sm:$0xff] %v2900_v46  ;;  %v2866_v61 = vrot.slane %v2836_v0, 5  ;;  %vm6600_vm5 = vcmask 1046529   ;;  %v2865_v29 = vrot.slane %v2776_v44, 6  ;;  %vm6611_vm2 = vcmask 261120   ;;  %vm6629_vm15 = vmmov %vm6625_vm1 }
 0x5db   :  { %2956 = vst [vmem:[#allocation1 + $0x2] ss:$9 sm:$0xff] %v2907_v3  ;;  %v2930_v6 = vsel %vm6600_vm5, %v2929_v4, %v2928_v63  ;;  %v3371_v34 = vld [vmem:[%s6413_s8] sm:$0x3]  ;;  %vm6612_vm4 = vmmov %vm6611_vm2  ;;  %vm3376_vm8 = vcmask 31744  }
 0x5dc   :  { %2957 = vst [vmem:[#allocation1 + $0x3] ss:$9 sm:$0xff] %v2911_v2  ;;  %v2933_v35 = vsel %vm965_vm12, %v2865_v29, %v2866_v61  ;;  %v2931_v39 = vrot.slane %v2930_v6, 7  ;;  %vm6610_vm12 = vmmov %vm6601_vm3  ;;  %v4231_v61 = vld [vmem:[%s6412_s7] ss:$0 sm:$0xff] }
 0x5dd   :  { %2958 = vst [vmem:[#allocation1 + $0x4] ss:$9 sm:$0xff] %v2915_v28  ;;  %v2934_v55 = vsel %vm6601_vm3, %v2932_v37, %v2933_v35  ;;  %v3384_v42 = vsel %vm6610_vm12, %v3371_v34, 0  ;;  %vm6623_vm11 = vmmov %vm6611_vm2 }
 0x5de   :  { %2959 = vst [vmem:[#allocation1 + $0x5] ss:$9 sm:$0xff] %v2919_v62  ;;  %3393 = vmatpush.bf16.msra.mxu1 %v3384_v42  ;;  %vm6624_vm10 = vmmov %vm6611_vm2 }
 0x5df   :  { %2960 = vst [vmem:[#allocation1 + $0x6] ss:$9 sm:$0xff] %v2923_v5  ;;  %vm6627_vm7 = vmmov %vm6611_vm2 }
 0x5e0   :  { %2961 = vst [vmem:[#allocation1 + $0x7] ss:$9 sm:$0xff] %v2927_v54  ;;  %vm6628_vm14 = vmmov %vm6611_vm2 }
 0x5e7   :  { %v2962_v43 = vld [vmem:[#allocation1] sm:$0xff]  ;;  %v2963_v52 = vld [vmem:[#allocation1 + $0x9] sm:$0xff]  ;;  %v2964_v16 = vld [vmem:[#allocation1 + $0x12] sm:$0xff] }
 0x5e8   :  { %v2984_v19 = vpack.c.bf16 %v2962_v43, %v2950_v9  ;;  %v2985_v25 = vpack.c.bf16 %v2963_v52, %v2951_v53  ;;  %v2986_v12 = vpack.c.bf16 %v2964_v16, %v2952_v36  ;;  %v2965_v33 = vld [vmem:[#allocation1 + $0x1b] sm:$0xff] }
 0x5e9   :  { %v2987_v15 = vpack.c.bf16 %v2965_v33, %v2953_v27  ;;  %2966 = vst [vmem:[#allocation1] ss:$9 sm:$0xff] %v2931_v39  ;;  %v6614_v33 = vld [vmem:[#allocation10_spill] sm:$0xff] }
 0x5ea   :  { %3256 = vmatmul.bf16.vlgmr.msrb.gmra.mxu0 %v2984_v19  ;;  %3274 = vmatmul.bf16.vlgmr.msrb.gmra.mxu1 %v2985_v25  ;;  %2967 = vst [vmem:[#allocation1 + $0x1] ss:$9 sm:$0xff] %v2934_v55  ;;  %v6615_v55 = vld [vmem:[#allocation12_spill] sm:$0xff] }
 0x5eb   :  { %3292 = vmatmul.bf16.vlgmr.msra.gmra.mxu2 %v2986_v12  ;;  %3310 = vmatmul.bf16.vlgmr.msra.gmra.mxu3 %v2987_v15  ;;  %v6613_v12 = vld [vmem:[#allocation11_spill] sm:$0xff]  ;;  %v6616_v15 = vld [vmem:[#allocation13_spill] sm:$0xff] }
 0x5f1   :  { %v2968_v45 = vld [vmem:[#allocation1] sm:$0xff]  ;;  %v2969_v22 = vld [vmem:[#allocation1 + $0x9] sm:$0xff]  ;;  %v2970_v11 = vld [vmem:[#allocation1 + $0x12] sm:$0xff] }
 0x5f2   :  { %v2971_v14 = vld [vmem:[#allocation1 + $0x1b] sm:$0xff]  ;;  %v2988_v21 = vpack.c.bf16 %v2968_v45, %v2968_v45  ;;  %v2989_v30 = vpack.c.bf16 %v2969_v22, %v2969_v22  ;;  %v2990_v56 = vpack.c.bf16 %v2970_v11, %v2970_v11  ;;  %v6617_v45 = vld [vmem:[#allocation14_spill] sm:$0xff]  ;;  %v6618_v22 = vld [vmem:[#allocation15_spill] sm:$0xff] }
 0x5f3   :  { %3407 = vst [vmem:[#allocation1] ss:$9 sm:$0xff] %v6602_v32  ;;  %v2991_v40 = vpack.c.bf16 %v2971_v14, %v2971_v14  ;;  %v6619_v11 = vld [vmem:[#allocation16_spill] sm:$0xff]  ;;  %v6620_v14 = vld [vmem:[#allocation17_spill] sm:$0xff] }
 0x5f4   :  { %3409 = vst [vmem:[#allocation1 + $0x1] ss:$9 sm:$0xff] %v6603_v50  ;;  %v6621_v50 = vld [vmem:[#allocation18_spill] sm:$0xff] }
 0x5f5   :  { %3411 = vst [vmem:[#allocation1 + $0x2] ss:$9 sm:$0xff] %v6604_v1  ;;  %v6622_v1 = vld [vmem:[#allocation19_spill] sm:$0xff] }
 0x5f6   :  { %3413 = vst [vmem:[#allocation1 + $0x3] ss:$9 sm:$0xff] %v6605_v57  ;;  %v4232_v57 = vld [vmem:[%s6414_s9] ss:$0 sm:$0xff] }
 0x5f7   :  { %3415 = vst [vmem:[#allocation1 + $0x4] ss:$9 sm:$0xff] %v6606_v47 }
 0x5f8   :  { %3417 = vst [vmem:[#allocation1 + $0x5] ss:$9 sm:$0xff] %v6607_v24 }
 0x5f9   :  { %3419 = vst [vmem:[#allocation1 + $0x6] ss:$9 sm:$0xff] %v6608_v48 }
 0x5fa   :  { %3261 = vmatmul.bf16.gmra.mxu0 %v2988_v21  ;;  %3279 = vmatmul.bf16.gmra.mxu1 %v2989_v30  ;;  %3421 = vst [vmem:[#allocation1 + $0x7] ss:$9 sm:$0xff] %v6609_v41 }
 0x5fb   :  { %3297 = vmatmul.bf16.gmra.mxu2 %v2990_v56  ;;  %3315 = vmatmul.bf16.gmra.mxu3 %v2991_v40 }
 0x601   :  { %v3422_v25 = vld [vmem:[#allocation1] sm:$0xff] }
 0x602   :  { %3423 = vst [vmem:[#allocation1] ss:$9 sm:$0xff] %v6613_v12 }
 0x603   :  { %3424 = vst [vmem:[#allocation1 + $0x1] ss:$9 sm:$0xff] %v6614_v33 }
 0x604   :  { %3425 = vst [vmem:[#allocation1 + $0x2] ss:$9 sm:$0xff] %v6615_v55 }
 0x605   :  { %3426 = vst [vmem:[#allocation1 + $0x3] ss:$9 sm:$0xff] %v6616_v15 }
 0x606   :  { %3427 = vst [vmem:[#allocation1 + $0x4] ss:$9 sm:$0xff] %v6617_v45 }
 0x607   :  { %3428 = vst [vmem:[#allocation1 + $0x5] ss:$9 sm:$0xff] %v6618_v22  ;;  %v4233_v22 = vld [vmem:[%s6415_s10] ss:$0 sm:$0xff] }
 0x608   :  { %3429 = vst [vmem:[#allocation1 + $0x6] ss:$9 sm:$0xff] %v6619_v11 }
 0x609   :  { %3430 = vst [vmem:[#allocation1 + $0x7] ss:$9 sm:$0xff] %v6620_v14 }
 0x610   :  { %v3431_v32 = vld [vmem:[#allocation1] sm:$0xff] }
 0x611   :  { %3432 = vst [vmem:[#allocation1] ss:$9 sm:$0xff] %v6621_v50 }
 0x612   :  { %3433 = vst [vmem:[#allocation1 + $0x1] ss:$9 sm:$0xff] %v6622_v1 }
 0x667   :  { %v3257_v18 = vpop.f32.mrf.mxu0  ;;  %v3275_v49 = vpop.f32.mrf.mxu1 }
 0x668   :  { %v3276_v13 = vadd.f32 %v3275_v49, %v3257_v18 }
 0x66e   :  { %v3293_v31 = vpop.f32.mrf.mxu2  ;;  %v3311_v60 = vpop.f32.mrf.mxu3 }
 0x66f   :  { %v3259_v38 = vpop.f32.mrf.mxu0  ;;  %v3277_v10 = vpop.f32.mrf.mxu1  ;;  %v3294_v51 = vadd.f32 %v3293_v31, %v3276_v13  ;;  %v3434_v31 = vld [vmem:[#allocation1] sm:$0xff] }
 0x670   :  { %v3278_v59 = vadd.f32 %v3277_v10, %v3259_v38 }
 0x671   :  { %v3312_v7 = vadd.f32 %v3311_v60, %v3294_v51  ;;  %v6626_v51 = vld [vmem:[#allocation20_spill] sm:$0xff] }
 0x676   :  { %v3295_v3 = vpop.f32.mrf.mxu2  ;;  %v3313_v20 = vpop.f32.mrf.mxu3 }
 0x677   :  { %v3296_v9 = vadd.f32 %v3295_v3, %v3278_v59  ;;  %v3262_v53 = vpop.f32.mrf.mxu0  ;;  %v3280_v36 = vpop.f32.mrf.mxu1 }
 0x678   :  { %v3281_v62 = vadd.f32 %v3280_v36, %v3262_v53 }
 0x679   :  { %v3314_v46 = vadd.f32 %v3313_v20, %v3296_v9 }
 0x67b   :  { %v3320_v2 = vpack.c.bf16 %v3314_v46, %v3312_v7 }
 0x67d   :  { %4095 = vmatmul.msk.bf16.vlgmr.msra.gmra.mxu0 %vm6611_vm2, %v3320_v2 }
 0x67e   :  { %v3298_v58 = vpop.f32.mrf.mxu2  ;;  %v3316_v27 = vpop.f32.mrf.mxu3 }
 0x67f   :  { %v3264_v28 = vpop.f32.mrf.mxu0  ;;  %v3282_v8 = vpop.f32.mrf.mxu1  ;;  %v3299_v5 = vadd.f32 %v3298_v58, %v3281_v62 }
 0x681   :  { %v3317_v0 = vadd.f32 %v3316_v27, %v3299_v5 }
 0x683   :  { %v3321_v4 = vpack.c.bf16 %v3317_v0, %v3317_v0 }
 0x686   :  { %v3300_v26 = vpop.f32.mrf.mxu2  ;;  %v3318_v54 = vpop.f32.mrf.mxu3 }
 0x68d   :  { %4096 = vmatmul.msk.bf16.gmra.mxu0 %vm6612_vm4, %v3321_v4  ;;  %v4211_v4 = vld [vmem:[%s6418_s12] sm:$0xff] }
 0x6fa   :  { %v3357_v44 = vpop.f32.mrf.mxu0 }
 0x6fb   :  { %v3358_v63 = vadd.f32 %v4231_v61, %v3357_v44 }
 0x6fd   :  { %v3366_v29 = vmax.f32 %v3358_v63, 0.0 }
 0x702   :  { %v3359_v17 = vpop.f32.mrf.mxu0 }
 0x703   :  { %v3360_v6 = vadd.f32 %v4231_v61, %v3359_v17 }
 0x705   :  { %v3367_v35 = vmax.f32 %v3360_v6, 0.0 }
 0x707   :  { %v3369_v39 = vpack.c.bf16 %v3367_v35, %v3366_v29 }
 0x709   :  { %4097 = vmatmul.msk.bf16.vlgmr.msra.gmra.mxu1 %vm3376_vm8, %v3369_v39 }
 0x70a   :  { %v3362_v43 = vpop.f32.mrf.mxu0 }
 0x70b   :  { %v3363_v52 = vadd.f32 %v4231_v61, %v3362_v43 }
 0x70d   :  { %v3368_v37 = vmax.f32 %v3363_v52, 0.0 }
 0x70f   :  { %v3370_v19 = vpack.c.bf16 %v3368_v37, %v3368_v37 }
 0x712   :  { %v3364_v16 = vpop.f32.mrf.mxu0 }
 0x719   :  { %4098 = vmatmul.msk.bf16.gmra.mxu1 %vm3376_vm8, %v3370_v19 }
 0x786   :  { %v3395_v47 = vpop.f32.mrf.mxu1 }
 0x787   :  { %v3396_v21 = vadd.f32 %v4232_v57, %v3395_v47 }
 0x789   :  { %v3404_v30 = vadd.f32 %v3396_v21, %v3312_v7 }
 0x78b   :  { %v6300_v24 = vadd.f32 %v3422_v25, %v3404_v30 }
 0x78d   :  { %v3443_v56 = vsel %vm6623_vm11, %v6300_v24, 0.0  ;;  %vm6630_vm11 = vmmov %vm6627_vm7 }
 0x78e   :  { %v3397_v40 = vpop.f32.mrf.mxu1  ;;  %3444 = vadd.xlane.f32.xlu2 %v3443_v56 }
 0x78f   :  { %v3398_v48 = vadd.f32 %v4232_v57, %v3397_v40 }
 0x791   :  { %v3405_v41 = vadd.f32 %v3398_v48, %v3314_v46 }
 0x793   :  { %v6304_v23 = vadd.f32 %v3431_v32, %v3405_v41 }
 0x795   :  { %v3446_v18 = vsel %vm6624_vm10, %v6304_v23, 0.0  ;;  %vm6631_vm10 = vmmov %vm6627_vm7 }
 0x796   :  { %v3400_v49 = vpop.f32.mrf.mxu1  ;;  %3447 = vadd.xlane.f32.xlu0 %v3446_v18 }
 0x797   :  { %v3401_v34 = vadd.f32 %v4232_v57, %v3400_v49  ;;  %v4234_v57 = vld [vmem:[%s6416_s11] ss:$0 sm:$0xff] }
 0x799   :  { %v3406_v60 = vadd.f32 %v3401_v34, %v3317_v0  ;;  %v4212_v0 = vld [vmem:[%s6418_s12 + $0x8] sm:$0xff] }
 0x79a   :  { %3555 = vmatpush.bf16.msrb.mxu2 %v4212_v0 }
 0x79b   :  { %v6308_v42 = vadd.f32 %v3434_v31, %v3406_v60 }
 0x79d   :  { %v3449_v38 = vsel %vm6625_vm1, %v6308_v42, 0.0  ;;  %vm6632_vm1 = vcmask 1041408  }
 0x79e   :  { %v3402_v10 = vpop.f32.mrf.mxu1  ;;  %3450 = vadd.xlane.f32.xlu1 %v3449_v38  ;;  %3556 = vmatpush.bf16.msrb.mxu2 %v4211_v4 }
 0x801   :  { %v3445_v13 = vpop.xlane.xlu2 %3444 }
 0x802   :  { %v3452_v59 = vmul.f32 %v3445_v13, %v6626_v51  ;;  %v4220_v13 = vld [vmem:[%s6420_s14 + $0x38] sm:$0xff] }
 0x803   :  { %3664 = vmatpush.bf16.msrb.mxu3 %v4220_v13 }
 0x804   :  { %v3455_v3 = vsub.f32 %v6300_v24, %v3452_v59 }
 0x806   :  { %v3458_v20 = vmul.f32 %v3455_v3, %v3455_v3 }
 0x808   :  { %v3461_v9 = vsel %vm6627_vm7, %v3458_v20, 0.0  ;;  %v4219_v20 = vld [vmem:[%s6420_s14 + $0x30] sm:$0xff] }
 0x809   :  { %v3448_v53 = vpop.xlane.xlu0 %3447  ;;  %3462 = vadd.xlane.f32.xlu2 %v3461_v9  ;;  %3665 = vmatpush.bf16.msrb.mxu3 %v4219_v20 }
 0x80a   :  { %v3453_v36 = vmul.f32 %v3448_v53, %v6626_v51  ;;  %v4218_v53 = vld [vmem:[%s6420_s14 + $0x28] sm:$0xff] }
 0x80c   :  { %v3456_v7 = vsub.f32 %v6304_v23, %v3453_v36 }
 0x80d   :  { %3666 = vmatpush.bf16.msrb.mxu3 %v4218_v53 }
 0x80e   :  { %v3459_v46 = vmul.f32 %v3456_v7, %v3456_v7 }
 0x810   :  { %v3464_v2 = vsel %vm6628_vm14, %v3459_v46, 0.0  ;;  %v4217_v46 = vld [vmem:[%s6420_s14 + $0x20] sm:$0xff]  ;;  %vm6633_vm14 = vmmov %vm6627_vm7 }
 0x811   :  { %v3451_v58 = vpop.xlane.xlu1 %3450  ;;  %3465 = vadd.xlane.f32.xlu0 %v3464_v2  ;;  %3667 = vmatpush.bf16.msrb.mxu3 %v4217_v46 }
 0x812   :  { %v3454_v27 = vmul.f32 %v3451_v58, %v6626_v51 }
 0x814   :  { %v3457_v28 = vsub.f32 %v6308_v42, %v3454_v27 }
 0x816   :  { %v3460_v8 = vmul.f32 %v3457_v28, %v3457_v28 }
 0x818   :  { %v3467_v62 = vsel %vm6629_vm15, %v3460_v8, 0.0  ;;  %vm3823_vm15 = vcmask 253952  }
 0x819   :  { %3468 = vadd.xlane.f32.xlu1 %v3467_v62  ;;  %v4216_v62 = vld [vmem:[%s6420_s14 + $0x18] sm:$0xff] }
 0x81a   :  { %3668 = vmatpush.bf16.msrb.mxu3 %v4216_v62 }
 0x87c   :  { %v3463_v5 = vpop.xlane.xlu2 %3462 }
 0x87d   :  { %v3470_v26 = vmul.f32 %v3463_v5, %v6626_v51 }
 0x87f   :  { %v3473_v54 = vadd.f32 1e-06, %v3470_v26 }
 0x881   :  { %4311 = vrsqrt.f32 %v3473_v54  ;;  %vm3482_vm0 = vweird.f32 %v3473_v54 }
 0x884   :  { %v3466_v44 = vpop.xlane.xlu0 %3465 }
 0x885   :  { %v3471_v61 = vmul.f32 %v3466_v44, %v6626_v51 }
 0x887   :  { %v4312_v63 = vpop.eup %4311  ;;  %v3474_v17 = vadd.f32 1e-06, %v3471_v61 }
 0x888   :  { %v3477_v6 = vmul.f32 %v4312_v63, %v3473_v54  ;;  %vm3483_vm6 = vweird.f32 %v4312_v63  ;;  %v4215_v54 = vld [vmem:[%s6420_s14 + $0x10] sm:$0xff] }
 0x889   :  { %4313 = vrsqrt.f32 %v3474_v17  ;;  %vm3484_vm9 = vmor %vm3482_vm0, %vm3483_vm6  ;;  %vm3492_vm5 = vweird.f32 %v3474_v17  ;;  %3669 = vmatpush.bf16.msrb.mxu3 %v4215_v54 }
 0x88a   :  { %v3478_v29 = vmul.f32 %v4312_v63, %v3477_v6  ;;  %v4222_v6 = vld [vmem:[%s6421_s16 + $0x8] sm:$0xff]  ;;  %vm6635_vm6 = vmmov %vm6627_vm7 }
 0x88b   :  { %3716 = vmatpush.bf16.msrb.mxu0 %v4222_v6 }
 0x88c   :  { %v3479_v35 = vmul.f32 0.5, %v3478_v29  ;;  %v3469_v39 = vpop.xlane.xlu1 %3468 }
 0x88d   :  { %v3472_v43 = vmul.f32 %v3469_v39, %v6626_v51  ;;  %v4235_v51 = vld [vmem:[%s6417_s13] ss:$0 sm:$0xff] }
 0x88e   :  { %v3480_v52 = vsub.f32 1.5, %v3479_v35 }
 0x88f   :  { %v4314_v16 = vpop.eup %4313  ;;  %v3475_v37 = vadd.f32 1e-06, %v3472_v43  ;;  %v4213_v43 = vld [vmem:[%s6420_s14] sm:$0xff] }
 0x890   :  { %v3481_v19 = vmul.f32 %v4312_v63, %v3480_v52  ;;  %v3487_v25 = vmul.f32 %v4314_v16, %v3474_v17  ;;  %vm3493_vm13 = vweird.f32 %v4314_v16  ;;  %v4214_v17 = vld [vmem:[%s6420_s14 + $0x8] sm:$0xff] }
 0x891   :  { %4315 = vrsqrt.f32 %v3475_v37  ;;  %vm3494_vm3 = vmor %vm3492_vm5, %vm3493_vm13  ;;  %vm3502_vm2 = vweird.f32 %v3475_v37  ;;  %3670 = vmatpush.bf16.msrb.mxu3 %v4214_v17 }
 0x892   :  { %v3488_v12 = vmul.f32 %v4314_v16, %v3487_v25  ;;  %v3485_v33 = vsel %vm3484_vm9, %v4312_v63, %v3481_v19 }
 0x893   :  { %v3506_v11 = vmul.f32 %v3485_v33, %v3455_v3 }
 0x894   :  { %v3489_v55 = vmul.f32 0.5, %v3488_v12 }
 0x895   :  { %v3512_v47 = vmul.f32 %v4233_v22, %v3506_v11  ;;  %3671 = vmatpush.bf16.msrb.mxu3 %v4213_v43 }
 0x896   :  { %v3490_v15 = vsub.f32 1.5, %v3489_v55 }
 0x897   :  { %v4316_v45 = vpop.eup %4315  ;;  %v3518_v48 = vadd.f32 %v4234_v57, %v3512_v47  ;;  %v3733_v47 = vld [vmem:[%s6423_s18] sm:$0x3] }
 0x898   :  { %v3491_v14 = vmul.f32 %v4314_v16, %v3490_v15  ;;  %v3497_v32 = vmul.f32 %v4316_v45, %v3475_v37  ;;  %vm3503_vm12 = vweird.f32 %v4316_v45 }
 0x899   :  { %vm3504_vm4 = vmor %vm3502_vm2, %vm3503_vm12 }
 0x89a   :  { %v3495_v50 = vsel %vm3494_vm3, %v4314_v16, %v3491_v14  ;;  %v3498_v1 = vmul.f32 %v4316_v45, %v3497_v32 }
 0x89b   :  { %v3507_v21 = vmul.f32 %v3495_v50, %v3456_v7 }
 0x89c   :  { %v3499_v30 = vmul.f32 0.5, %v3498_v1 }
 0x89d   :  { %v3513_v56 = vmul.f32 %v4233_v22, %v3507_v21  ;;  %v3745_v21 = vsel %vm6632_vm1, %v3733_v47, 0 }
 0x89e   :  { %v3500_v40 = vsub.f32 1.5, %v3499_v30  ;;  %3754 = vmatpush.bf16.msrb.mxu1 %v3745_v21 }
 0x89f   :  { %v3519_v41 = vadd.f32 %v4234_v57, %v3513_v56  ;;  %v4236_v56 = vld [vmem:[%s6419_s15] ss:$0 sm:$0xff] }
 0x8a0   :  { %v3501_v18 = vmul.f32 %v4316_v45, %v3500_v40 }
 0x8a1   :  { %v3521_v49 = vpack.c.bf16 %v3519_v41, %v3518_v48 }
 0x8a2   :  { %v3505_v34 = vsel %vm3504_vm4, %v4316_v45, %v3501_v18 }
 0x8a3   :  { %4107 = vmatmul.msk.bf16.vlgmr.msrb.gmra.mxu2 %vm6630_vm11, %v3521_v49  ;;  %v3508_v31 = vmul.f32 %v3505_v34, %v3457_v28 }
 0x8a5   :  { %v3514_v60 = vmul.f32 %v4233_v22, %v3508_v31 }
 0x8a7   :  { %v3520_v38 = vadd.f32 %v4234_v57, %v3514_v60  ;;  %v4221_v57 = vld [vmem:[%s6421_s16] sm:$0xff] }
 0x8a8   :  { %3717 = vmatpush.bf16.msrb.mxu0 %v4221_v57 }
 0x8a9   :  { %v3522_v10 = vpack.c.bf16 %v3520_v38, %v3520_v38 }
 0x8b3   :  { %4108 = vmatmul.msk.bf16.gmra.mxu2 %vm6631_vm10, %v3522_v10  ;;  %v4237_v10 = vld [vmem:[%s6422_s17] ss:$0 sm:$0xff] }
 0x926   :  { %v3558_v59 = vpop.f32.mrf.mxu2 }
 0x927   :  { %v3559_v3 = vadd.f32 %v4235_v51, %v3558_v59 }
 0x929   :  { %v3567_v9 = vmul.f32 %v3559_v3, %v3559_v3 }
 0x92b   :  { %v3570_v36 = vmul.f32 %v3567_v9, %v3559_v3 }
 0x92d   :  { %v3573_v7 = vmul.f32 0.044715, %v3570_v36 }
 0x92e   :  { %v3560_v2 = vpop.f32.mrf.mxu2 }
 0x92f   :  { %v3576_v58 = vadd.f32 %v3573_v7, %v3559_v3  ;;  %v3561_v27 = vadd.f32 %v4235_v51, %v3560_v2 }
 0x931   :  { %v3579_v28 = vmul.f32 0.7978846, %v3576_v58  ;;  %v3568_v8 = vmul.f32 %v3561_v27, %v3561_v27  ;;  %v4238_v58 = vld [vmem:[%s6424_s19] ss:$0 sm:$0xff] }
 0x933   :  { %v3571_v5 = vmul.f32 %v3568_v8, %v3561_v27  ;;  %4317 = vtanh.f32 %v3579_v28 }
 0x935   :  { %v3574_v26 = vmul.f32 0.044715, %v3571_v5 }
 0x936   :  { %v3563_v0 = vpop.f32.mrf.mxu2 }
 0x937   :  { %v3577_v4 = vadd.f32 %v3574_v26, %v3561_v27  ;;  %v3564_v44 = vadd.f32 %v4235_v51, %v3563_v0 }
 0x939   :  { %v3580_v61 = vmul.f32 0.7978846, %v3577_v4  ;;  %v3569_v63 = vmul.f32 %v3564_v44, %v3564_v44  ;;  %v4318_v29 = vpop.eup %4317 }
 0x93a   :  { %v3585_v52 = vadd.f32 1.0, %v4318_v29 }
 0x93b   :  { %4319 = vtanh.f32 %v3580_v61  ;;  %v3572_v35 = vmul.f32 %v3569_v63, %v3564_v44 }
 0x93c   :  { %v3588_v12 = vmul.f32 0.5, %v3585_v52 }
 0x93d   :  { %v3575_v39 = vmul.f32 0.044715, %v3572_v35 }
 0x93e   :  { %v3565_v16 = vpop.f32.mrf.mxu2  ;;  %v3591_v15 = vmul.f32 %v3588_v12, %v3559_v3 }
 0x93f   :  { %v3578_v37 = vadd.f32 %v3575_v39, %v3564_v44 }
 0x941   :  { %v4320_v19 = vpop.eup %4319  ;;  %v3581_v25 = vmul.f32 0.7978846, %v3578_v37 }
 0x942   :  { %v3586_v33 = vadd.f32 1.0, %v4320_v19 }
 0x943   :  { %4321 = vtanh.f32 %v3581_v25 }
 0x944   :  { %v3589_v55 = vmul.f32 0.5, %v3586_v33 }
 0x946   :  { %v3592_v45 = vmul.f32 %v3589_v55, %v3561_v27 }
 0x948   :  { %v3594_v22 = vpack.c.bf16 %v3592_v45, %v3591_v15 }
 0x949   :  { %v4322_v11 = vpop.eup %4321 }
 0x94a   :  { %3672 = vmatmul.bf16.vlgmr.msrb.gmra.mxu3 %v3594_v22  ;;  %v3587_v14 = vadd.f32 1.0, %v4322_v11 }
 0x94c   :  { %v3590_v32 = vmul.f32 0.5, %v3587_v14 }
 0x94e   :  { %v3593_v50 = vmul.f32 %v3590_v32, %v3564_v44 }
 0x950   :  { %v3595_v1 = vpack.c.bf16 %v3593_v50, %v3593_v50 }
 0x95a   :  { %3677 = vmatmul.bf16.gmra.mxu3 %v3595_v1 }
 0x9cd   :  { %v3673_v30 = vpop.f32.mrf.mxu3 }
 0x9ce   :  { %v3674_v48 = vadd.f32 %v4236_v56, %v3673_v30 }
 0x9d5   :  { %v3675_v40 = vpop.f32.mrf.mxu3 }
 0x9d6   :  { %v3676_v41 = vadd.f32 %v4236_v56, %v3675_v40 }
 0x9d8   :  { %v3682_v18 = vpack.c.bf16 %v3676_v41, %v3674_v48 }
 0x9da   :  { %4149 = vmatmul.msk.bf16.vlgmr.msrb.gmra.mxu0 %vm6627_vm7, %v3682_v18 }
 0x9dd   :  { %v3678_v49 = vpop.f32.mrf.mxu3 }
 0x9de   :  { %v3679_v34 = vadd.f32 %v4236_v56, %v3678_v49 }
 0x9e0   :  { %v3683_v60 = vpack.c.bf16 %v3679_v34, %v3679_v34 }
 0x9e5   :  { %v3680_v31 = vpop.f32.mrf.mxu3 }
 0x9ea   :  { %4150 = vmatmul.msk.bf16.gmra.mxu0 %vm6633_vm14, %v3683_v60 }
 0xa57   :  { %v3719_v38 = vpop.f32.mrf.mxu0 }
 0xa58   :  { %v3720_v13 = vadd.f32 %v4237_v10, %v3719_v38 }
 0xa5a   :  { %v3728_v3 = vmax.f32 %v3720_v13, 0.0 }
 0xa5f   :  { %v3721_v51 = vpop.f32.mrf.mxu0 }
 0xa60   :  { %v3722_v59 = vadd.f32 %v4237_v10, %v3721_v51 }
 0xa62   :  { %v3729_v20 = vmax.f32 %v3722_v59, 0.0 }
 0xa64   :  { %v3731_v9 = vpack.c.bf16 %v3729_v20, %v3728_v3 }
 0xa66   :  { %4151 = vmatmul.msk.bf16.vlgmr.msrb.gmra.mxu1 %vm3376_vm8, %v3731_v9 }
 0xa67   :  { %v3724_v53 = vpop.f32.mrf.mxu0 }
 0xa68   :  { %v3725_v36 = vadd.f32 %v4237_v10, %v3724_v53 }
 0xa6a   :  { %v3730_v46 = vmax.f32 %v3725_v36, 0.0 }
 0xa6c   :  { %v3732_v2 = vpack.c.bf16 %v3730_v46, %v3730_v46 }
 0xa6f   :  { %v3726_v7 = vpop.f32.mrf.mxu0 }
 0xa76   :  { %4152 = vmatmul.msk.bf16.gmra.mxu1 %vm3376_vm8, %v3732_v2  ;;  %vm6634_vm8 = vmmov %vm6627_vm7 }
 0xae3   :  { %v3756_v27 = vpop.f32.mrf.mxu1 }
 0xae4   :  { %v3757_v28 = vadd.f32 %v4238_v58, %v3756_v27 }
 0xae6   :  { %v3765_v8 = vadd.f32 %v3757_v28, %v3674_v48 }
 0xae8   :  { %v3768_v62 = vadd.f32 %v3765_v8, %v6300_v24 }
 0xaea   :  { %v3774_v5 = vrot.slane %v3768_v62, 1  ;;  %v3775_v26 = vrot.slane %v3768_v62, 2  ;;  %v3776_v54 = vrot.slane %v3768_v62, 3  ;;  %3789 = vst [vmem:[#allocation1] ss:$9 sm:$0xff] %v3768_v62  ;;  %v3777_v0 = vrot.slane %v3768_v62, 4 }
 0xaeb   :  { %v3758_v4 = vpop.f32.mrf.mxu1  ;;  %v3778_v44 = vrot.slane %v3768_v62, 5  ;;  %v3779_v61 = vrot.slane %v3768_v62, 6  ;;  %v3780_v63 = vrot.slane %v3768_v62, 7 }
 0xaec   :  { %3791 = vst [vmem:[#allocation1 + $0x1] ss:$9 sm:$0xff] %v3774_v5  ;;  %v3759_v17 = vadd.f32 %v4238_v58, %v3758_v4 }
 0xaed   :  { %3793 = vst [vmem:[#allocation1 + $0x2] ss:$9 sm:$0xff] %v3775_v26 }
 0xaee   :  { %3795 = vst [vmem:[#allocation1 + $0x3] ss:$9 sm:$0xff] %v3776_v54  ;;  %v3766_v29 = vadd.f32 %v3759_v17, %v3676_v41 }
 0xaef   :  { %3797 = vst [vmem:[#allocation1 + $0x4] ss:$9 sm:$0xff] %v3777_v0 }
 0xaf0   :  { %3799 = vst [vmem:[#allocation1 + $0x5] ss:$9 sm:$0xff] %v3778_v44  ;;  %v3769_v35 = vadd.f32 %v3766_v29, %v6304_v23 }
 0xaf1   :  { %3801 = vst [vmem:[#allocation1 + $0x6] ss:$9 sm:$0xff] %v3779_v61 }
 0xaf2   :  { %3803 = vst [vmem:[#allocation1 + $0x7] ss:$9 sm:$0xff] %v3780_v63  ;;  %v3781_v43 = vrot.slane %v3769_v35, 1  ;;  %v3782_v16 = vrot.slane %v3769_v35, 2  ;;  %v3783_v19 = vrot.slane %v3769_v35, 3  ;;  %v3784_v25 = vrot.slane %v3769_v35, 4 }
 0xaf3   :  { %v3761_v6 = vpop.f32.mrf.mxu1  ;;  %v3785_v12 = vrot.slane %v3769_v35, 5  ;;  %v3786_v55 = vrot.slane %v3769_v35, 6  ;;  %v3787_v23 = vrot.slane %v3769_v35, 7 }
 0xaf4   :  { %v3762_v52 = vadd.f32 %v4238_v58, %v3761_v6 }
 0xaf6   :  { %v3767_v33 = vadd.f32 %v3762_v52, %v3679_v34 }
 0xaf8   :  { %v3770_v15 = vadd.f32 %v3767_v33, %v6308_v42 }
 0xaf9   :  { %v3804_v24 = vld [vmem:[#allocation1] sm:$0xff] }
 0xafa   :  { %3822 = vst.msk [vmem:[%s6425_s20] sm:$0xff] %vm6634_vm8, %v3804_v24  ;;  %v3788_v45 = vrot.slane %v3770_v15, 1 }
 0xafb   :  { %3805 = vst [vmem:[#allocation1] ss:$9 sm:$0xff] %v3769_v35  ;;  %v3763_v39 = vpop.f32.mrf.mxu1 }
 0xb02   :  { %v3806_v37 = vld [vmem:[#allocation1] sm:$0xff] }
 0xb03   :  { %3807 = vst [vmem:[#allocation1] ss:$9 sm:$0xff] %v3781_v43 }
 0xb04   :  { %3808 = vst [vmem:[#allocation1 + $0x1] ss:$9 sm:$0xff] %v3782_v16 }
 0xb05   :  { %3809 = vst [vmem:[#allocation1 + $0x2] ss:$9 sm:$0xff] %v3783_v19 }
 0xb06   :  { %3810 = vst [vmem:[#allocation1 + $0x3] ss:$9 sm:$0xff] %v3784_v25 }
 0xb07   :  { %3811 = vst [vmem:[#allocation1 + $0x4] ss:$9 sm:$0xff] %v3785_v12 }
 0xb08   :  { %3812 = vst [vmem:[#allocation1 + $0x5] ss:$9 sm:$0xff] %v3786_v55 }
 0xb09   :  { %3813 = vst [vmem:[#allocation1 + $0x6] ss:$9 sm:$0xff] %v3787_v23 }
 0xb0a   :  { %3824 = vst.msk [vmem:[%s6425_s20 + $0x8] sm:$0x1] %vm3823_vm15, %v3806_v37 }
 0xb0b   :  { %3814 = vst [vmem:[#allocation1 + $0x7] ss:$9 sm:$0xff] %v3770_v15 }
 0xb12   :  { %v3815_v22 = vld [vmem:[#allocation1] sm:$0xff] }
 0xb13   :  { %3816 = vst [vmem:[#allocation1] ss:$9 sm:$0xff] %v3788_v45 }
 0xb14   :  { %3825 = vst.msk [vmem:[%s6425_s20 + $0x10] sm:$0xff] %vm6635_vm6, %v3815_v22 }
 0xb1a   :  { %v3817_v11 = vld [vmem:[#allocation1] sm:$0xff] }
 0xb1b   :  { %3826 = vst.msk [vmem:[%s6425_s20 + $0x18] sm:$0x1] %vm3823_vm15, %v3817_v11 }

</bundles_post_ra>
